<compile_context>
chip_gen: v5e
topology: v5e:2x2
jax: 0.10.0
libtpu: 0.0.40
codegen_flags: <defaults>
</compile_context>

<pallas_src>
import functools

import jax
import jax.numpy as jnp
from jax import lax
from jax.experimental import pallas as pl
from jax.experimental.pallas import tpu as pltpu


def _convlstm_kernel(comb_ref, w_ref, b_ref, c_ref, out_ref,
                     lhs_ref, acc_ref, *, H, W, K, C_tot, C_hid, Hp):
    """One batch element per grid step.

    comb_ref : (1, Hp, Wp, C_tot)       zero-padded [x ; h_cur], NHWC, bf16
    w_ref    : (K, K*C_tot, 4*C_hid)    packed conv weights, bf16
    b_ref    : (1, 4*C_hid)             conv bias, f32
    c_ref    : (1, H*W, C_hid)          current cell state (pixel-major), f32
    out_ref  : (1, H*W, 2*C_hid)        packed [h_next | c_next], f32
    lhs_ref  : (Hp*W, K*C_tot)          VMEM scratch: width-shifted panel, bf16
    acc_ref  : (H*W, 4*C_hid)           VMEM scratch: f32 matmul accumulator
    """
    # ---- Stage 1: build the width-shifted LHS panel once (K relayouts, not K*K).
    for kw in range(K):
        slab = comb_ref[0, :, kw:kw + W, :]                 # (Hp, W, C_tot) bf16
        lhs_ref[:, kw * C_tot:(kw + 1) * C_tot] = slab.reshape(Hp * W, C_tot)

    # ---- Stage 2: K matmuls with contraction depth K*C_tot on the MXU.
    # Row offsets kh*W are sublane-aligned for W % 8 == 0, so these slices
    # are cheap views of the scratch panel.
    for kh in range(K):
        lhs = lhs_ref[kh * W:kh * W + H * W, :]             # (H*W, K*C_tot) bf16
        contrib = jnp.dot(lhs, w_ref[kh],
                          preferred_element_type=jnp.float32)
        if kh == 0:
            acc_ref[...] = contrib
        else:
            acc_ref[...] += contrib

    # ---- Stage 3: epilogue — bias, gates, LSTM cell update (all f32).
    conv = acc_ref[...] + b_ref[...]                        # (H*W, 4*Ch)

    # Full-width transcendentals (EUP), lane-select between sigmoid and tanh.
    lane = lax.broadcasted_iota(jnp.int32, (H * W, 4 * C_hid), 1)
    act = jnp.where(lane < 3 * C_hid, jax.nn.sigmoid(conv), jnp.tanh(conv))

    i_g = act[:, 0 * C_hid:1 * C_hid]
    f_g = act[:, 1 * C_hid:2 * C_hid]
    o_g = act[:, 2 * C_hid:3 * C_hid]
    g_g = act[:, 3 * C_hid:4 * C_hid]

    c_cur = c_ref[0]                                        # (H*W, Ch) f32
    c_next = f_g * c_cur + i_g * g_g
    h_next = o_g * jnp.tanh(c_next)

    # Fused packed output: [h_next | c_next] along lanes (one writeback stream).
    out_ref[0, :, 0:C_hid] = h_next.astype(out_ref.dtype)
    out_ref[0, :, C_hid:2 * C_hid] = c_next.astype(out_ref.dtype)


def pack_convlstm_weights(weight_oihw, bias):
    """OIHW -> (K, K*C_tot, 4*Ch) bf16 panel + (1, 4*Ch) f32 bias.

    Do this once per cell; reuse across timesteps.
    """
    O, I, K, _ = weight_oihw.shape
    w_hwio = jnp.transpose(weight_oihw, (2, 3, 1, 0))       # (K, K, C_tot, 4*Ch)
    w_packed = w_hwio.reshape(K, K * I, O).astype(jnp.bfloat16)
    b2d = bias.reshape(1, O).astype(jnp.float32)
    return w_packed, b2d


def convlstm_cell_forward_nhwc(x_nhwc, h_nhwc, c_nhwc, w_packed, b2d,
                               kernel_size):
    """NHWC-native fast path (no layout transposes). Returns NHWC h/c."""
    B, H, W, Cin = x_nhwc.shape
    Ch = h_nhwc.shape[-1]
    K = kernel_size
    assert K % 2 == 1, "kernel_size must be odd for 'same' padding semantics"
    p = K // 2
    C_tot = Cin + Ch
    Hp, Wp = H + 2 * p, W + 2 * p

    # TODO(synk): for a recurrent scan, x/h could be passed unconcatenated and
    # assembled/zero-padded into a VMEM scratch in-kernel to avoid the HBM
    # round-trip of `combined` every step; kept in the wrapper for simplicity.
    combined = jnp.concatenate([x_nhwc, h_nhwc], axis=-1).astype(jnp.bfloat16)
    combined = jnp.pad(combined, ((0, 0), (p, p), (p, p), (0, 0)))
    c_rows = c_nhwc.reshape(B, H * W, Ch).astype(jnp.float32)

    kernel = functools.partial(_convlstm_kernel, H=H, W=W, K=K,
                               C_tot=C_tot, C_hid=Ch, Hp=Hp)

    flops = 2 * B * H * W * K * K * C_tot * 4 * Ch
    transcendentals = 5 * B * H * W * Ch
    bytes_accessed = (B * Hp * Wp * C_tot * 2          # combined (bf16)
                      + K * K * C_tot * 4 * Ch * 2     # weights (bf16)
                      + 4 * Ch * 4                     # bias
                      + B * H * W * Ch * 4             # c in
                      + B * H * W * 2 * Ch * 4)        # packed h/c out

    packed = pl.pallas_call(
        kernel,
        out_shape=jax.ShapeDtypeStruct((B, H * W, 2 * Ch), jnp.float32),
        grid_spec=pltpu.PrefetchScalarGridSpec(
            num_scalar_prefetch=0,
            grid=(B,),
            in_specs=[
                pl.BlockSpec((1, Hp, Wp, C_tot), lambda b: (b, 0, 0, 0)),
                pl.BlockSpec((K, K * C_tot, 4 * Ch), lambda b: (0, 0, 0)),
                pl.BlockSpec((1, 4 * Ch), lambda b: (0, 0)),
                pl.BlockSpec((1, H * W, Ch), lambda b: (b, 0, 0)),
            ],
            out_specs=pl.BlockSpec((1, H * W, 2 * Ch), lambda b: (b, 0, 0)),
            scratch_shapes=[
                pltpu.VMEM((Hp * W, K * C_tot), jnp.bfloat16),   # shifted panel
                pltpu.VMEM((H * W, 4 * Ch), jnp.float32),        # f32 accumulator
            ],
        ),
        compiler_params=pltpu.CompilerParams(
            dimension_semantics=("parallel",)),   # batch feeds v7x's 2 TCs
        cost_estimate=pl.CostEstimate(
            flops=flops, transcendentals=transcendentals,
            bytes_accessed=bytes_accessed),
    )(combined, w_packed, b2d, c_rows)

    hc = packed.reshape(B, H, W, 2 * Ch)
    return hc[..., :Ch], hc[..., Ch:]


def convlstm_cell_forward(x_nchw, h_nchw, c_nchw, weight_oihw, bias,
                          kernel_size):
    """PyTorch-layout entry point: NCHW in, NCHW out (matches the nn.Module)."""
    w_packed, b2d = pack_convlstm_weights(weight_oihw, bias)
    x_nhwc = jnp.transpose(x_nchw, (0, 2, 3, 1))
    h_nhwc = jnp.transpose(h_nchw, (0, 2, 3, 1))
    c_nhwc = jnp.transpose(c_nchw, (0, 2, 3, 1))
    h_next, c_next = convlstm_cell_forward_nhwc(x_nhwc, h_nhwc, c_nhwc,
                                                w_packed, b2d, kernel_size)
    return (jnp.transpose(h_next, (0, 3, 1, 2)),
            jnp.transpose(c_next, (0, 3, 1, 2)))


def _reference_forward(x, h, c, w_oihw, bias, kernel_size):
    """Pure-JAX f32 reference (mirrors the PyTorch forward) for verification."""
    p = kernel_size // 2
    combined = jnp.concatenate([x, h], axis=1)              # NCHW
    conv = lax.conv_general_dilated(
        combined, w_oihw, window_strides=(1, 1),
        padding=((p, p), (p, p)),
        dimension_numbers=("NCHW", "OIHW", "NCHW"))
    conv = conv + bias[None, :, None, None]
    cc_i, cc_f, cc_o, cc_g = jnp.split(conv, 4, axis=1)
    i = jax.nn.sigmoid(cc_i)
    f = jax.nn.sigmoid(cc_f)
    o = jax.nn.sigmoid(cc_o)
    g = jnp.tanh(cc_g)
    c_next = f * c + i * g
    h_next = o * jnp.tanh(c_next)
    return h_next, c_next


if __name__ == "__main__":
    # Small deterministic shapes consistent with the module.
    B, Cin, Ch, H, W, K = 2, 4, 32, 16, 16, 3

    key = jax.random.PRNGKey(0)
    kx, kh, kc, kw, kb = jax.random.split(key, 5)

    x = jax.random.normal(kx, (B, Cin, H, W), dtype=jnp.float32)
    h0 = jax.random.normal(kh, (B, Ch, H, W), dtype=jnp.float32)
    c0 = jax.random.normal(kc, (B, Ch, H, W), dtype=jnp.float32)

    # Deterministic parameter init mimicking PyTorch Conv2d default
    # (uniform in +/- 1/sqrt(fan_in)).
    fan_in = (Cin + Ch) * K * K
    bound = 1.0 / jnp.sqrt(jnp.float32(fan_in))
    w_oihw = jax.random.uniform(kw, (4 * Ch, Cin + Ch, K, K),
                                minval=-bound, maxval=bound,
                                dtype=jnp.float32)
    bias = jax.random.uniform(kb, (4 * Ch,), minval=-bound, maxval=bound,
                              dtype=jnp.float32)

    fwd = jax.jit(convlstm_cell_forward, static_argnums=5)
    h_next, c_next = fwd(x, h0, c0, w_oihw, bias, K)
    jax.block_until_ready((h_next, c_next))

    h_ref, c_ref = _reference_forward(x, h0, c0, w_oihw, bias, K)
    # bf16 MXU operands (f32 accumulation) -> tolerance loosened vs the pure
    # f32 reference, per review guidance.
    assert jnp.allclose(h_next, h_ref, rtol=3e-2, atol=3e-2)
    assert jnp.allclose(c_next, c_ref, rtol=3e-2, atol=3e-2)

    print("KERNEL_OK")
</pallas_src>

<mosaic_0001>
module attributes {stable_mosaic.version = 11 : i64} {
  func.func @_convlstm_kernel(%arg0: i32, %arg1: memref<1x18x18x36xbf16, #tpu.memory_space<vmem>>, %arg2: memref<3x108x128xbf16, #tpu.memory_space<vmem>>, %arg3: memref<1x128xf32, #tpu.memory_space<vmem>>, %arg4: memref<1x256x32xf32, #tpu.memory_space<vmem>>, %arg5: memref<1x256x64xf32, #tpu.memory_space<vmem>>, %arg6: memref<288x108xbf16, #tpu.memory_space<vmem>>, %arg7: memref<256x128xf32, #tpu.memory_space<vmem>>) attributes {dimension_semantics = [#tpu.dimension_semantics<parallel>], iteration_bounds = array<i64: 2>, scalar_prefetch = 0 : i64, scratch_operands = 2 : i64, tpu.core_type = #tpu.core_type<tc>, window_params = [{transform_indices = @transform_0, window_bounds = array<i64: 1, 18, 18, 36>}, {pipeline_mode = #tpu.pipeline_mode<synchronous>, transform_indices = @transform_1, window_bounds = array<i64: 3, 108, 128>}, {pipeline_mode = #tpu.pipeline_mode<synchronous>, transform_indices = @transform_2, window_bounds = array<i64: 1, 128>}, {transform_indices = @transform_3, window_bounds = array<i64: 1, 256, 32>}, {transform_indices = @transform_4, window_bounds = array<i64: 1, 256, 64>}]} {
    %c0 = arith.constant 0 : index
    %c0_0 = arith.constant 0 : index
    %c0_1 = arith.constant 0 : index
    %c0_2 = arith.constant 0 : index
    %0 = vector.load %arg1[%c0, %c0_0, %c0_1, %c0_2] : memref<1x18x18x36xbf16, #tpu.memory_space<vmem>>, vector<1x18x16x36xbf16>
    %1 = vector.shape_cast %0 : vector<1x18x16x36xbf16> to vector<18x16x36xbf16>
    %2 = vector.shape_cast %1 : vector<18x16x36xbf16> to vector<288x36xbf16>
    %c0_3 = arith.constant 0 : index
    %c0_4 = arith.constant 0 : index
    %3 = vector.load %arg6[%c0_3, %c0_4] : memref<288x108xbf16, #tpu.memory_space<vmem>>, vector<288x36xbf16>
    tpu.vector_store %arg6[%c0_3, %c0_4], %2 {strides = array<i32>} : memref<288x108xbf16, #tpu.memory_space<vmem>>, vector<288x36xbf16>,
    %c0_5 = arith.constant 0 : index
    %c0_6 = arith.constant 0 : index
    %c1 = arith.constant 1 : index
    %c0_7 = arith.constant 0 : index
    %4 = vector.load %arg1[%c0_5, %c0_6, %c1, %c0_7] : memref<1x18x18x36xbf16, #tpu.memory_space<vmem>>, vector<1x18x16x36xbf16>
    %5 = vector.shape_cast %4 : vector<1x18x16x36xbf16> to vector<18x16x36xbf16>
    %6 = vector.shape_cast %5 : vector<18x16x36xbf16> to vector<288x36xbf16>
    %c0_8 = arith.constant 0 : index
    %c36 = arith.constant 36 : index
    %7 = vector.load %arg6[%c0_8, %c36] : memref<288x108xbf16, #tpu.memory_space<vmem>>, vector<288x36xbf16>
    tpu.vector_store %arg6[%c0_8, %c36], %6 {strides = array<i32>} : memref<288x108xbf16, #tpu.memory_space<vmem>>, vector<288x36xbf16>,
    %c0_9 = arith.constant 0 : index
    %c0_10 = arith.constant 0 : index
    %c2 = arith.constant 2 : index
    %c0_11 = arith.constant 0 : index
    %8 = vector.load %arg1[%c0_9, %c0_10, %c2, %c0_11] : memref<1x18x18x36xbf16, #tpu.memory_space<vmem>>, vector<1x18x16x36xbf16>
    %9 = vector.shape_cast %8 : vector<1x18x16x36xbf16> to vector<18x16x36xbf16>
    %10 = vector.shape_cast %9 : vector<18x16x36xbf16> to vector<288x36xbf16>
    %c0_12 = arith.constant 0 : index
    %c72 = arith.constant 72 : index
    %11 = vector.load %arg6[%c0_12, %c72] : memref<288x108xbf16, #tpu.memory_space<vmem>>, vector<288x36xbf16>
    tpu.vector_store %arg6[%c0_12, %c72], %10 {strides = array<i32>} : memref<288x108xbf16, #tpu.memory_space<vmem>>, vector<288x36xbf16>,
    %c0_13 = arith.constant 0 : index
    %c0_14 = arith.constant 0 : index
    %12 = vector.load %arg6[%c0_13, %c0_14] : memref<288x108xbf16, #tpu.memory_space<vmem>>, vector<256x108xbf16>
    %c0_15 = arith.constant 0 : index
    %c0_16 = arith.constant 0 : index
    %c0_17 = arith.constant 0 : index
    %13 = vector.load %arg2[%c0_15, %c0_16, %c0_17] : memref<3x108x128xbf16, #tpu.memory_space<vmem>>, vector<1x108x128xbf16>
    %14 = vector.shape_cast %13 : vector<1x108x128xbf16> to vector<108x128xbf16>
    %cst = arith.constant dense<0.000000e+00> : vector<256x128xf32>
    %15 = tpu.matmul %12, %14, %cst {dimension_numbers = #tpu.dot_dimension_numbers<[1], [0], [0], [1], [0, 0, 1, 1], [], []>} : vector<256x108xbf16>, vector<108x128xbf16>, vector<256x128xf32> -> vector<256x128xf32>
    %c0_18 = arith.constant 0 : index
    %c0_19 = arith.constant 0 : index
    %16 = vector.load %arg7[%c0_18, %c0_19] : memref<256x128xf32, #tpu.memory_space<vmem>>, vector<256x128xf32>
    tpu.vector_store %arg7[%c0_18, %c0_19], %15 {strides = array<i32>} : memref<256x128xf32, #tpu.memory_space<vmem>>, vector<256x128xf32>,
    %c16 = arith.constant 16 : index
    %c0_20 = arith.constant 0 : index
    %17 = vector.load %arg6[%c16, %c0_20] : memref<288x108xbf16, #tpu.memory_space<vmem>>, vector<256x108xbf16>
    %c1_21 = arith.constant 1 : index
    %c0_22 = arith.constant 0 : index
    %c0_23 = arith.constant 0 : index
    %18 = vector.load %arg2[%c1_21, %c0_22, %c0_23] : memref<3x108x128xbf16, #tpu.memory_space<vmem>>, vector<1x108x128xbf16>
    %19 = vector.shape_cast %18 : vector<1x108x128xbf16> to vector<108x128xbf16>
    %cst_24 = arith.constant dense<0.000000e+00> : vector<256x128xf32>
    %20 = tpu.matmul %17, %19, %cst_24 {dimension_numbers = #tpu.dot_dimension_numbers<[1], [0], [0], [1], [0, 0, 1, 1], [], []>} : vector<256x108xbf16>, vector<108x128xbf16>, vector<256x128xf32> -> vector<256x128xf32>
    %c0_25 = arith.constant 0 : index
    %c0_26 = arith.constant 0 : index
    %21 = vector.load %arg7[%c0_25, %c0_26] : memref<256x128xf32, #tpu.memory_space<vmem>>, vector<256x128xf32>
    %22 = arith.addf %21, %20 : vector<256x128xf32>
    %c0_27 = arith.constant 0 : index
    %c0_28 = arith.constant 0 : index
    %23 = vector.load %arg7[%c0_27, %c0_28] : memref<256x128xf32, #tpu.memory_space<vmem>>, vector<256x128xf32>
    tpu.vector_store %arg7[%c0_27, %c0_28], %22 {strides = array<i32>} : memref<256x128xf32, #tpu.memory_space<vmem>>, vector<256x128xf32>,
    %c32 = arith.constant 32 : index
    %c0_29 = arith.constant 0 : index
    %24 = vector.load %arg6[%c32, %c0_29] : memref<288x108xbf16, #tpu.memory_space<vmem>>, vector<256x108xbf16>
    %c2_30 = arith.constant 2 : index
    %c0_31 = arith.constant 0 : index
    %c0_32 = arith.constant 0 : index
    %25 = vector.load %arg2[%c2_30, %c0_31, %c0_32] : memref<3x108x128xbf16, #tpu.memory_space<vmem>>, vector<1x108x128xbf16>
    %26 = vector.shape_cast %25 : vector<1x108x128xbf16> to vector<108x128xbf16>
    %cst_33 = arith.constant dense<0.000000e+00> : vector<256x128xf32>
    %27 = tpu.matmul %24, %26, %cst_33 {dimension_numbers = #tpu.dot_dimension_numbers<[1], [0], [0], [1], [0, 0, 1, 1], [], []>} : vector<256x108xbf16>, vector<108x128xbf16>, vector<256x128xf32> -> vector<256x128xf32>
    %c0_34 = arith.constant 0 : index
    %c0_35 = arith.constant 0 : index
    %28 = vector.load %arg7[%c0_34, %c0_35] : memref<256x128xf32, #tpu.memory_space<vmem>>, vector<256x128xf32>
    %29 = arith.addf %28, %27 : vector<256x128xf32>
    %c0_36 = arith.constant 0 : index
    %c0_37 = arith.constant 0 : index
    %30 = vector.load %arg7[%c0_36, %c0_37] : memref<256x128xf32, #tpu.memory_space<vmem>>, vector<256x128xf32>
    tpu.vector_store %arg7[%c0_36, %c0_37], %29 {strides = array<i32>} : memref<256x128xf32, #tpu.memory_space<vmem>>, vector<256x128xf32>,
    %c0_38 = arith.constant 0 : index
    %c0_39 = arith.constant 0 : index
    %31 = vector.load %arg7[%c0_38, %c0_39] : memref<256x128xf32, #tpu.memory_space<vmem>>, vector<256x128xf32>
    %c0_40 = arith.constant 0 : index
    %c0_41 = arith.constant 0 : index
    %32 = vector.load %arg3[%c0_40, %c0_41] : memref<1x128xf32, #tpu.memory_space<vmem>>, vector<1x128xf32>
    %33 = vector.broadcast %32 : vector<1x128xf32> to vector<256x128xf32>
    %34 = arith.addf %31, %33 : vector<256x128xf32>
    %35 = tpu.iota {dimensions = array<i32: 1>} : vector<256x128xi32>
    %c96_i32 = arith.constant 96 : i32
    %36 = vector.broadcast %c96_i32 : i32 to vector<256x128xi32>
    %37 = arith.cmpi slt, %35, %36 : vector<256x128xi32>
    %38 = arith.negf %34 : vector<256x128xf32>
    %39 = math.exp %38 : vector<256x128xf32>
    %cst_42 = arith.constant 1.000000e+00 : f32
    %40 = vector.broadcast %cst_42 : f32 to vector<256x128xf32>
    %41 = arith.addf %40, %39 : vector<256x128xf32>
    %42 = arith.divf %40, %41 : vector<256x128xf32>
    %43 = math.tanh %34 : vector<256x128xf32>
    %44 = arith.select %37, %42, %43 : vector<256x128xi1>, vector<256x128xf32>
    %45 = vector.extract_strided_slice %44 {offsets = [0, 0], sizes = [256, 32], strides = [1, 1]} : vector<256x128xf32> to vector<256x32xf32>
    %46 = vector.extract_strided_slice %44 {offsets = [0, 32], sizes = [256, 32], strides = [1, 1]} : vector<256x128xf32> to vector<256x32xf32>
    %47 = vector.extract_strided_slice %44 {offsets = [0, 64], sizes = [256, 32], strides = [1, 1]} : vector<256x128xf32> to vector<256x32xf32>
    %48 = vector.extract_strided_slice %44 {offsets = [0, 96], sizes = [256, 32], strides = [1, 1]} : vector<256x128xf32> to vector<256x32xf32>
    %c0_43 = arith.constant 0 : index
    %c0_44 = arith.constant 0 : index
    %c0_45 = arith.constant 0 : index
    %49 = vector.load %arg4[%c0_43, %c0_44, %c0_45] : memref<1x256x32xf32, #tpu.memory_space<vmem>>, vector<1x256x32xf32>
    %50 = vector.shape_cast %49 : vector<1x256x32xf32> to vector<256x32xf32>
    %51 = arith.mulf %46, %50 : vector<256x32xf32>
    %52 = arith.mulf %45, %48 : vector<256x32xf32>
    %53 = arith.addf %51, %52 : vector<256x32xf32>
    %54 = math.tanh %53 : vector<256x32xf32>
    %55 = arith.mulf %47, %54 : vector<256x32xf32>
    %c0_46 = arith.constant 0 : index
    %c0_47 = arith.constant 0 : index
    %c0_48 = arith.constant 0 : index
    %56 = vector.load %arg5[%c0_46, %c0_47, %c0_48] : memref<1x256x64xf32, #tpu.memory_space<vmem>>, vector<1x256x32xf32>
    %57 = vector.shape_cast %56 : vector<1x256x32xf32> to vector<256x32xf32>
    %58 = vector.shape_cast %55 : vector<256x32xf32> to vector<1x256x32xf32>
    tpu.vector_store %arg5[%c0_46, %c0_47, %c0_48], %58 {strides = array<i32>} : memref<1x256x64xf32, #tpu.memory_space<vmem>>, vector<1x256x32xf32>,
    %c0_49 = arith.constant 0 : index
    %c0_50 = arith.constant 0 : index
    %c32_51 = arith.constant 32 : index
    %59 = vector.load %arg5[%c0_49, %c0_50, %c32_51] : memref<1x256x64xf32, #tpu.memory_space<vmem>>, vector<1x256x32xf32>
    %60 = vector.shape_cast %59 : vector<1x256x32xf32> to vector<256x32xf32>
    %61 = vector.shape_cast %53 : vector<256x32xf32> to vector<1x256x32xf32>
    tpu.vector_store %arg5[%c0_49, %c0_50, %c32_51], %61 {strides = array<i32>} : memref<1x256x64xf32, #tpu.memory_space<vmem>>, vector<1x256x32xf32>,
    return
  }
  func.func @transform_0(%arg0: i32) -> (i32, i32, i32, i32) {
    %c0_i32 = arith.constant 0 : i32
    %c0_i32_0 = arith.constant 0 : i32
    %c0_i32_1 = arith.constant 0 : i32
    %c0_i32_2 = arith.constant 0 : i32
    return %arg0, %c0_i32, %c0_i32_0, %c0_i32_1 : i32, i32, i32, i32
  }
  func.func @transform_1(%arg0: i32) -> (i32, i32, i32) {
    %c0_i32 = arith.constant 0 : i32
    %c0_i32_0 = arith.constant 0 : i32
    %c0_i32_1 = arith.constant 0 : i32
    %c0_i32_2 = arith.constant 0 : i32
    return %c0_i32, %c0_i32_0, %c0_i32_1 : i32, i32, i32
  }
  func.func @transform_2(%arg0: i32) -> (i32, i32) {
    %c0_i32 = arith.constant 0 : i32
    %c0_i32_0 = arith.constant 0 : i32
    %c0_i32_1 = arith.constant 0 : i32
    return %c0_i32, %c0_i32_0 : i32, i32
  }
  func.func @transform_3(%arg0: i32) -> (i32, i32, i32) {
    %c0_i32 = arith.constant 0 : i32
    %c0_i32_0 = arith.constant 0 : i32
    %c0_i32_1 = arith.constant 0 : i32
    return %arg0, %c0_i32, %c0_i32_0 : i32, i32, i32
  }
  func.func @transform_4(%arg0: i32) -> (i32, i32, i32) {
    %c0_i32 = arith.constant 0 : i32
    %c0_i32_0 = arith.constant 0 : i32
    %c0_i32_1 = arith.constant 0 : i32
    return %arg0, %c0_i32, %c0_i32_0 : i32, i32, i32
  }
}

</mosaic_0001>

<bundles_post_ra>
// kernel: convlstm_cell_forward.1
= control target key start
LH: loop header
LB: loop body
LE: loop exit
PB: predicated region body
PF: predicated region fallthrough
CT: control target
= control target key end

     0   :  { %s4979_s15 = smov 0   ;;  %s7116_s0 = inlined_call_operand.vmem [shape: bf16[2,18,18,36], index: 0, kind: input, shape index: {}]   ;;  %s7117_s1 = inlined_call_operand.vmem [shape: bf16[3,108,128], index: 1, kind: input, shape index: {}]   ;;  %s7118_s2 = inlined_call_operand.vmem [shape: f32[1,128], index: 2, kind: input, shape index: {}]   ;;  %s7119_s3 = inlined_call_operand.vmem [shape: f32[2,256,32], index: 3, kind: input, shape index: {}]   ;;  %s7120_s4 = inlined_call_operand.vmem [shape: f32[2,256,64], index: 4, kind: output, shape index: {}]  }
   0x1 LB: > { %s4165_s16 = sadd.s32 4294967295, %s4948_s15   ;;  %p4169_p0 = scmp.ge.s32.totalorder %s4948_s15, 1  ;;  %s4948_s15 = sphi %s4979_s15, %s14_s15  }
   0x2   : > { %p172_p1 = scmp.lt.s32.totalorder %s4948_s15, 3 }
   0x4   : > { %p173_p2 = pnand %p4169_p0, %p172_p1 }
   0x6   : > { %176 = sbr.rel (%p173_p2) target bundleno = 1086 (0x43e), region = 36 }
   0xb   : > { %p203_p3 = scmp.lt.s32.totalorder %s4165_s16, 1  ;;  %vm346_vm0 = vsmask.f32 3328  ;;  %vm347_vm1 = vsmask.f32 7440  ;;  %s4950_s21 = smov 36  }
   0xc   : > { %vm5004_vm2 = vmor %vm346_vm0, %vm347_vm1  ;;  %vm255_vm3 = vcmask 289792   ;;  %vm1034_vm4 = vcmask 1042432   ;;  %vm1035_vm5 = vcmask 1046532   ;;  %s4951_s22 = smov 72   ;;  %vm889_vm7 = vcmask 584992   ;;  %s4952_s5 = smov 32  }
   0xd   : > { %s7203_s16 = smov (!%p203_p3, %s4165_s16), 1  ;;  %vm5202_vm6 = vmor %vm1034_vm4, %vm1035_vm5  ;;  %vm1524_vm8 = vcmask 1045504   ;;  %vm1271_vm9 = vcmask 880192   ;;  %vm1475_vm10 = vcmask 883712   ;;  %s4953_s8 = smov 64  }
   0xe   : > { %s4671_s17 = smul.u32 216, %s7203_s16  ;;  %s4579_s27 = sshll.u32 %s7203_s16, 8 }
   0xf   : > { %s5609_s30 = scalar_lea.vmem %s7119_s3, %s4579_s27  ;;  %s6913_s11 = scalar_lea.vmem %s7120_s4, %s4579_s27 }
  0x10   : > { %s4993_s20 = scalar_lea.vmem %s7116_s0, %s4671_s17 }
  0x11   : > { %v295_v0 = vld [vmem:[%s4993_s20 + $0xc] sm:$0xf]  ;;  %v296_v1 = vld [vmem:[%s4993_s20 + $0x10] sm:$0xf]  ;;  %v292_v2 = vld [vmem:[%s4993_s20] sm:$0xf] }
  0x12   : > { %v374_v3 = vshrl.u32 %v295_v0, 16  ;;  %v377_v4 = vshll.u32 %v295_v0, 16  ;;  %v383_v5 = vshll.u32 %v296_v1, 16  ;;  %v387_v6 = vshrl.u32 %v296_v1, 16  ;;  %v293_v7 = vld [vmem:[%s4993_s20 + $0x4] sm:$0xf] }
  0x13   : > { %v350_v8 = vshrl.u32 %v292_v2, 16  ;;  %v353_v9 = vshll.u32 %v292_v2, 16  ;;  %v359_v10 = vshll.u32 %v293_v7, 16  ;;  %v363_v11 = vshrl.u32 %v293_v7, 16  ;;  %v297_v12 = vld [vmem:[%s4993_s20 + $0x14] sm:$0x1] }
  0x14   : > { %v376_v13 = vrot.slane %v374_v3, 4  ;;  %v379_v14 = vrot.slane %v377_v4, 5  ;;  %v385_v15 = vrot.slane %v383_v5, 5  ;;  %v389_v16 = vrot.slane %v387_v6, 4  ;;  %v294_v17 = vld [vmem:[%s4993_s20 + $0x8] sm:$0x1] }
  0x15   : > { %v352_v18 = vrot.slane %v350_v8, 4  ;;  %v355_v19 = vrot.slane %v353_v9, 5  ;;  %v365_v20 = vrot.slane %v363_v11, 4  ;;  %v302_v21 = vld [vmem:[%s4993_s20 + $0x28] sm:$0xf]  ;;  %v393_v24 = vshll.u32 %v297_v12, 16 }
  0x16   : > { %v380_v22 = vor.u32 %v379_v14, %v376_v13  ;;  %v390_v23 = vor.u32 %v389_v16, %v385_v15  ;;  %v361_v27 = vrot.slane %v359_v10, 5  ;;  %v431_v28 = vshll.u32 %v302_v21, 16  ;;  %v301_v30 = vld [vmem:[%s4993_s20 + $0x24] sm:$0xf]  ;;  %v298_v35 = vld [vmem:[%s4993_s20 + $0x18] sm:$0xf] }
  0x17   : > { %v356_v26 = vor.u32 %v355_v19, %v352_v18  ;;  %v435_v29 = vshrl.u32 %v302_v21, 16  ;;  %v369_v32 = vshll.u32 %v294_v17, 16  ;;  %v395_v38 = vrot.slane %v393_v24, 5  ;;  %v299_v40 = vld [vmem:[%s4993_s20 + $0x1c] sm:$0xf] }
  0x18   : > { %v381_v31 = vrot.slane %v380_v22, 4  ;;  %v366_v34 = vor.u32 %v365_v20, %v361_v27  ;;  %v391_v37 = vrot.slane %v390_v23, 4  ;;  %v422_v39 = vshrl.u32 %v301_v30, 16  ;;  %v303_v42 = vld [vmem:[%s4993_s20 + $0x2c] sm:$0x1] }
  0x19   : > { %v357_v33 = vrot.slane %v356_v26, 4  ;;  %v5017_v43 = vrot.slane %v431_v28, 5  ;;  %v437_v44 = vrot.slane %v435_v29, 4  ;;  %v425_v45 = vshll.u32 %v301_v30, 16  ;;  %v307_v50 = vld [vmem:[%s4993_s20 + $0x3c] sm:$0xf] }
  0x1a   : > { %v386_v36 = vsel %vm5004_vm2, %v381_v31, %v385_v15  ;;  %v371_v46 = vrot.slane %v369_v32, 5  ;;  %v424_v47 = vrot.slane %v422_v39, 4  ;;  %v398_v48 = vshrl.u32 %v298_v35, 16  ;;  %v305_v58 = vld [vmem:[%s4993_s20 + $0x34] sm:$0xf] }
  0x1b   : > { %785 = vrot.lane.b32.xlu1 %v386_v36, %s4950_s21  ;;  %v362_v41 = vsel %vm5004_vm2, %v357_v33, %v361_v27  ;;  %v401_v49 = vshll.u32 %v298_v35, 16  ;;  %v367_v51 = vrot.slane %v366_v34, 4  ;;  %v427_v52 = vrot.slane %v425_v45, 5  ;;  %v300_v6 = vld [vmem:[%s4993_s20 + $0x20] sm:$0x1] }
  0x1c   : > { %781 = vrot.lane.b32.xlu0 %v362_v41, %s4950_s21  ;;  %v407_v53 = vshll.u32 %v299_v40, 16  ;;  %v411_v54 = vshrl.u32 %v299_v40, 16  ;;  %v396_v55 = vsel %vm5004_vm2, %v391_v37, %v395_v38  ;;  %v400_v56 = vrot.slane %v398_v48, 4  ;;  %v308_v10 = vld [vmem:[%s4993_s20 + $0x40] sm:$0xf] }
  0x1d   : > { %v403_v57 = vrot.slane %v401_v49, 5  ;;  %v438_v59 = vor.u32 %v437_v44, %v5017_v43  ;;  %v441_v60 = vshll.u32 %v303_v42, 16  ;;  %v470_v62 = vshrl.u32 %v307_v50, 16  ;;  %v311_v17 = vld [vmem:[%s4993_s20 + $0x4c] sm:$0xf] }
  0x1e   : > { %v413_v61 = vrot.slane %v411_v54, 4  ;;  %v428_v63 = vor.u32 %v427_v52, %v424_v47  ;;  %v409_v1 = vrot.slane %v407_v53, 5  ;;  %v473_v2 = vshll.u32 %v307_v50, 16  ;;  %v306_v18 = vld [vmem:[%s4993_s20 + $0x38] sm:$0x1] }
  0x1f   : > { %v404_v0 = vor.u32 %v403_v57, %v400_v56  ;;  %v372_v3 = vsel %vm5004_vm2, %v367_v51, %v371_v46  ;;  %v455_v4 = vshll.u32 %v305_v58, 16  ;;  %v459_v5 = vshrl.u32 %v305_v58, 16  ;;  %v304_v21 = vld [vmem:[%s4993_s20 + $0x30] sm:$0xf]  ;;  %v310_v24 = vld [vmem:[%s4993_s20 + $0x48] sm:$0xf] }
  0x20   : > { %v439_v8 = vrot.slane %v438_v59, 4  ;;  %v443_v9 = vrot.slane %v441_v60, 5  ;;  %v472_v11 = vrot.slane %v470_v62, 4  ;;  %v414_v12 = vor.u32 %v413_v61, %v409_v1  ;;  %v312_v47 = vld [vmem:[%s4993_s20 + $0x50] sm:$0x1] }
  0x21   : > { %v405_v7 = vrot.slane %v404_v0, 4  ;;  %v429_v13 = vrot.slane %v428_v63, 4  ;;  %v475_v15 = vrot.slane %v473_v2, 5  ;;  %v417_v16 = vshll.u32 %v300_v6, 16  ;;  %v316_v52 = vld [vmem:[%s4993_s20 + $0x60] sm:$0xf] }
  0x22   : > { %v5036_v19 = vrot.slane %v455_v4, 5  ;;  %v461_v20 = vrot.slane %v459_v5, 4  ;;  %v415_v22 = vrot.slane %v414_v12, 4  ;;  %v444_v26 = vsel %vm5004_vm2, %v439_v8, %v443_v9  ;;  %v314_v53 = vld [vmem:[%s4993_s20 + $0x58] sm:$0xf] }
  0x23   : > { %787 = vrot.lane.b32.xlu1 %v396_v55, %s4950_s21  ;;  %v410_v14 = vsel %vm5004_vm2, %v405_v7, %v409_v1  ;;  %v419_v23 = vrot.slane %v417_v16, 5  ;;  %v479_v27 = vshll.u32 %v308_v10, 16  ;;  %v503_v28 = vshll.u32 %v311_v17, 16  ;;  %v309_v58 = vld [vmem:[%s4993_s20 + $0x44] sm:$0x1] }
  0x24   : > { %783 = vrot.lane.b32.xlu0 %v372_v3, %s4950_s21  ;;  %789 = vrot.lane.b32.xlu2 %v410_v14, %s4950_s21  ;;  %v507_v29 = vshrl.u32 %v311_v17, 16  ;;  %v434_v30 = vsel %vm5004_vm2, %v429_v13, %v5017_v43  ;;  %v476_v31 = vor.u32 %v475_v15, %v472_v11  ;;  %v465_v32 = vshll.u32 %v306_v18, 16  ;;  %v313_v2 = vld [vmem:[%s4993_s20 + $0x54] sm:$0xf]  ;;  %v317_v8 = vld [vmem:[%s4993_s20 + $0x64] sm:$0xf] }
  0x25   : > { %v446_v33 = vshrl.u32 %v304_v21, 16  ;;  %v462_v34 = vor.u32 %v461_v20, %v5036_v19  ;;  %v494_v35 = vshrl.u32 %v310_v24, 16  ;;  %v497_v36 = vshll.u32 %v310_v24, 16  ;;  %v320_v11 = vld [vmem:[%s4993_s20 + $0x70] sm:$0xf] }
  0x26   : > { %v449_v37 = vshll.u32 %v304_v21, 16  ;;  %v483_v38 = vshrl.u32 %v308_v10, 16  ;;  %v420_v39 = vsel %vm5004_vm2, %v415_v22, %v419_v23  ;;  %v5049_v41 = vrot.slane %v503_v28, 5  ;;  %v315_v15 = vld [vmem:[%s4993_s20 + $0x5c] sm:$0x1] }
  0x27   : > { %v448_v40 = vrot.slane %v446_v33, 4  ;;  %v509_v42 = vrot.slane %v507_v29, 4  ;;  %v477_v44 = vrot.slane %v476_v31, 4  ;;  %v481_v45 = vrot.slane %v479_v27, 5  ;;  %v319_v20 = vld [vmem:[%s4993_s20 + $0x6c] sm:$0xf] }
  0x28   : > { %v451_v43 = vrot.slane %v449_v37, 5  ;;  %v467_v46 = vrot.slane %v465_v32, 5  ;;  %v463_v48 = vrot.slane %v462_v34, 4  ;;  %v496_v49 = vrot.slane %v494_v35, 4  ;;  %v226_v25 = vld [vmem:[%s4993_s20 + $0x28] sm:$0xf] }
  0x29   : > { %v499_v50 = vrot.slane %v497_v36, 5  ;;  %v485_v54 = vrot.slane %v483_v38, 4  ;;  %v510_v55 = vor.u32 %v509_v42, %v5049_v41  ;;  %v513_v56 = vshll.u32 %v312_v47, 16  ;;  %v325_v42 = vld [vmem:[%s4993_s20 + $0x84] sm:$0xf] }
  0x2a   : > { %v452_v51 = vor.u32 %v451_v43, %v448_v40  ;;  %v482_v59 = vsel %vm5004_vm2, %v477_v44, %v481_v45  ;;  %v542_v60 = vshrl.u32 %v316_v52, 16  ;;  %v545_v61 = vshll.u32 %v316_v52, 16  ;;  %v323_v47 = vld [vmem:[%s4993_s20 + $0x7c] sm:$0xf]  ;;  %263 = vst.msk [vmem:[#allocation2 + $0x1c] sm:$0xf] %vm255_vm3, %v226_v25 }
  0x2b   : > { %795 = vrot.lane.b32.xlu1 %v444_v26, %s4950_s21  ;;  %v468_v62 = vsel %vm5004_vm2, %v463_v48, %v467_v46  ;;  %v500_v63 = vor.u32 %v499_v50, %v496_v49  ;;  %v527_v0 = vshll.u32 %v314_v53, 16  ;;  %v531_v1 = vshrl.u32 %v314_v53, 16  ;;  %v318_v49 = vld [vmem:[%s4993_s20 + $0x68] sm:$0x1] }
  0x2c   : > { %793 = vrot.lane.b32.xlu0 %v434_v30, %s4950_s21  ;;  %791 = vrot.lane.b32.xlu2 %v420_v39, %s4950_s21  ;;  %v453_v57 = vrot.slane %v452_v51, 4  ;;  %v486_v4 = vor.u32 %v485_v54, %v481_v45  ;;  %v489_v5 = vshll.u32 %v309_v58, 16  ;;  %v511_v6 = vrot.slane %v510_v55, 4  ;;  %v322_v55 = vld [vmem:[%s4993_s20 + $0x78] sm:$0xf] }
  0x2d   : > { %v515_v7 = vrot.slane %v513_v56, 5  ;;  %v544_v9 = vrot.slane %v542_v60, 4  ;;  %v547_v10 = vrot.slane %v545_v61, 5  ;;  %v518_v12 = vshrl.u32 %v313_v2, 16 }
  0x2e   : > { %v458_v3 = vsel %vm5004_vm2, %v453_v57, %v5036_v19  ;;  %v521_v13 = vshll.u32 %v313_v2, 16  ;;  %v501_v14 = vrot.slane %v500_v63, 4  ;;  %v5072_v16 = vrot.slane %v527_v0, 5  ;;  %v326_v63 = vld [vmem:[%s4993_s20 + $0x88] sm:$0xf] }
  0x2f   : > { %v533_v17 = vrot.slane %v531_v1, 4  ;;  %v487_v18 = vrot.slane %v486_v4, 4  ;;  %v491_v19 = vrot.slane %v489_v5, 5  ;;  %v520_v21 = vrot.slane %v518_v12, 4  ;;  %v324_v12 = vld [vmem:[%s4993_s20 + $0x80] sm:$0x1] }
  0x30   : > { %v523_v22 = vrot.slane %v521_v13, 5  ;;  %v575_v23 = vshll.u32 %v320_v11, 16  ;;  %v579_v24 = vshrl.u32 %v320_v11, 16  ;;  %v516_v26 = vsel %vm5004_vm2, %v511_v6, %v515_v7  ;;  %v328_v13 = vld [vmem:[%s4993_s20 + $0x90] sm:$0xf] }
  0x31   : > { %v548_v27 = vor.u32 %v547_v10, %v544_v9  ;;  %v551_v28 = vshll.u32 %v317_v8, 16  ;;  %v537_v29 = vshll.u32 %v315_v15, 16  ;;  %v506_v30 = vsel %vm5004_vm2, %v501_v14, %v5049_v41  ;;  %v321_v41 = vld [vmem:[%s4993_s20 + $0x74] sm:$0x1] }
  0x32   : > { %v534_v31 = vor.u32 %v533_v17, %v5072_v16  ;;  %v566_v32 = vshrl.u32 %v319_v20, 16  ;;  %v569_v33 = vshll.u32 %v319_v20, 16  ;;  %v555_v34 = vshrl.u32 %v317_v8, 16  ;;  %v329_v9 = vld [vmem:[%s4993_s20 + $0x94] sm:$0xf] }
  0x33   : > { %801 = vrot.lane.b32.xlu1 %v482_v59, %s4950_s21  ;;  %v492_v35 = vsel %vm5004_vm2, %v487_v18, %v491_v19  ;;  %v524_v36 = vor.u32 %v523_v22, %v520_v21  ;;  %v5084_v37 = vrot.slane %v575_v23, 5  ;;  %v581_v38 = vrot.slane %v579_v24, 4 }
  0x34   : > { %799 = vrot.lane.b32.xlu0 %v468_v62, %s4950_s21  ;;  %797 = vrot.lane.b32.xlu2 %v458_v3, %s4950_s21  ;;  %v549_v39 = vrot.slane %v548_v27, 4  ;;  %v553_v40 = vrot.slane %v551_v28, 5  ;;  %v535_v43 = vrot.slane %v534_v31, 4  ;;  %v539_v44 = vrot.slane %v537_v29, 5 }
  0x35   : > { %v568_v45 = vrot.slane %v566_v32, 4  ;;  %v571_v46 = vrot.slane %v569_v33, 5  ;;  %v525_v48 = vrot.slane %v524_v36, 4  ;;  %v557_v50 = vrot.slane %v555_v34, 4  ;;  %v330_v33 = vld [vmem:[%s4993_s20 + $0x98] sm:$0x1] }
  0x36   : > { %v582_v51 = vor.u32 %v581_v38, %v5084_v37  ;;  %v585_v52 = vshll.u32 %v321_v41, 16  ;;  %v614_v53 = vshrl.u32 %v325_v42, 16  ;;  %v617_v54 = vshll.u32 %v325_v42, 16  ;;  %v332_v42 = vld [vmem:[%s4993_s20 + $0xa0] sm:$0xf] }
  0x37   : > { %v554_v56 = vsel %vm5004_vm2, %v549_v39, %v553_v40  ;;  %v599_v57 = vshll.u32 %v323_v47, 16  ;;  %v603_v58 = vshrl.u32 %v323_v47, 16  ;;  %v540_v59 = vsel %vm5004_vm2, %v535_v43, %v539_v44  ;;  %v331_v44 = vld [vmem:[%s4993_s20 + $0x9c] sm:$0xf] }
  0x38   : > { %v572_v60 = vor.u32 %v571_v46, %v568_v45  ;;  %v561_v61 = vshll.u32 %v318_v49, 16  ;;  %v530_v62 = vsel %vm5004_vm2, %v525_v48, %v5072_v16  ;;  %v558_v0 = vor.u32 %v557_v50, %v553_v40  ;;  %v334_v40 = vld [vmem:[%s4993_s20 + $0xa8] sm:$0xf]  ;;  %v327_v49 = vld [vmem:[%s4993_s20 + $0x8c] sm:$0x1] }
  0x39   : > { %v590_v1 = vshrl.u32 %v322_v55, 16  ;;  %v593_v2 = vshll.u32 %v322_v55, 16  ;;  %v583_v3 = vrot.slane %v582_v51, 4  ;;  %v587_v4 = vrot.slane %v585_v52, 5 }
  0x3a   : > { %v616_v5 = vrot.slane %v614_v53, 4  ;;  %v619_v6 = vrot.slane %v617_v54, 5  ;;  %v5104_v7 = vrot.slane %v599_v57, 5  ;;  %v605_v8 = vrot.slane %v603_v58, 4 }
  0x3b   : > { %807 = vrot.lane.b32.xlu1 %v516_v26, %s4950_s21  ;;  %v573_v10 = vrot.slane %v572_v60, 4  ;;  %v623_v11 = vshll.u32 %v326_v63, 16  ;;  %v559_v14 = vrot.slane %v558_v0, 4  ;;  %v563_v15 = vrot.slane %v561_v61, 5 }
  0x3c   : > { %805 = vrot.lane.b32.xlu0 %v506_v30, %s4950_s21  ;;  %803 = vrot.lane.b32.xlu2 %v492_v35, %s4950_s21  ;;  %v592_v16 = vrot.slane %v590_v1, 4  ;;  %v595_v17 = vrot.slane %v593_v2, 5  ;;  %v588_v18 = vsel %vm5004_vm2, %v583_v3, %v587_v4  ;;  %v620_v19 = vor.u32 %v619_v6, %v616_v5  ;;  %v335_v1 = vld [vmem:[%s4993_s20 + $0xac] sm:$0xf]  ;;  %v333_v2 = vld [vmem:[%s4993_s20 + $0xa4] sm:$0x1] }
  0x3d   : > { %v647_v20 = vshll.u32 %v329_v9, 16  ;;  %v651_v21 = vshrl.u32 %v329_v9, 16  ;;  %v606_v22 = vor.u32 %v605_v8, %v5104_v7  ;;  %v609_v23 = vshll.u32 %v324_v12, 16  ;;  %v338_v5 = vld [vmem:[%s4993_s20 + $0xb8] sm:$0xf] }
  0x3e   : > { %v638_v24 = vshrl.u32 %v328_v13, 16  ;;  %v641_v26 = vshll.u32 %v328_v13, 16  ;;  %v578_v27 = vsel %vm5004_vm2, %v573_v10, %v5084_v37  ;;  %v627_v28 = vshrl.u32 %v326_v63, 16  ;;  %v337_v10 = vld [vmem:[%s4993_s20 + $0xb4] sm:$0xf] }
  0x3f   : > { %v564_v29 = vsel %vm5004_vm2, %v559_v14, %v563_v15  ;;  %v596_v30 = vor.u32 %v595_v17, %v592_v16  ;;  %v621_v31 = vrot.slane %v620_v19, 4  ;;  %v625_v32 = vrot.slane %v623_v11, 5 }
  0x40   : > { %v5120_v34 = vrot.slane %v647_v20, 5  ;;  %v653_v35 = vrot.slane %v651_v21, 4  ;;  %v607_v36 = vrot.slane %v606_v22, 4  ;;  %v611_v37 = vrot.slane %v609_v23, 5 }
  0x41   : > { %v640_v38 = vrot.slane %v638_v24, 4  ;;  %v643_v39 = vrot.slane %v641_v26, 5  ;;  %v597_v41 = vrot.slane %v596_v30, 4  ;;  %v629_v43 = vrot.slane %v627_v28, 4 }
  0x42   : > { %v654_v45 = vor.u32 %v653_v35, %v5120_v34  ;;  %v657_v46 = vshll.u32 %v330_v33, 16  ;;  %v686_v47 = vshrl.u32 %v334_v40, 16  ;;  %v689_v48 = vshll.u32 %v334_v40, 16 }
  0x43   : > { %813 = vrot.lane.b32.xlu1 %v554_v56, %s4950_s21  ;;  %v626_v50 = vsel %vm5004_vm2, %v621_v31, %v625_v32  ;;  %v612_v51 = vsel %vm5004_vm2, %v607_v36, %v611_v37  ;;  %v644_v52 = vor.u32 %v643_v39, %v640_v38  ;;  %v671_v53 = vshll.u32 %v332_v42, 16  ;;  %v343_v31 = vld [vmem:[%s4993_s20 + $0xcc] sm:$0xf]  ;;  %v341_v36 = vld [vmem:[%s4993_s20 + $0xc4] sm:$0xf] }
  0x44   : > { %811 = vrot.lane.b32.xlu0 %v540_v59, %s4950_s21  ;;  %809 = vrot.lane.b32.xlu2 %v530_v62, %s4950_s21  ;;  %v675_v54 = vshrl.u32 %v332_v42, 16  ;;  %v662_v55 = vshrl.u32 %v331_v44, 16  ;;  %v665_v56 = vshll.u32 %v331_v44, 16  ;;  %v602_v57 = vsel %vm5004_vm2, %v597_v41, %v5104_v7  ;;  %v336_v41 = vld [vmem:[%s4993_s20 + $0xb0] sm:$0x1] }
  0x45   : > { %v630_v58 = vor.u32 %v629_v43, %v625_v32  ;;  %v633_v59 = vshll.u32 %v327_v49, 16  ;;  %v655_v60 = vrot.slane %v654_v45, 4  ;;  %v659_v61 = vrot.slane %v657_v46, 5  ;;  %v340_v42 = vld [vmem:[%s4993_s20 + $0xc0] sm:$0xf] }
  0x46   : > { %v688_v62 = vrot.slane %v686_v47, 4  ;;  %v691_v63 = vrot.slane %v689_v48, 5  ;;  %v645_v0 = vrot.slane %v644_v52, 4  ;;  %v5141_v3 = vrot.slane %v671_v53, 5 }
  0x47   : > { %v677_v4 = vrot.slane %v675_v54, 4  ;;  %v664_v6 = vrot.slane %v662_v55, 4  ;;  %v667_v7 = vrot.slane %v665_v56, 5  ;;  %v631_v8 = vrot.slane %v630_v58, 4  ;;  %v344_v54 = vld [vmem:[%s4993_s20 + $0xd0] sm:$0xf] }
  0x48   : > { %v635_v9 = vrot.slane %v633_v59, 5  ;;  %v660_v11 = vsel %vm5004_vm2, %v655_v60, %v659_v61  ;;  %v692_v12 = vor.u32 %v691_v63, %v688_v62  ;;  %v695_v13 = vshll.u32 %v335_v1, 16  ;;  %v342_v59 = vld [vmem:[%s4993_s20 + $0xc8] sm:$0x1] }
  0x49   : > { %v650_v14 = vsel %vm5004_vm2, %v645_v0, %v5120_v34  ;;  %v681_v15 = vshll.u32 %v333_v2, 16  ;;  %v719_v16 = vshll.u32 %v338_v5, 16  ;;  %v723_v17 = vshrl.u32 %v338_v5, 16 }
  0x4a   : > { %v710_v19 = vshrl.u32 %v337_v10, 16  ;;  %v713_v20 = vshll.u32 %v337_v10, 16  ;;  %v668_v21 = vor.u32 %v667_v7, %v664_v6  ;;  %v699_v22 = vshrl.u32 %v335_v1, 16 }
  0x4b   : > { %819 = vrot.lane.b32.xlu1 %v588_v18, %s4950_s21  ;;  %v678_v18 = vor.u32 %v677_v4, %v5141_v3  ;;  %v636_v23 = vsel %vm5004_vm2, %v631_v8, %v635_v9  ;;  %v693_v24 = vrot.slane %v692_v12, 4  ;;  %v697_v26 = vrot.slane %v695_v13, 5 }
  0x4c   : > { %817 = vrot.lane.b32.xlu0 %v578_v27, %s4950_s21  ;;  %815 = vrot.lane.b32.xlu2 %v564_v29, %s4950_s21  ;;  %v339_v27 = vld [vmem:[%s4993_s20 + $0xbc] sm:$0x1]  ;;  %v683_v28 = vrot.slane %v681_v15, 5  ;;  %v721_v29 = vrot.slane %v719_v16, 5  ;;  %v725_v30 = vrot.slane %v723_v17, 4  ;;  %v712_v33 = vrot.slane %v710_v19, 4 }
  0x4d   : > { %v679_v32 = vrot.slane %v678_v18, 4  ;;  %v715_v34 = vrot.slane %v713_v20, 5  ;;  %v669_v35 = vrot.slane %v668_v21, 4  ;;  %v701_v37 = vrot.slane %v699_v22, 4  ;;  %v927_v16 = vld [vmem:[%s4993_s20 + $0x4] sm:$0xf] }
  0x4e   : > { %v698_v38 = vsel %vm5004_vm2, %v693_v24, %v697_v26  ;;  %v758_v39 = vshrl.u32 %v343_v31, 16  ;;  %v761_v40 = vshll.u32 %v343_v31, 16  ;;  %v726_v43 = vor.u32 %v725_v30, %v721_v29  ;;  %v223_v17 = vld [vmem:[%s4993_s20 + $0x18] sm:$0xf]  ;;  %v221_v18 = vld [vmem:[%s4993_s20 + $0xc] sm:$0xf] }
  0x4f   : > { %v729_v44 = vshll.u32 %v339_v27, 16  ;;  %v743_v45 = vshll.u32 %v341_v36, 16  ;;  %v747_v46 = vshrl.u32 %v341_v36, 16  ;;  %v684_v47 = vsel %vm5004_vm2, %v679_v32, %v683_v28  ;;  %260 = vst.msk [vmem:[#allocation2 + $0x10] sm:$0xf] %vm255_vm3, %v223_v17 }
  0x50   : > { %v716_v48 = vor.u32 %v715_v34, %v712_v33  ;;  %v674_v49 = vsel %vm5004_vm2, %v669_v35, %v5141_v3  ;;  %v734_v52 = vshrl.u32 %v340_v42, 16  ;;  %v737_v53 = vshll.u32 %v340_v42, 16  ;;  %v219_v19 = vld [vmem:[%s4993_s20] sm:$0xf]  ;;  %258 = vst.msk [vmem:[#allocation2 + $0x8] sm:$0xf] %vm255_vm3, %v221_v18 }
  0x51   : > { %v760_v55 = vrot.slane %v758_v39, 4  ;;  %v763_v56 = vrot.slane %v761_v40, 5  ;;  %v731_v58 = vrot.slane %v729_v44, 5  ;;  %v745_v60 = vrot.slane %v743_v45, 5  ;;  %v345_v22 = vld [vmem:[%s4993_s20 + $0xd4] sm:$0x1] }
  0x52   : > { %v749_v61 = vrot.slane %v747_v46, 4  ;;  %v717_v62 = vrot.slane %v716_v48, 4  ;;  %v736_v1 = vrot.slane %v734_v52, 4  ;;  %v739_v2 = vrot.slane %v737_v53, 5  ;;  %256 = vst.msk [vmem:[#allocation2] sm:$0xf] %vm255_vm3, %v219_v19 }
  0x53   : > { %825 = vrot.lane.b32.xlu1 %v626_v50, %s4950_s21  ;;  %v702_v50 = vor.u32 %v701_v37, %v697_v26  ;;  %v764_v3 = vor.u32 %v763_v56, %v760_v55  ;;  %v767_v4 = vshll.u32 %v344_v54, 16  ;;  %v753_v5 = vshll.u32 %v342_v59, 16  ;;  %v928_v24 = vld [vmem:[%s4993_s20 + $0x8] sm:$0x1]  ;;  %v926_v28 = vld [vmem:[%s4993_s20] sm:$0xe] }
  0x54   : > { %823 = vrot.lane.b32.xlu0 %v612_v51, %s4950_s21  ;;  %821 = vrot.lane.b32.xlu2 %v602_v57, %s4950_s21  ;;  %v705_v51 = vshll.u32 %v336_v41, 16  ;;  %v727_v57 = vrot.slane %v726_v43, 4  ;;  %v750_v7 = vor.u32 %v749_v61, %v745_v60  ;;  %v722_v8 = vsel %vm5004_vm2, %v717_v62, %v721_v29  ;;  %v930_v35 = vld [vmem:[%s4993_s20 + $0x10] sm:$0xf]  ;;  %v224_v36 = vld [vmem:[%s4993_s20 + $0x1c] sm:$0xf] }
  0x55   : > { %v703_v63 = vrot.slane %v702_v50, 4  ;;  %v771_v9 = vshrl.u32 %v344_v54, 16  ;;  %v765_v12 = vrot.slane %v764_v3, 4  ;;  %v769_v13 = vrot.slane %v767_v4, 5  ;;  %261 = vst.msk [vmem:[#allocation2 + $0x14] sm:$0xf] %vm255_vm3, %v224_v36 }
  0x56   : > { %v707_v0 = vrot.slane %v705_v51, 5  ;;  %v732_v6 = vsel %vm5004_vm2, %v727_v57, %v731_v58  ;;  %v751_v15 = vrot.slane %v750_v7, 4  ;;  %v1039_v26 = vrot.slane %v927_v16, 5  ;;  %v220_v39 = vld [vmem:[%s4993_s20 + $0x4] sm:$0xf]  ;;  %v3202_v37 = vld [vmem:[%s5609_s30 + $0x10] sm:$0xff] }
  0x57   : > { %v773_v21 = vrot.slane %v771_v9, 4  ;;  %v777_v31 = vshll.u32 %v345_v22, 16  ;;  %v1042_v32 = vrot.slane %v928_v24, 5  ;;  %v4175_v34 = vrot.slane %v926_v28, 9  ;;  %257 = vst.msk [vmem:[#allocation2 + $0x4] sm:$0xf] %vm255_vm3, %v220_v39 }
  0x58   : > { %v708_v10 = vsel %vm5004_vm2, %v703_v63, %v707_v0  ;;  %v1041_v33 = vrot.slane %v1039_v26, 4  ;;  %v932_v43 = vld [vmem:[%s4993_s20 + $0x18] sm:$0xe]  ;;  %v1046_v44 = vrot.slane %v930_v35, 5  ;;  %v933_v46 = vld [vmem:[%s4993_s20 + $0x1c] sm:$0xf] }
  0x59   : > { %v774_v30 = vor.u32 %v773_v21, %v769_v13  ;;  %v779_v41 = vrot.slane %v777_v31, 5  ;;  %v1040_v45 = vsel %vm5202_vm6, %v4175_v34, %v1039_v26  ;;  %v929_v50 = vld [vmem:[%s4993_s20 + $0xc] sm:$0xe]  ;;  %v1053_v51 = vrot.slane %v933_v46, 5  ;;  %v227_v54 = vld [vmem:[%s4993_s20 + $0x30] sm:$0xf] }
  0x5a   : > { %v1043_v42 = vsel %vm5202_vm6, %v1041_v33, %v1042_v32  ;;  %v1048_v52 = vrot.slane %v1046_v44, 4  ;;  %264 = vst.msk [vmem:[#allocation2 + $0x20] sm:$0xf] %vm255_vm3, %v227_v54  ;;  %v225_v55 = vld [vmem:[%s4993_s20 + $0x24] sm:$0xf]  ;;  %v4176_v56 = vrot.slane %v929_v50, 9 }
  0x5b   : > { %831 = vrot.lane.b32.xlu1 %v660_v11, %s4950_s21  ;;  %v740_v11 = vor.u32 %v739_v2, %v736_v1  ;;  %v775_v40 = vrot.slane %v774_v30, 4  ;;  %262 = vst.msk [vmem:[#allocation2 + $0x18] sm:$0xf] %vm255_vm3, %v225_v55  ;;  %v962_v59 = vld [vmem:[%s4993_s20 + $0x90] sm:$0xe]  ;;  %v1055_v9 = vrot.slane %v1053_v51, 4 }
  0x5c   : > { %829 = vrot.lane.b32.xlu0 %v650_v14, %s4950_s21  ;;  %827 = vrot.lane.b32.xlu2 %v636_v23, %s4950_s21  ;;  %v755_v14 = vrot.slane %v753_v5, 5  ;;  %v770_v23 = vsel %vm5004_vm2, %v765_v12, %v769_v13  ;;  %v963_v61 = vld [vmem:[%s4993_s20 + $0x94] sm:$0xf]  ;;  %v935_v62 = vld [vmem:[%s4993_s20 + $0x24] sm:$0xe]  ;;  %v1047_v0 = vsel %vm5202_vm6, %v4176_v56, %v1046_v44  ;;  %v4187_v2 = vrot.slane %v962_v59, 9 }
  0x5d   : > { %v741_v20 = vrot.slane %v740_v11, 4  ;;  %v780_v48 = vsel %vm5004_vm2, %v775_v40, %v779_v41  ;;  %v936_v63 = vld [vmem:[%s4993_s20 + $0x28] sm:$0xf]  ;;  %v934_v1 = vld [vmem:[%s4993_s20 + $0x20] sm:$0x1]  ;;  %v1123_v3 = vrot.slane %v963_v61, 5 }
  0x5e   : > { %v756_v27 = vsel %vm5004_vm2, %v751_v15, %v755_v14  ;;  %v4178_v4 = vrot.slane %v935_v62, 9  ;;  %v1060_v5 = vrot.slane %v936_v63, 5  ;;  %v229_v7 = vld [vmem:[%s4993_s20 + $0x3c] sm:$0xf]  ;;  %v938_v14 = vld [vmem:[%s4993_s20 + $0x30] sm:$0xe] }
  0x5f   : > { %v746_v29 = vsel %vm5004_vm2, %v741_v20, %v745_v60  ;;  %266 = vst.msk [vmem:[#allocation2 + $0x28] sm:$0xf] %vm255_vm3, %v229_v7  ;;  %v1124_v12 = vsel %vm5202_vm6, %v4187_v2, %v1123_v3  ;;  %v939_v15 = vld [vmem:[%s4993_s20 + $0x34] sm:$0xf]  ;;  %v937_v16 = vld [vmem:[%s4993_s20 + $0x2c] sm:$0x1] }
  0x60   : > { %v1061_v13 = vsel %vm5202_vm6, %v4178_v4, %v1060_v5  ;;  %v964_v18 = vld [vmem:[%s4993_s20 + $0x98] sm:$0x1]  ;;  %v4179_v19 = vrot.slane %v938_v14, 9  ;;  %v1067_v20 = vrot.slane %v939_v15, 5  ;;  %v233_v21 = vld [vmem:[%s4993_s20 + $0x54] sm:$0xf] }
  0x61   : > { %v1063_v24 = vrot.slane %v937_v16, 5  ;;  %v966_v26 = vld [vmem:[%s4993_s20 + $0xa0] sm:$0xf]  ;;  %270 = vst.msk [vmem:[#allocation2 + $0x38] sm:$0xf] %vm255_vm3, %v233_v21  ;;  %v1125_v28 = vrot.slane %v1123_v3, 4 }
  0x62   : > { %v232_v30 = vld [vmem:[%s4993_s20 + $0x4c] sm:$0xf]  ;;  %v231_v32 = vld [vmem:[%s4993_s20 + $0x48] sm:$0xf]  ;;  %v1068_v33 = vsel %vm5202_vm6, %v4179_v19, %v1067_v20  ;;  %v1130_v34 = vrot.slane %v966_v26, 5 }
  0x63   : > { %837 = vrot.lane.b32.xlu1 %v698_v38, %s4950_s21  ;;  %v222_v38 = vld [vmem:[%s4993_s20 + $0x10] sm:$0xf]  ;;  %v967_v36 = vld [vmem:[%s4993_s20 + $0xa4] sm:$0x1]  ;;  %269 = vst.msk [vmem:[#allocation2 + $0x34] sm:$0xf] %vm255_vm3, %v232_v30 }
  0x64   : > { %835 = vrot.lane.b32.xlu0 %v684_v47, %s4950_s21  ;;  %833 = vrot.lane.b32.xlu2 %v674_v49, %s4950_s21  ;;  %259 = vst.msk [vmem:[#allocation2 + $0xc] sm:$0xf] %vm255_vm3, %v222_v38  ;;  %v931_v47 = vld [vmem:[%s4993_s20 + $0x14] sm:$0x1]  ;;  %v4177_v49 = vrot.slane %v932_v43, 9  ;;  %v1132_v41 = vrot.slane %v1130_v34, 4 }
  0x65   : > { %v1049_v53 = vrot.slane %v931_v47, 5  ;;  %v965_v38 = vld [vmem:[%s4993_s20 + $0x9c] sm:$0xe]  ;;  %268 = vst.msk [vmem:[#allocation2 + $0x30] sm:$0xf] %vm255_vm3, %v231_v32 }
  0x66   : > { %v1054_v58 = vsel %vm5202_vm6, %v4177_v49, %v1053_v51  ;;  %v940_v40 = vld [vmem:[%s4993_s20 + $0x38] sm:$0x1]  ;;  %v236_v43 = vld [vmem:[%s4993_s20 + $0x64] sm:$0xf]  ;;  %v942_v46 = vld [vmem:[%s4993_s20 + $0x40] sm:$0xf] }
  0x67   : > { %v1050_v60 = vsel %vm5202_vm6, %v1048_v52, %v1049_v53  ;;  %273 = vst.msk [vmem:[#allocation2 + $0x44] sm:$0xf] %vm255_vm3, %v236_v43  ;;  %v1070_v49 = vrot.slane %v940_v40, 5  ;;  %v235_v50 = vld [vmem:[%s4993_s20 + $0x60] sm:$0xf]  ;;  %v1074_v54 = vrot.slane %v942_v46, 5 }
  0x68   : > { %v234_v52 = vld [vmem:[%s4993_s20 + $0x58] sm:$0xf]  ;;  %v944_v55 = vld [vmem:[%s4993_s20 + $0x48] sm:$0xe]  ;;  %v945_v56 = vld [vmem:[%s4993_s20 + $0x4c] sm:$0xf] }
  0x69   : > { %272 = vst.msk [vmem:[#allocation2 + $0x40] sm:$0xf] %vm255_vm3, %v235_v50  ;;  %v941_v59 = vld [vmem:[%s4993_s20 + $0x3c] sm:$0xe]  ;;  %v1081_v61 = vrot.slane %v945_v56, 5 }
  0x6a   : > { %271 = vst.msk [vmem:[#allocation2 + $0x3c] sm:$0xf] %vm255_vm3, %v234_v52  ;;  %v239_v62 = vld [vmem:[%s4993_s20 + $0x78] sm:$0xf]  ;;  %v969_v2 = vld [vmem:[%s4993_s20 + $0xac] sm:$0xf] }
  0x6b   : > { %843 = vrot.lane.b32.xlu1 %v732_v6, %s4950_s21  ;;  %v230_v6 = vld [vmem:[%s4993_s20 + $0x40] sm:$0xf]  ;;  %276 = vst.msk [vmem:[#allocation2 + $0x50] sm:$0xf] %vm255_vm3, %v239_v62  ;;  %v4180_v4 = vrot.slane %v941_v59, 9 }
  0x6c   : > { %841 = vrot.lane.b32.xlu0 %v722_v8, %s4950_s21  ;;  %839 = vrot.lane.b32.xlu2 %v708_v10, %s4950_s21  ;;  %267 = vst.msk [vmem:[#allocation2 + $0x2c] sm:$0xf] %vm255_vm3, %v230_v6  ;;  %v228_v8 = vld [vmem:[%s4993_s20 + $0x34] sm:$0xf]  ;;  %v1056_v10 = vrot.slane %v934_v1, 5 }
  0x6d   : > { %265 = vst.msk [vmem:[#allocation2 + $0x24] sm:$0xf] %vm255_vm3, %v228_v8  ;;  %v237_v7 = vld [vmem:[%s4993_s20 + $0x6c] sm:$0xf]  ;;  %v1075_v14 = vsel %vm5202_vm6, %v4180_v4, %v1074_v54  ;;  %v946_v15 = vld [vmem:[%s4993_s20 + $0x50] sm:$0x1] }
  0x6e   : > { %v1057_v17 = vsel %vm5202_vm6, %v1055_v9, %v1056_v10  ;;  %v1137_v9 = vrot.slane %v969_v2, 5  ;;  %v242_v10 = vld [vmem:[%s4993_s20 + $0x88] sm:$0xf]  ;;  %274 = vst.msk [vmem:[#allocation2 + $0x48] sm:$0xf] %vm255_vm3, %v237_v7 }
  0x6f   : > { %279 = vst.msk [vmem:[#allocation2 + $0x5c] sm:$0xf] %vm255_vm3, %v242_v10  ;;  %v949_v32 = vld [vmem:[%s4993_s20 + $0x5c] sm:$0x1]  ;;  %v951_v46 = vld [vmem:[%s4993_s20 + $0x64] sm:$0xf] }
  0x70   : > { %v1139_v16 = vrot.slane %v1137_v9, 4  ;;  %v1095_v50 = vrot.slane %v951_v46, 5  ;;  %v973_v52 = vld [vmem:[%s4993_s20 + $0xbc] sm:$0x1]  ;;  %v4283_v2 = vld [vmem:[%s7117_s1 + $0x30] sm:$0xf] }
  0x71   : > { %v4603_v4 = vld [vmem:[%s7117_s1 + $0x30] sm:$0x30]  ;;  %v5480_v46 = vld [vmem:[%s7117_s1 + $0x58] sm:$0xff] }
  0x73   : > { %849 = vrot.lane.b32.xlu1 %v770_v23, %s4950_s21  ;;  %v1062_v23 = vrot.slane %v1060_v5, 4  ;;  %v238_v5 = vld [vmem:[%s4993_s20 + $0x70] sm:$0xf] }
  0x74   : > { %847 = vrot.lane.b32.xlu0 %v756_v27, %s4950_s21  ;;  %845 = vrot.lane.b32.xlu2 %v746_v29, %s4950_s21  ;;  %v1126_v29 = vrot.slane %v964_v18, 5  ;;  %275 = vst.msk [vmem:[#allocation2 + $0x4c] sm:$0xf] %vm255_vm3, %v238_v5  ;;  %v251_v5 = vld [vmem:[%s4993_s20 + $0xc0] sm:$0xf] }
  0x75   : > { %v1064_v35 = vsel %vm5202_vm6, %v1062_v23, %v1063_v24  ;;  %v1084_v23 = vrot.slane %v946_v15, 5  ;;  %v241_v24 = vld [vmem:[%s4993_s20 + $0x84] sm:$0xf]  ;;  %288 = vst.msk [vmem:[#allocation2 + $0x80] sm:$0xf] %vm255_vm3, %v251_v5  ;;  %v4602_v15 = vld [vmem:[%s7117_s1 + $0x28] sm:$0xff] }
  0x76   : > { %v1127_v39 = vsel %vm5202_vm6, %v1125_v28, %v1126_v29  ;;  %v245_v29 = vld [vmem:[%s4993_s20 + $0x9c] sm:$0xf]  ;;  %278 = vst.msk [vmem:[#allocation2 + $0x58] sm:$0xf] %vm255_vm3, %v241_v24  ;;  %v975_v5 = vld [vmem:[%s4993_s20 + $0xc4] sm:$0xf] }
  0x77   : > { %282 = vst.msk [vmem:[#allocation2 + $0x68] sm:$0xf] %vm255_vm3, %v245_v29 }
  0x7b   : > { %1165 = vrot.lane.b32.xlu1 %v1043_v42, %s4951_s22  ;;  %v1133_v42 = vrot.slane %v967_v36, 5 }
  0x7c   : > { %1163 = vrot.lane.b32.xlu0 %v1040_v45, %s4951_s22  ;;  %851 = vrot.lane.b32.xlu2 %v780_v48, %s4950_s21  ;;  %v4188_v45 = vrot.slane %v965_v38, 9  ;;  %v1069_v48 = vrot.slane %v1067_v20, 4  ;;  %v948_v20 = vld [vmem:[%s4993_s20 + $0x58] sm:$0xf]  ;;  %v1091_v38 = vrot.slane %v949_v32, 5 }
  0x7d   : > { %v1134_v53 = vsel %vm5202_vm6, %v1132_v41, %v1133_v42  ;;  %v244_v42 = vld [vmem:[%s4993_s20 + $0x94] sm:$0xf] }
  0x7e   : > { %v790_v57 = vpop.permute.xlu2 %789  ;;  %v1131_v25 = vsel %vm5202_vm6, %v4188_v45, %v1130_v34  ;;  %v947_v34 = vld [vmem:[%s4993_s20 + $0x54] sm:$0xe]  ;;  %v950_v45 = vld [vmem:[%s4993_s20 + $0x60] sm:$0xe]  ;;  %281 = vst.msk [vmem:[#allocation2 + $0x64] sm:$0xf] %vm255_vm3, %v244_v42 }
  0x7f   : > { %894 = vst.msk [vmem:[#allocation2 + $0x10] sm:$0xf] %vm889_vm7, %v790_v57  ;;  %v943_v57 = vld [vmem:[%s4993_s20 + $0x44] sm:$0x1]  ;;  %v4182_v41 = vrot.slane %v947_v34, 9 }
  0x80   : > { %v1077_v1 = vrot.slane %v943_v57, 5  ;;  %v1147_v57 = vrot.slane %v973_v52, 5  ;;  %v5453_v34 = vld [vmem:[%s7117_s1 + $0x60] sm:$0xff]  ;;  %v955_v42 = vld [vmem:[%s4993_s20 + $0x74] sm:$0x1] }
  0x81   : > { %v960_v52 = vld [vmem:[%s4993_s20 + $0x88] sm:$0xf] }
  0x83   : > { %1171 = vrot.lane.b32.xlu1 %v1054_v58, %s4951_s22  ;;  %v1071_v58 = vsel %vm5202_vm6, %v1069_v48, %v1070_v49 }
  0x84   : > { %1169 = vrot.lane.b32.xlu0 %v1050_v60, %s4951_s22  ;;  %1167 = vrot.lane.b32.xlu2 %v1047_v0, %s4951_s22  ;;  %v4181_v60 = vrot.slane %v944_v55, 9  ;;  %v1076_v0 = vrot.slane %v1074_v54, 4  ;;  %v971_v54 = vld [vmem:[%s4993_s20 + $0xb4] sm:$0xe] }
  0x86   : > { %v792_v11 = vpop.permute.xlu2 %791  ;;  %v1082_v8 = vsel %vm5202_vm6, %v4181_v60, %v1081_v61  ;;  %v247_v60 = vld [vmem:[%s4993_s20 + $0xa8] sm:$0xf] }
  0x87   : > { %895 = vst.msk [vmem:[#allocation2 + $0x14] sm:$0xf] %vm889_vm7, %v792_v11  ;;  %v1078_v11 = vsel %vm5202_vm6, %v1076_v0, %v1077_v1  ;;  %v1097_v0 = vrot.slane %v1095_v50, 4 }
  0x88   : > { %284 = vst.msk [vmem:[#allocation2 + $0x70] sm:$0xf] %vm255_vm3, %v247_v60 }
  0x8b   : > { %1211 = vrot.lane.b32.xlu1 %v1124_v12, %s4951_s22  ;;  %v970_v12 = vld [vmem:[%s4993_s20 + $0xb0] sm:$0x1] }
  0x8c   : > { %1175 = vrot.lane.b32.xlu0 %v1061_v13, %s4951_s22  ;;  %1173 = vrot.lane.b32.xlu2 %v1057_v17, %s4951_s22  ;;  %v968_v13 = vld [vmem:[%s4993_s20 + $0xa8] sm:$0xe]  ;;  %v1140_v17 = vrot.slane %v970_v12, 5  ;;  %v250_v12 = vld [vmem:[%s4993_s20 + $0xb8] sm:$0xf] }
  0x8d   : > { %v786_v22 = vpop.permute.xlu1 %785  ;;  %v4189_v19 = vrot.slane %v968_v13, 9  ;;  %v249_v13 = vld [vmem:[%s4993_s20 + $0xb4] sm:$0xf]  ;;  %287 = vst.msk [vmem:[#allocation2 + $0x7c] sm:$0xf] %vm255_vm3, %v250_v12 }
  0x8e   : > { %892 = vst.msk [vmem:[#allocation2 + $0x8] sm:$0xf] %vm889_vm7, %v786_v22  ;;  %v782_v27 = vpop.permute.xlu0 %781  ;;  %v798_v31 = vpop.permute.xlu2 %797  ;;  %v1083_v22 = vrot.slane %v1081_v61, 4  ;;  %v1141_v28 = vsel %vm5202_vm6, %v1139_v16, %v1140_v17  ;;  %v246_v61 = vld [vmem:[%s4993_s20 + $0xa0] sm:$0xf] }
  0x8f   : > { %890 = vst.msk [vmem:[#allocation2] sm:$0xf] %vm889_vm7, %v782_v27  ;;  %v240_v27 = vld [vmem:[%s4993_s20 + $0x7c] sm:$0xf]  ;;  %v1138_v30 = vsel %vm5202_vm6, %v4189_v19, %v1137_v9  ;;  %v4601_v16 = vld [vmem:[%s7117_s1 + $0x20] sm:$0xff] }
  0x90   : > { %898 = vst.msk [vmem:[#allocation2 + $0x20] sm:$0xf] %vm889_vm7, %v798_v31  ;;  %v1088_v31 = vrot.slane %v948_v20, 5  ;;  %v4405_v17 = vld [vmem:[%s7117_s1 + $0x68] sm:$0xf] }
  0x91   : > { %277 = vst.msk [vmem:[#allocation2 + $0x54] sm:$0xf] %vm255_vm3, %v240_v27  ;;  %v4527_v19 = vld [vmem:[%s7117_s1 + $0xa0] sm:$0xf] }
  0x92   : > { %v1090_v36 = vrot.slane %v1088_v31, 4  ;;  %283 = vst.msk [vmem:[#allocation2 + $0x6c] sm:$0xf] %vm255_vm3, %v246_v61 }
  0x93   : > { %1179 = vrot.lane.b32.xlu1 %v1068_v33, %s4951_s22  ;;  %v1085_v33 = vsel %vm5202_vm6, %v1083_v22, %v1084_v23  ;;  %v254_v22 = vld [vmem:[%s4993_s20 + $0xd0] sm:$0xf]  ;;  %286 = vst.msk [vmem:[#allocation2 + $0x78] sm:$0xf] %vm255_vm3, %v249_v13  ;;  %v4620_v13 = vld [vmem:[%s7117_s1 + $0x38] sm:$0xff] }
  0x94   : > { %1177 = vrot.lane.b32.xlu0 %v1064_v35, %s4951_s22  ;;  %1213 = vrot.lane.b32.xlu2 %v1127_v39, %s4951_s22  ;;  %v972_v39 = vld [vmem:[%s4993_s20 + $0xb8] sm:$0xf]  ;;  %v1092_v48 = vsel %vm5202_vm6, %v1090_v36, %v1091_v38  ;;  %291 = vst.msk [vmem:[#allocation2 + $0x8c] sm:$0xf] %vm255_vm3, %v254_v22 }
  0x95   : > { %v788_v44 = vpop.permute.xlu1 %787  ;;  %v1144_v49 = vrot.slane %v972_v39, 5  ;;  %v956_v38 = vld [vmem:[%s4993_s20 + $0x78] sm:$0xe]  ;;  %v5464_v39 = vld [vmem:[%s4993_s20 + $0x7c] sm:$0xf] }
  0x96   : > { %893 = vst.msk [vmem:[#allocation2 + $0xc] sm:$0xf] %vm889_vm7, %v788_v44  ;;  %v784_v47 = vpop.permute.xlu0 %783  ;;  %v804_v51 = vpop.permute.xlu2 %803  ;;  %v243_v44 = vld [vmem:[%s4993_s20 + $0x90] sm:$0xf] }
  0x97   : > { %891 = vst.msk [vmem:[#allocation2 + $0x4] sm:$0xf] %vm889_vm7, %v784_v47  ;;  %v4183_v47 = vrot.slane %v950_v45, 9  ;;  %v1146_v56 = vrot.slane %v1144_v49, 4  ;;  %v4599_v45 = vld [vmem:[%s7117_s1 + $0x10] sm:$0xff] }
  0x98   : > { %901 = vst.msk [vmem:[#allocation2 + $0x2c] sm:$0xf] %vm889_vm7, %v804_v51  ;;  %v248_v51 = vld [vmem:[%s4993_s20 + $0xac] sm:$0xf] }
  0x99   : > { %280 = vst.msk [vmem:[#allocation2 + $0x60] sm:$0xf] %vm255_vm3, %v243_v44  ;;  %v1105_v44 = vrot.slane %v955_v42, 5 }
  0x9a   : > { %285 = vst.msk [vmem:[#allocation2 + $0x74] sm:$0xf] %vm255_vm3, %v248_v51 }
  0x9b   : > { %1217 = vrot.lane.b32.xlu1 %v1134_v53, %s4951_s22  ;;  %v1089_v53 = vsel %vm5202_vm6, %v4182_v41, %v1088_v31  ;;  %v5444_v31 = vld [vmem:[%s4993_s20 + $0x70] sm:$0xf]  ;;  %v1109_v41 = vrot.slane %v5464_v39, 5 }
  0x9c   : > { %1215 = vrot.lane.b32.xlu0 %v1131_v25, %s4951_s22  ;;  %1181 = vrot.lane.b32.xlu2 %v1071_v58, %s4951_s22  ;;  %v1096_v25 = vsel %vm5202_vm6, %v4183_v47, %v1095_v50  ;;  %v4190_v58 = vrot.slane %v971_v54, 9  ;;  %v1102_v36 = vrot.slane %v5444_v31, 5  ;;  %v4598_v54 = vld [vmem:[%s7117_s1 + $0x8] sm:$0xff] }
  0x9d   : > { %v796_v63 = vpop.permute.xlu1 %795 }
  0x9e   : > { %897 = vst.msk [vmem:[#allocation2 + $0x1c] sm:$0xf] %vm889_vm7, %v796_v63  ;;  %v794_v3 = vpop.permute.xlu0 %793  ;;  %v810_v6 = vpop.permute.xlu2 %809  ;;  %v952_v63 = vld [vmem:[%s4993_s20 + $0x68] sm:$0x1] }
  0x9f   : > { %896 = vst.msk [vmem:[#allocation2 + $0x18] sm:$0xf] %vm889_vm7, %v794_v3  ;;  %v1098_v1 = vrot.slane %v952_v63, 5  ;;  %v1148_v3 = vsel %vm5202_vm6, %v1146_v56, %v1147_v57  ;;  %v1116_v56 = vrot.slane %v960_v52, 5  ;;  %v961_v57 = vld [vmem:[%s4993_s20 + $0x8c] sm:$0x1] }
  0xa0   : > { %904 = vst.msk [vmem:[#allocation2 + $0x38] sm:$0xf] %vm889_vm7, %v810_v6  ;;  %v1145_v6 = vsel %vm5202_vm6, %v4190_v58, %v1144_v49  ;;  %v959_v58 = vld [vmem:[%s4993_s20 + $0x84] sm:$0xe]  ;;  %v1119_v60 = vrot.slane %v961_v57, 5  ;;  %v4622_v63 = vld [vmem:[%s7117_s1 + $0x48] sm:$0xff] }
  0xa1   : > { %v1099_v7 = vsel %vm5202_vm6, %v1097_v0, %v1098_v1  ;;  %v4186_v61 = vrot.slane %v959_v58, 9  ;;  %v5524_v0 = vld [vmem:[%s7117_s1 + $0x80] sm:$0xff] }
  0xa3   : > { %1187 = vrot.lane.b32.xlu1 %v1082_v8, %s4951_s22  ;;  %v4284_v8 = vor.u32 %v4603_v4, %v4283_v2  ;;  %v1117_v2 = vsel %vm5202_vm6, %v4186_v61, %v1116_v56  ;;  %v3200_v61 = vld [vmem:[%s5609_s30] sm:$0xff] }
  0xa4   : > { %1185 = vrot.lane.b32.xlu0 %v1078_v11, %s4951_s22  ;;  %1183 = vrot.lane.b32.xlu2 %v1075_v14, %s4951_s22 }
  0xa5   : > { %v802_v18 = vpop.permute.xlu1 %801  ;;  %v1526_v9 = vsel %vm1524_vm8, %v4284_v8, 0  ;;  %v5542_v8 = vld [vmem:[%s7117_s1 + $0x78] sm:$0xff] }
  0xa6   : > { %900 = vst.msk [vmem:[#allocation2 + $0x28] sm:$0xf] %vm889_vm7, %v802_v18  ;;  %v800_v21 = vpop.permute.xlu0 %799  ;;  %v816_v26 = vpop.permute.xlu2 %815  ;;  %1529 = vmatpush.bf16.msra.mxu0 %v1526_v9  ;;  %4650 = vmatpush.bf16.msra.mxu3 %v1526_v9  ;;  %v4626_v18 = vld [vmem:[%s7117_s1 + $0x68] sm:$0x30]  ;;  %v1151_v9 = vrot.slane %v975_v5, 5 }
  0xa7   : > { %899 = vst.msk [vmem:[#allocation2 + $0x24] sm:$0xf] %vm889_vm7, %v800_v21  ;;  %v4406_v20 = vor.u32 %v4626_v18, %v4405_v17  ;;  %v4649_v21 = vld [vmem:[%s7117_s1 + $0xa0] sm:$0x30] }
  0xa8   : > { %907 = vst.msk [vmem:[#allocation2 + $0x44] sm:$0xf] %vm889_vm7, %v816_v26  ;;  %v4528_v23 = vor.u32 %v4649_v21, %v4527_v19  ;;  %v953_v19 = vld [vmem:[%s4993_s20 + $0x6c] sm:$0xe] }
  0xa9   : > { %v5432_v24 = vsel %vm1524_vm8, %v4406_v20, 0  ;;  %v4184_v20 = vrot.slane %v953_v19, 9 }
  0xaa   : > { %1530 = vmatpush.bf16.msra.mxu0 %v4602_v15  ;;  %4651 = vmatpush.bf16.msra.mxu3 %v4602_v15  ;;  %v5437_v26 = vsel %vm1524_vm8, %v4528_v23, 0 }
  0xab   : > { %1221 = vrot.lane.b32.xlu1 %v1141_v28, %s4951_s22  ;;  %1869 = vmatpush.bf16.msra.mxu1 %v5432_v24  ;;  %v253_v28 = vld [vmem:[%s4993_s20 + $0xcc] sm:$0xf]  ;;  %v1103_v21 = vsel %vm5202_vm6, %v4184_v20, %v1102_v36  ;;  %v3204_v20 = vld [vmem:[%s5609_s30 + $0x20] sm:$0xff] }
  0xac   : > { %1219 = vrot.lane.b32.xlu0 %v1138_v30, %s4951_s22  ;;  %1189 = vrot.lane.b32.xlu2 %v1085_v33, %s4951_s22  ;;  %v252_v30 = vld [vmem:[%s4993_s20 + $0xc4] sm:$0xf]  ;;  %v4600_v33 = vld [vmem:[%s7117_s1 + $0x18] sm:$0xff]  ;;  %290 = vst.msk [vmem:[#allocation2 + $0x88] sm:$0xf] %vm255_vm3, %v253_v28  ;;  %v1111_v28 = vrot.slane %v1109_v41, 4 }
  0xad   : > { %v808_v35 = vpop.permute.xlu1 %807  ;;  %2273 = vmatpush.bf16.msra.mxu2 %v5437_v26  ;;  %289 = vst.msk [vmem:[#allocation2 + $0x84] sm:$0xf] %vm255_vm3, %v252_v30 }
  0xae   : > { %903 = vst.msk [vmem:[#allocation2 + $0x34] sm:$0xf] %vm889_vm7, %v808_v35  ;;  %v806_v40 = vpop.permute.xlu0 %805  ;;  %v822_v43 = vpop.permute.xlu2 %821  ;;  %1531 = vmatpush.bf16.msra.mxu0 %v4601_v16  ;;  %4652 = vmatpush.bf16.msra.mxu3 %v4601_v16  ;;  %v5458_v35 = vld [vmem:[%s7117_s1 + $0x98] sm:$0xff] }
  0xaf   : > { %902 = vst.msk [vmem:[#allocation2 + $0x30] sm:$0xf] %vm889_vm7, %v806_v40  ;;  %1870 = vmatpush.bf16.msra.mxu1 %v5453_v34  ;;  %v4185_v40 = vrot.slane %v956_v38, 9 }
  0xb0   : > { %910 = vst.msk [vmem:[#allocation2 + $0x50] sm:$0xf] %vm889_vm7, %v822_v43  ;;  %v1104_v43 = vrot.slane %v1102_v36, 4 }
  0xb1   : > { %2274 = vmatpush.bf16.msra.mxu2 %v5458_v35  ;;  %v1110_v47 = vsel %vm5202_vm6, %v4185_v40, %v1109_v41 }
  0xb2   : > { %1532 = vmatpush.bf16.msra.mxu0 %v4600_v33  ;;  %4653 = vmatpush.bf16.msra.mxu3 %v4600_v33  ;;  %v1106_v49 = vsel %vm5202_vm6, %v1104_v43, %v1105_v44 }
  0xb3   : > { %1195 = vrot.lane.b32.xlu1 %v1096_v25, %s4951_s22  ;;  %1871 = vmatpush.bf16.msra.mxu1 %v5480_v46  ;;  %v4623_v25 = vld [vmem:[%s7117_s1 + $0x50] sm:$0xff] }
  0xb4   : > { %1193 = vrot.lane.b32.xlu0 %v1092_v48, %s4951_s22  ;;  %1191 = vrot.lane.b32.xlu2 %v1089_v53, %s4951_s22  ;;  %v5489_v48 = vld [vmem:[%s7117_s1 + $0x90] sm:$0xff] }
  0xb5   : > { %v814_v55 = vpop.permute.xlu1 %813  ;;  %2275 = vmatpush.bf16.msra.mxu2 %v5489_v48 }
  0xb6   : > { %906 = vst.msk [vmem:[#allocation2 + $0x40] sm:$0xf] %vm889_vm7, %v814_v55  ;;  %v812_v59 = vpop.permute.xlu0 %811  ;;  %v828_v62 = vpop.permute.xlu2 %827  ;;  %1533 = vmatpush.bf16.msra.mxu0 %v4599_v45  ;;  %v5509_v55 = vld [vmem:[%s7117_s1 + $0x88] sm:$0xff]  ;;  %4654 = vmatpush.bf16.msra.mxu3 %v4599_v45 }
  0xb7   : > { %905 = vst.msk [vmem:[#allocation2 + $0x3c] sm:$0xf] %vm889_vm7, %v812_v59  ;;  %v1118_v59 = vrot.slane %v1116_v56, 4  ;;  %1872 = vmatpush.bf16.msra.mxu1 %v4623_v25 }
  0xb8   : > { %913 = vst.msk [vmem:[#allocation2 + $0x5c] sm:$0xf] %vm889_vm7, %v828_v62  ;;  %v4597_v62 = vld [vmem:[%s7117_s1] sm:$0xff] }
  0xb9   : > { %2276 = vmatpush.bf16.msra.mxu2 %v5509_v55  ;;  %v1120_v1 = vsel %vm5202_vm6, %v1118_v59, %v1119_v60  ;;  %v978_v59 = vld [vmem:[%s4993_s20 + $0xd0] sm:$0xf] }
  0xba   : > { %1534 = vmatpush.bf16.msra.mxu0 %v4598_v54  ;;  %4655 = vmatpush.bf16.msra.mxu3 %v4598_v54  ;;  %v1158_v60 = vrot.slane %v978_v59, 5  ;;  %v3218_v59 = vld [vmem:[%s5609_s30 + $0x90] sm:$0xff] }
  0xbb   : > { %1197 = vrot.lane.b32.xlu1 %v1099_v7, %s4951_s22  ;;  %1873 = vmatpush.bf16.msra.mxu1 %v4622_v63  ;;  %v4621_v7 = vld [vmem:[%s7117_s1 + $0x40] sm:$0xff] }
  0xbc   : > { %1225 = vrot.lane.b32.xlu0 %v1148_v3, %s4951_s22  ;;  %1223 = vrot.lane.b32.xlu2 %v1145_v6, %s4951_s22 }
  0xbd   : > { %v820_v10 = vpop.permute.xlu1 %819  ;;  %2277 = vmatpush.bf16.msra.mxu2 %v5524_v0 }
  0xbe   : > { %909 = vst.msk [vmem:[#allocation2 + $0x4c] sm:$0xf] %vm889_vm7, %v820_v10  ;;  %v818_v11 = vpop.permute.xlu0 %817  ;;  %v834_v14 = vpop.permute.xlu2 %833  ;;  %1535 = vmatpush.bf16.msra.mxu0 %v4597_v62  ;;  %4656 = vmatpush.bf16.msra.mxu3 %v4597_v62  ;;  %v976_v10 = vld [vmem:[%s4993_s20 + $0xc8] sm:$0x1] }
  0xbf   : > { %908 = vst.msk [vmem:[#allocation2 + $0x48] sm:$0xf] %vm889_vm7, %v818_v11  ;;  %v1153_v11 = vrot.slane %v1151_v9, 4  ;;  %v1154_v12 = vrot.slane %v976_v10, 5  ;;  %1874 = vmatpush.bf16.msra.mxu1 %v4621_v7 }
  0xc0   : > { %916 = vst.msk [vmem:[#allocation2 + $0x68] sm:$0xf] %vm889_vm7, %v834_v14  ;;  %v5554_v14 = vld [vmem:[%s7117_s1 + $0x70] sm:$0xff] }
  0xc1   : > { %2278 = vmatpush.bf16.msra.mxu2 %v5542_v8  ;;  %v1155_v15 = vsel %vm5202_vm6, %v1153_v11, %v1154_v12  ;;  %v979_v12 = vld [vmem:[%s4993_s20 + $0xd4] sm:$0x1] }
  0xc2   : > { %4657 = vmatpush.bf16.msrb.mxu3 %v5432_v24 }
  0xc3   : > { %1203 = vrot.lane.b32.xlu1 %v1110_v47, %s4951_s22  ;;  %1875 = vmatpush.bf16.msra.mxu1 %v4620_v13 }
  0xc4   : > { %1201 = vrot.lane.b32.xlu0 %v1106_v49, %s4951_s22  ;;  %1199 = vrot.lane.b32.xlu2 %v1103_v21, %s4951_s22 }
  0xc5   : > { %v826_v27 = vpop.permute.xlu1 %825  ;;  %2279 = vmatpush.bf16.msra.mxu2 %v5554_v14 }
  0xc6   : > { %912 = vst.msk [vmem:[#allocation2 + $0x58] sm:$0xf] %vm889_vm7, %v826_v27  ;;  %v824_v29 = vpop.permute.xlu0 %823  ;;  %v840_v32 = vpop.permute.xlu2 %839  ;;  %4658 = vmatpush.bf16.msrb.mxu3 %v5453_v34  ;;  %v958_v27 = vld [vmem:[%s4993_s20 + $0x80] sm:$0x1]  ;;  %v974_v34 = vld [vmem:[%s4993_s20 + $0xc0] sm:$0xe] }
  0xc7   : > { %911 = vst.msk [vmem:[#allocation2 + $0x54] sm:$0xf] %vm889_vm7, %v824_v29  ;;  %v1112_v29 = vrot.slane %v958_v27, 5  ;;  %v4191_v36 = vrot.slane %v974_v34, 9 }
  0xc8   : > { %919 = vst.msk [vmem:[#allocation2 + $0x74] sm:$0xf] %vm889_vm7, %v840_v32 }
  0xc9   : > { %v1113_v30 = vsel %vm5202_vm6, %v1111_v28, %v1112_v29  ;;  %v1152_v38 = vsel %vm5202_vm6, %v4191_v36, %v1151_v9 }
  0xca   : > { %4659 = vmatpush.bf16.msrb.mxu3 %v5480_v46 }
  0xcb   : > { %1209 = vrot.lane.b32.xlu1 %v1120_v1, %s4951_s22 }
  0xcc   : > { %1207 = vrot.lane.b32.xlu0 %v1117_v2, %s4951_s22  ;;  %1205 = vrot.lane.b32.xlu2 %v1113_v30, %s4951_s22 }
  0xcd   : > { %v832_v50 = vpop.permute.xlu1 %831 }
  0xce   : > { %915 = vst.msk [vmem:[#allocation2 + $0x64] sm:$0xf] %vm889_vm7, %v832_v50  ;;  %v830_v51 = vpop.permute.xlu0 %829  ;;  %v846_v53 = vpop.permute.xlu2 %845  ;;  %4660 = vmatpush.bf16.msrb.mxu3 %v4623_v25 }
  0xcf   : > { %914 = vst.msk [vmem:[#allocation2 + $0x60] sm:$0xf] %vm889_vm7, %v830_v51 }
  0xd0   : > { %922 = vst.msk [vmem:[#allocation2 + $0x80] sm:$0xf] %vm889_vm7, %v846_v53 }
  0xd2   : > { %4661 = vmatpush.bf16.msrb.mxu3 %v4622_v63 }
  0xd4   : > { %1229 = vrot.lane.b32.xlu0 %v1155_v15, %s4951_s22  ;;  %1227 = vrot.lane.b32.xlu2 %v1152_v38, %s4951_s22 }
  0xd5   : > { %v838_v3 = vpop.permute.xlu1 %837 }
  0xd6   : > { %918 = vst.msk [vmem:[#allocation2 + $0x70] sm:$0xf] %vm889_vm7, %v838_v3  ;;  %v836_v4 = vpop.permute.xlu0 %835  ;;  %v852_v6 = vpop.permute.xlu2 %851  ;;  %4662 = vmatpush.bf16.msrb.mxu3 %v4621_v7 }
  0xd7   : > { %917 = vst.msk [vmem:[#allocation2 + $0x6c] sm:$0xf] %vm889_vm7, %v836_v4 }
  0xd8   : > { %925 = vst.msk [vmem:[#allocation2 + $0x8c] sm:$0xf] %vm889_vm7, %v852_v6 }
  0xda   : > { %4663 = vmatpush.bf16.msrb.mxu3 %v4620_v13  ;;  %v1160_v13 = vrot.slane %v1158_v60, 4 }
  0xdc   : > { %3264 = vrot.lane.b32.xlu0 %v3200_v61, %s4952_s5  ;;  %v3223_v61 = vld [vmem:[%s5609_s30 + $0xb8] sm:$0xff] }
  0xdd   : > { %v844_v16 = vpop.permute.xlu1 %843 }
  0xde   : > { %921 = vst.msk [vmem:[#allocation2 + $0x7c] sm:$0xf] %vm889_vm7, %v844_v16  ;;  %v842_v17 = vpop.permute.xlu0 %841  ;;  %v1168_v18 = vpop.permute.xlu2 %1167 }
  0xdf   : > { %920 = vst.msk [vmem:[#allocation2 + $0x78] sm:$0xf] %vm889_vm7, %v842_v17 }
  0xe0   : > { %1274 = vst.msk [vmem:[#allocation2 + $0x8] sm:$0xf] %vm1271_vm9, %v1168_v18 }
  0xe5   : > { %v850_v22 = vpop.permute.xlu1 %849 }
  0xe6   : > { %924 = vst.msk [vmem:[#allocation2 + $0x88] sm:$0xf] %vm889_vm7, %v850_v22  ;;  %v848_v23 = vpop.permute.xlu0 %847  ;;  %v1174_v24 = vpop.permute.xlu2 %1173 }
  0xe7   : > { %923 = vst.msk [vmem:[#allocation2 + $0x84] sm:$0xf] %vm889_vm7, %v848_v23  ;;  %v3205_v23 = vld [vmem:[%s5609_s30 + $0x28] sm:$0xff] }
  0xe8   : > { %1277 = vst.msk [vmem:[#allocation2 + $0x14] sm:$0xf] %vm1271_vm9, %v1174_v24 }
  0xed   : > { %v1166_v31 = vpop.permute.xlu1 %1165 }
  0xee   : > { %1273 = vst.msk [vmem:[#allocation2 + $0x4] sm:$0xf] %vm1271_vm9, %v1166_v31  ;;  %v1164_v32 = vpop.permute.xlu0 %1163  ;;  %v1214_v33 = vpop.permute.xlu2 %1213  ;;  %v3206_v31 = vld [vmem:[%s5609_s30 + $0x30] sm:$0xff] }
  0xef   : > { %1272 = vst.msk [vmem:[#allocation2] sm:$0xf] %vm1271_vm9, %v1164_v32  ;;  %v3208_v32 = vld [vmem:[%s5609_s30 + $0x40] sm:$0xff] }
  0xf0   : > { %1297 = vst.msk [vmem:[#allocation2 + $0x64] sm:$0xf] %vm1271_vm9, %v1214_v33 }
  0xf5   : > { %v1172_v39 = vpop.permute.xlu1 %1171 }
  0xf6   : > { %1276 = vst.msk [vmem:[#allocation2 + $0x10] sm:$0xf] %vm1271_vm9, %v1172_v39  ;;  %v1170_v40 = vpop.permute.xlu0 %1169  ;;  %v4581_v41 = vld [vmem:[#allocation2] sm:$0xff]  ;;  %v1182_v42 = vpop.permute.xlu2 %1181 }
  0xf7   : > { %1275 = vst.msk [vmem:[#allocation2 + $0xc] sm:$0xf] %vm1271_vm9, %v1170_v40  ;;  %4285 = vmatmul.msk.bf16.vlgmr.msra.gmra.mxu0 %vm1475_vm10, %v4581_v41  ;;  %v3207_v40 = vld [vmem:[%s5609_s30 + $0x38] sm:$0xff]  ;;  %v3209_v41 = vld [vmem:[%s5609_s30 + $0x48] sm:$0xff] }
  0xf8   : > { %1281 = vst.msk [vmem:[#allocation2 + $0x24] sm:$0xf] %vm1271_vm9, %v1182_v42  ;;  %v3211_v42 = vld [vmem:[%s5609_s30 + $0x58] sm:$0xff] }
  0xfd   : > { %v1212_v43 = vpop.permute.xlu1 %1211  ;;  %v4627_v44 = vld [vmem:[#allocation2 + $0x10] sm:$0xff] }
  0xfe   : > { %1296 = vst.msk [vmem:[#allocation2 + $0x60] sm:$0xf] %vm1271_vm9, %v1212_v43  ;;  %v1176_v45 = vpop.permute.xlu0 %1175  ;;  %v4604_v46 = vld [vmem:[#allocation2 + $0x8] sm:$0xff]  ;;  %4529 = vmatmul.msk.bf16.vlgmr.msra.gmra.mxu2 %vm1475_vm10, %v4627_v44  ;;  %v1184_v47 = vpop.permute.xlu2 %1183  ;;  %v4605_v56 = vld [vmem:[#allocation2 + $0x10] sm:$0xff] }
  0xff   : > { %1278 = vst.msk [vmem:[#allocation2 + $0x18] sm:$0xf] %vm1271_vm9, %v1176_v45  ;;  %4407 = vmatmul.msk.bf16.vlgmr.msra.gmra.mxu1 %vm1475_vm10, %v4604_v46  ;;  %v4582_v52 = vld [vmem:[#allocation2 + $0x8] sm:$0xff]  ;;  %v4583_v2 = vld [vmem:[#allocation2 + $0x10] sm:$0xff] }
 0x100   : > { %1282 = vst.msk [vmem:[#allocation2 + $0x28] sm:$0xf] %vm1271_vm9, %v1184_v47  ;;  %v3210_v47 = vld [vmem:[%s5609_s30 + $0x50] sm:$0xff] }
 0x105   : > { %v1180_v49 = vpop.permute.xlu1 %1179  ;;  %v4593_v50 = vld [vmem:[#allocation2 + $0x60] sm:$0xff] }
 0x106   : > { %1280 = vst.msk [vmem:[#allocation2 + $0x20] sm:$0xf] %vm1271_vm9, %v1180_v49  ;;  %v1178_v51 = vpop.permute.xlu0 %1177  ;;  %4297 = vmatmul.msk.bf16.vlgmr.msra.gmra.mxu3 %vm1475_vm10, %v4593_v50  ;;  %v1190_v53 = vpop.permute.xlu2 %1189  ;;  %v3212_v49 = vld [vmem:[%s5609_s30 + $0x60] sm:$0xff]  ;;  %v3214_v50 = vld [vmem:[%s5609_s30 + $0x70] sm:$0xff] }
 0x107   : > { %1279 = vst.msk [vmem:[#allocation2 + $0x1c] sm:$0xf] %vm1271_vm9, %v1178_v51  ;;  %4286 = vmatmul.msk.bf16.gmra.mxu0 %vm1475_vm10, %v4582_v52  ;;  %4664 = vmatpush.bf16.msra.mxu3 %v5437_v26  ;;  %v977_v26 = vld [vmem:[%s4993_s20 + $0xcc] sm:$0xe] }
 0x108   : > { %1285 = vst.msk [vmem:[#allocation2 + $0x34] sm:$0xf] %vm1271_vm9, %v1190_v53  ;;  %v3213_v53 = vld [vmem:[%s5609_s30 + $0x68] sm:$0xff] }
 0x10b   : > { %4665 = vmatpush.bf16.msra.mxu3 %v5458_v35  ;;  %v4192_v35 = vrot.slane %v977_v26, 9  ;;  %v3216_v26 = vld [vmem:[%s5609_s30 + $0x80] sm:$0xff] }
 0x10d   : > { %v1218_v54 = vpop.permute.xlu1 %1217  ;;  %v1159_v62 = vsel %vm5202_vm6, %v4192_v35, %v1158_v60  ;;  %v4629_v7 = vld [vmem:[#allocation2 + $0x20] sm:$0xff] }
 0x10e   : > { %1299 = vst.msk [vmem:[#allocation2 + $0x6c] sm:$0xf] %vm1271_vm9, %v1218_v54  ;;  %v1216_v25 = vpop.permute.xlu0 %1215  ;;  %v4628_v57 = vld [vmem:[#allocation2 + $0x18] sm:$0xff]  ;;  %v1192_v58 = vpop.permute.xlu2 %1191  ;;  %1231 = vrot.lane.b32.xlu1 %v1159_v62, %s4951_s22  ;;  %v4607_v17 = vld [vmem:[#allocation2 + $0x20] sm:$0xff] }
 0x10f   : > { %1298 = vst.msk [vmem:[#allocation2 + $0x68] sm:$0xf] %vm1271_vm9, %v1216_v25  ;;  %4408 = vmatmul.msk.bf16.gmra.mxu1 %vm1475_vm10, %v4605_v56  ;;  %4530 = vmatmul.msk.bf16.gmra.mxu2 %vm1475_vm10, %v4628_v57  ;;  %v4606_v6 = vld [vmem:[#allocation2 + $0x18] sm:$0xff]  ;;  %v4585_v21 = vld [vmem:[#allocation2 + $0x20] sm:$0xff]  ;;  %v3217_v25 = vld [vmem:[%s5609_s30 + $0x88] sm:$0xff] }
 0x110   : > { %1286 = vst.msk [vmem:[#allocation2 + $0x38] sm:$0xf] %vm1271_vm9, %v1192_v58  ;;  %4666 = vmatpush.bf16.msra.mxu3 %v5489_v48  ;;  %v3201_v48 = vld [vmem:[%s5609_s30 + $0x8] sm:$0xff]  ;;  %v4584_v9 = vld [vmem:[#allocation2 + $0x18] sm:$0xff]  ;;  %v3220_v58 = vld [vmem:[%s5609_s30 + $0xa0] sm:$0xff] }
 0x111   : > { %v3215_v54 = vld [vmem:[%s5609_s30 + $0x78] sm:$0xff] }
 0x112   : > { %v3219_v62 = vld [vmem:[%s5609_s30 + $0x98] sm:$0xff] }
 0x114   : > { %4667 = vmatpush.bf16.msra.mxu3 %v5509_v55 }
 0x115   : > { %v1188_v63 = vpop.permute.xlu1 %1187 }
 0x116   : > { %1284 = vst.msk [vmem:[#allocation2 + $0x30] sm:$0xf] %vm1271_vm9, %v1188_v63  ;;  %v1186_v1 = vpop.permute.xlu0 %1185  ;;  %v4594_v3 = vld [vmem:[#allocation2 + $0x68] sm:$0xff]  ;;  %v1224_v4 = vpop.permute.xlu2 %1223  ;;  %3266 = vrot.lane.b32.xlu1 %v3201_v48, %s4952_s5  ;;  %v3226_v48 = vld [vmem:[%s5609_s30 + $0xd0] sm:$0xff] }
 0x117   : > { %1283 = vst.msk [vmem:[#allocation2 + $0x2c] sm:$0xf] %vm1271_vm9, %v1186_v1  ;;  %4287 = vmatmul.msk.bf16.gmra.mxu0 %vm1475_vm10, %v4583_v2  ;;  %4298 = vmatmul.msk.bf16.gmra.mxu3 %vm1475_vm10, %v4594_v3  ;;  %v4616_v34 = vld [vmem:[#allocation2 + $0x68] sm:$0xff] }
 0x118   : > { %1302 = vst.msk [vmem:[#allocation2 + $0x78] sm:$0xf] %vm1271_vm9, %v1224_v4  ;;  %4668 = vmatpush.bf16.msra.mxu3 %v5524_v0  ;;  %v3221_v63 = vld [vmem:[%s5609_s30 + $0xa8] sm:$0xff] }
 0x11c   : > { %4669 = vmatpush.bf16.msra.mxu3 %v5542_v8  ;;  %v3203_v8 = vld [vmem:[%s5609_s30 + $0x18] sm:$0xff] }
 0x11d   : > { %v1222_v55 = vpop.permute.xlu1 %1221  ;;  %3270 = vrot.lane.b32.xlu0 %v3203_v8, %s4952_s5  ;;  %v4631_v27 = vld [vmem:[#allocation2 + $0x30] sm:$0xff] }
 0x11e   : > { %1301 = vst.msk [vmem:[#allocation2 + $0x74] sm:$0xf] %vm1271_vm9, %v1222_v55  ;;  %v1220_v5 = vpop.permute.xlu0 %1219  ;;  %v4630_v18 = vld [vmem:[#allocation2 + $0x28] sm:$0xff]  ;;  %3272 = vrot.lane.b32.xlu1 %v3204_v20, %s4952_s5  ;;  %v1200_v28 = vpop.permute.xlu2 %1199  ;;  %v4609_v43 = vld [vmem:[#allocation2 + $0x30] sm:$0xff]  ;;  %v3228_v20 = vld [vmem:[%s5609_s30 + $0xe0] sm:$0xff] }
 0x11f   : > { %1300 = vst.msk [vmem:[#allocation2 + $0x70] sm:$0xf] %vm1271_vm9, %v1220_v5  ;;  %4409 = vmatmul.msk.bf16.gmra.mxu1 %vm1475_vm10, %v4606_v6  ;;  %4531 = vmatmul.msk.bf16.gmra.mxu2 %vm1475_vm10, %v4629_v7  ;;  %v4608_v24 = vld [vmem:[#allocation2 + $0x28] sm:$0xff]  ;;  %v4587_v51 = vld [vmem:[#allocation2 + $0x30] sm:$0xff]  ;;  %v3224_v5 = vld [vmem:[%s5609_s30 + $0xc0] sm:$0xff] }
 0x120   : > { %4670 = vmatpush.bf16.msra.mxu3 %v5554_v14  ;;  %v1161_v14 = vrot.slane %v979_v12, 5  ;;  %1290 = vst.msk [vmem:[#allocation2 + $0x48] sm:$0xf] %vm1271_vm9, %v1200_v28  ;;  %v4586_v33 = vld [vmem:[#allocation2 + $0x28] sm:$0xff]  ;;  %v3222_v55 = vld [vmem:[%s5609_s30 + $0xb0] sm:$0xff] }
 0x122   : > { %v1162_v15 = vsel %vm5202_vm6, %v1160_v13, %v1161_v14  ;;  %v5736_v14 = vld [vmem:[%s7118_s2] ss:$0 sm:$0xff] }
 0x123   : > { %1233 = vrot.lane.b32.xlu2 %v1162_v15, %s4951_s22 }
 0x125   : > { %v1196_v11 = vpop.permute.xlu1 %1195  ;;  %3276 = vrot.lane.b32.xlu0 %v3206_v31, %s4952_s5 }
 0x126   : > { %v1194_v0 = vpop.permute.xlu0 %1193  ;;  %v4595_v10 = vld [vmem:[#allocation2 + $0x70] sm:$0xff]  ;;  %1288 = vst.msk [vmem:[#allocation2 + $0x40] sm:$0xf] %vm1271_vm9, %v1196_v11  ;;  %v1206_v36 = vpop.permute.xlu2 %1205  ;;  %3278 = vrot.lane.b32.xlu1 %v3207_v40, %s4952_s5  ;;  %v3227_v11 = vld [vmem:[%s5609_s30 + $0xd8] sm:$0xff] }
 0x127   : > { %1287 = vst.msk [vmem:[#allocation2 + $0x3c] sm:$0xf] %vm1271_vm9, %v1194_v0  ;;  %4288 = vmatmul.msk.bf16.gmra.mxu0 %vm1475_vm10, %v4584_v9  ;;  %4299 = vmatmul.msk.bf16.gmra.mxu3 %vm1475_vm10, %v4595_v10  ;;  %v4617_v52 = vld [vmem:[#allocation2 + $0x70] sm:$0xff]  ;;  %v3229_v9 = vld [vmem:[%s5609_s30 + $0xe8] sm:$0xff] }
 0x128   : > { %1293 = vst.msk [vmem:[#allocation2 + $0x54] sm:$0xf] %vm1271_vm9, %v1206_v36  ;;  %v3225_v10 = vld [vmem:[%s5609_s30 + $0xc8] sm:$0xff]  ;;  %v3231_v36 = vld [vmem:[%s5609_s30 + $0xf8] sm:$0xff] }
 0x12b   : > { %3268 = vrot.lane.b32.xlu2 %v3202_v37, %s4952_s5  ;;  %v3230_v37 = vld [vmem:[%s5609_s30 + $0xf0] sm:$0xff] }
 0x12d   : > { %v1198_v19 = vpop.permute.xlu1 %1197  ;;  %3282 = vrot.lane.b32.xlu0 %v3209_v41, %s4952_s5 }
 0x12e   : > { %v1226_v16 = vpop.permute.xlu0 %1225  ;;  %1289 = vst.msk [vmem:[#allocation2 + $0x44] sm:$0xf] %vm1271_vm9, %v1198_v19  ;;  %v4632_v44 = vld [vmem:[#allocation2 + $0x38] sm:$0xff]  ;;  %v1228_v45 = vpop.permute.xlu2 %1227  ;;  %3284 = vrot.lane.b32.xlu1 %v3210_v47, %s4952_s5 }
 0x12f   : > { %1303 = vst.msk [vmem:[#allocation2 + $0x7c] sm:$0xf] %vm1271_vm9, %v1226_v16  ;;  %4410 = vmatmul.msk.bf16.gmra.mxu1 %vm1475_vm10, %v4607_v17  ;;  %4532 = vmatmul.msk.bf16.gmra.mxu2 %vm1475_vm10, %v4630_v18  ;;  %v4610_v56 = vld [vmem:[#allocation2 + $0x38] sm:$0xff] }
 0x130   : > { %1304 = vst.msk [vmem:[#allocation2 + $0x80] sm:$0xf] %vm1271_vm9, %v1228_v45  ;;  %v4588_v35 = vld [vmem:[#allocation2 + $0x38] sm:$0xff] }
 0x133   : > { %3274 = vrot.lane.b32.xlu2 %v3205_v23, %s4952_s5 }
 0x135   : > { %v1204_v29 = vpop.permute.xlu1 %1203  ;;  %3288 = vrot.lane.b32.xlu0 %v3212_v49, %s4952_s5  ;;  %v4633_v57 = vld [vmem:[#allocation2 + $0x40] sm:$0xff] }
 0x136   : > { %v4596_v22 = vld [vmem:[#allocation2 + $0x78] sm:$0xff]  ;;  %v1202_v30 = vpop.permute.xlu0 %1201  ;;  %1292 = vst.msk [vmem:[#allocation2 + $0x50] sm:$0xf] %vm1271_vm9, %v1204_v29  ;;  %3290 = vrot.lane.b32.xlu1 %v3213_v53, %s4952_s5  ;;  %v4611_v1 = vld [vmem:[#allocation2 + $0x40] sm:$0xff] }
 0x137   : > { %4289 = vmatmul.msk.bf16.gmra.mxu0 %vm1475_vm10, %v4585_v21  ;;  %4300 = vmatmul.msk.bf16.gmra.mxu3 %vm1475_vm10, %v4596_v22  ;;  %1291 = vst.msk [vmem:[#allocation2 + $0x4c] sm:$0xf] %vm1271_vm9, %v1202_v30  ;;  %v4618_v60 = vld [vmem:[#allocation2 + $0x78] sm:$0xff]  ;;  %v4589_v6 = vld [vmem:[#allocation2 + $0x40] sm:$0xff]  ;;  %v4639_v22 = vld [vmem:[#allocation2 + $0x70] sm:$0xff] }
 0x13b   : > { %3280 = vrot.lane.b32.xlu2 %v3208_v32, %s4952_s5 }
 0x13d   : > { %v1210_v38 = vpop.permute.xlu1 %1209  ;;  %3294 = vrot.lane.b32.xlu0 %v3215_v54, %s4952_s5  ;;  %v4635_v12 = vld [vmem:[#allocation2 + $0x50] sm:$0xff] }
 0x13e   : > { %v1208_v39 = vpop.permute.xlu0 %1207  ;;  %1295 = vst.msk [vmem:[#allocation2 + $0x5c] sm:$0xf] %vm1271_vm9, %v1210_v38  ;;  %3296 = vrot.lane.b32.xlu1 %v3216_v26, %s4952_s5  ;;  %v4634_v2 = vld [vmem:[#allocation2 + $0x48] sm:$0xff]  ;;  %v4613_v38 = vld [vmem:[#allocation2 + $0x50] sm:$0xff] }
 0x13f   : > { %4411 = vmatmul.msk.bf16.gmra.mxu1 %vm1475_vm10, %v4608_v24  ;;  %4533 = vmatmul.msk.bf16.gmra.mxu2 %vm1475_vm10, %v4631_v27  ;;  %1294 = vst.msk [vmem:[#allocation2 + $0x58] sm:$0xf] %vm1271_vm9, %v1208_v39  ;;  %v4612_v8 = vld [vmem:[#allocation2 + $0x48] sm:$0xff] }
 0x140   : > { %v4590_v21 = vld [vmem:[#allocation2 + $0x48] sm:$0xff] }
 0x143   : > { %3286 = vrot.lane.b32.xlu2 %v3211_v42, %s4952_s5 }
 0x145   : > { %3300 = vrot.lane.b32.xlu0 %v3218_v59, %s4952_s5 }
 0x146   : > { %v1230_v46 = vpop.permute.xlu0 %1229  ;;  %3302 = vrot.lane.b32.xlu1 %v3219_v62, %s4952_s5  ;;  %v4636_v39 = vld [vmem:[#allocation2 + $0x58] sm:$0xff] }
 0x147   : > { %4290 = vmatmul.msk.bf16.gmra.mxu0 %vm1475_vm10, %v4586_v33  ;;  %4419 = vmatmul.msk.bf16.vlgmr.msrb.gmra.mxu3 %vm1475_vm10, %v4616_v34  ;;  %1305 = vst.msk [vmem:[#allocation2 + $0x84] sm:$0xf] %vm1271_vm9, %v1230_v46 }
 0x14b   : > { %3292 = vrot.lane.b32.xlu2 %v3214_v50, %s4952_s5 }
 0x14d   : > { %3306 = vrot.lane.b32.xlu0 %v3221_v63, %s4952_s5 }
 0x14e   : > { %v4619_v3 = vld [vmem:[#allocation2 + $0x80] sm:$0xff]  ;;  %3308 = vrot.lane.b32.xlu1 %v3222_v55, %s4952_s5  ;;  %v4614_v55 = vld [vmem:[#allocation2 + $0x58] sm:$0xff] }
 0x14f   : > { %4412 = vmatmul.msk.bf16.gmra.mxu1 %vm1475_vm10, %v4609_v43  ;;  %4534 = vmatmul.msk.bf16.gmra.mxu2 %vm1475_vm10, %v4632_v44 }
 0x153   : > { %3298 = vrot.lane.b32.xlu2 %v3217_v25, %s4952_s5 }
 0x155   : > { %3312 = vrot.lane.b32.xlu0 %v3224_v5, %s4952_s5  ;;  %v4637_v5 = vld [vmem:[#allocation2 + $0x60] sm:$0xff] }
 0x156   : > { %3314 = vrot.lane.b32.xlu1 %v3225_v10, %s4952_s5 }
 0x157   : > { %4291 = vmatmul.msk.bf16.gmra.mxu0 %vm1475_vm10, %v4587_v51  ;;  %4420 = vmatmul.msk.bf16.gmra.mxu3 %vm1475_vm10, %v4617_v52  ;;  %v4591_v51 = vld [vmem:[#allocation2 + $0x50] sm:$0xff]  ;;  %v4640_v52 = vld [vmem:[#allocation2 + $0x78] sm:$0xff] }
 0x15b   : > { %3304 = vrot.lane.b32.xlu2 %v3220_v58, %s4952_s5 }
 0x15d   : > { %3318 = vrot.lane.b32.xlu0 %v3227_v11, %s4952_s5 }
 0x15e   : > { %3320 = vrot.lane.b32.xlu1 %v3228_v20, %s4952_s5 }
 0x15f   : > { %4413 = vmatmul.msk.bf16.gmra.mxu1 %vm1475_vm10, %v4610_v56  ;;  %4535 = vmatmul.msk.bf16.gmra.mxu2 %vm1475_vm10, %v4633_v57  ;;  %v2525_v57 = vlaneseq }
 0x161   : > { %v5770_v62 = vand.u32 127, %v2525_v57 }
 0x163   : > { %3310 = vrot.lane.b32.xlu2 %v3223_v61, %s4952_s5  ;;  %vm2527_vm13 = vcmp.lt.s32.totalorder %v5770_v62, 96 }
 0x165   : > { %3324 = vrot.lane.b32.xlu0 %v3230_v37, %s4952_s5 }
 0x166   : > { %3326 = vrot.lane.b32.xlu1 %v3231_v36, %s4952_s5 }
 0x167   : > { %4292 = vmatmul.msk.bf16.gmra.mxu0 %vm1475_vm10, %v4588_v35  ;;  %4421 = vmatmul.msk.bf16.gmra.mxu3 %vm1475_vm10, %v4618_v60 }
 0x16b   : > { %3316 = vrot.lane.b32.xlu2 %v3226_v48, %s4952_s5 }
 0x16f   : > { %4414 = vmatmul.msk.bf16.gmra.mxu1 %vm1475_vm10, %v4611_v1  ;;  %4536 = vmatmul.msk.bf16.gmra.mxu2 %vm1475_vm10, %v4634_v2 }
 0x173   : > { %3322 = vrot.lane.b32.xlu2 %v3229_v9, %s4952_s5 }
 0x174   : > { %v1537_v4 = vpop.f32.mrf.mxu0 }
 0x177   : > { %4293 = vmatmul.msk.bf16.gmra.mxu0 %vm1475_vm10, %v4589_v6  ;;  %4422 = vmatmul.msk.bf16.gmra.mxu3 %vm1475_vm10, %v4619_v3 }
 0x17c   : > { %v1539_v7 = vpop.f32.mrf.mxu0  ;;  %v1877_v0 = vpop.f32.mrf.mxu1 }
 0x17d   : > { %v1989_v13 = vadd.f32 %v1877_v0, %v1537_v4  ;;  %v1234_v27 = vpop.permute.xlu2 %1233 }
 0x17e   : > { %1307 = vst.msk [vmem:[#allocation2 + $0x8c] sm:$0xf] %vm1271_vm9, %v1234_v27 }
 0x17f   : > { %4415 = vmatmul.msk.bf16.gmra.mxu1 %vm1475_vm10, %v4612_v8  ;;  %4537 = vmatmul.msk.bf16.gmra.mxu2 %vm1475_vm10, %v4635_v12 }
 0x180   : > { %v1232_v23 = vpop.permute.xlu1 %1231 }
 0x181   : > { %v2281_v15 = vpop.f32.mrf.mxu2  ;;  %1306 = vst.msk [vmem:[#allocation2 + $0x88] sm:$0xf] %vm1271_vm9, %v1232_v23 }
 0x182   : > { %v2393_v16 = vadd.f32 %v2281_v15, %v1989_v13 }
 0x184   : > { %v2493_v17 = vadd.f32 %v5736_v14, %v2393_v16  ;;  %v1542_v18 = vpop.f32.mrf.mxu0  ;;  %v1879_v19 = vpop.f32.mrf.mxu1 }
 0x185   : > { %v1990_v28 = vadd.f32 %v1879_v19, %v1539_v7 }
 0x186   : > { %v4545_v24 = vmul.f32 -1.442695, %v2493_v17 }
 0x187   : > { %4294 = vmatmul.msk.bf16.gmra.mxu0 %vm1475_vm10, %v4590_v21  ;;  %4541 = vmatmul.msk.bf16.vlgmr.msra.gmra.mxu3 %vm1475_vm10, %v4639_v22 }
 0x188   : > { %4685 = vpow2.f32 %v4545_v24 }
 0x189   : > { %v5747_v29 = vpop.f32.mrf.mxu3  ;;  %v2283_v30 = vpop.f32.mrf.mxu2 }
 0x18a   : > { %v2394_v31 = vadd.f32 %v2283_v30, %v1990_v28  ;;  %v4592_v30 = vld [vmem:[#allocation2 + $0x58] sm:$0xff] }
 0x18c   : > { %v5750_v32 = vadd.f32 %v5736_v14, %v2394_v31  ;;  %v1544_v33 = vpop.f32.mrf.mxu0  ;;  %v1882_v34 = vpop.f32.mrf.mxu1  ;;  %v4641_v31 = vld [vmem:[#allocation2 + $0x80] sm:$0xff] }
 0x18d   : > { %v1991_v43 = vadd.f32 %v1882_v34, %v1542_v18 }
 0x18e   : > { %v4686_v40 = vpop.eup %4685  ;;  %v4546_v41 = vmul.f32 -1.442695, %v5750_v32 }
 0x18f   : > { %v2624_v42 = vadd.f32 1.0, %v4686_v40  ;;  %4416 = vmatmul.msk.bf16.gmra.mxu1 %vm1475_vm10, %v4613_v38  ;;  %4538 = vmatmul.msk.bf16.gmra.mxu2 %vm1475_vm10, %v4636_v39 }
 0x190   : > { %4687 = vpow2.f32 %v4546_v41 }
 0x191   : > { %4689 = vrcp.f32 %v2624_v42  ;;  %v5757_v44 = vpop.f32.mrf.mxu3  ;;  %v2667_v63 = vand.u32 2147483648, %v2624_v42  ;;  %v2665_v4 = vand.u32 2147483647, %v2624_v42  ;;  %vm2661_vm12 = vweird.f32 %v2624_v42 }
 0x192   : > { %v2286_v45 = vpop.f32.mrf.mxu2 }
 0x193   : > { %v2395_v46 = vadd.f32 %v2286_v45, %v1991_v43  ;;  %v2668_v9 = vor.u32 1.1754944e-38, %v2667_v63  ;;  %vm2666_vm15 = vcmp.eq.f32.partialorder %v2665_v4, 8.507059e+37 }
 0x194   : > { %v1547_v47 = vpop.f32.mrf.mxu0  ;;  %v1884_v49 = vpop.f32.mrf.mxu1 }
 0x195   : > { %v5760_v50 = vadd.f32 %v5736_v14, %v2395_v46  ;;  %v1992_v26 = vadd.f32 %v1884_v49, %v1544_v33 }
 0x196   : > { %v4688_v53 = vpop.eup %4687 }
 0x197   : > { %v4690_v54 = vpop.eup %4689  ;;  %v5762_v25 = vadd.f32 1.0, %v4688_v53  ;;  %v4547_v56 = vmul.f32 -1.442695, %v5760_v50  ;;  %4295 = vmatmul.msk.bf16.gmra.mxu0 %vm1475_vm10, %v4591_v51  ;;  %4542 = vmatmul.msk.bf16.gmra.mxu3 %vm1475_vm10, %v4640_v52 }
 0x198   : > { %v2657_v58 = vmul.f32 %v4690_v54, %v2624_v42  ;;  %vm2662_vm11 = vweird.f32 %v4690_v54 }
 0x199   : > { %4691 = vrcp.f32 %v5762_v25  ;;  %vm2663_vm14 = vmor %vm2661_vm12, %vm2662_vm11  ;;  %v2682_v21 = vand.u32 2147483648, %v5762_v25  ;;  %v2680_v27 = vand.u32 2147483647, %v5762_v25  ;;  %vm2676_vm1 = vweird.f32 %v5762_v25 }
 0x19a   : > { %4693 = vpow2.f32 %v4547_v56  ;;  %v5768_v59 = vpop.f32.mrf.mxu3  ;;  %v2288_v35 = vpop.f32.mrf.mxu2  ;;  %v2658_v60 = vsub.f32 1.0, %v2657_v58  ;;  %v4615_v58 = vld [vmem:[#allocation2 + $0x60] sm:$0xff] }
 0x19b   : > { %4695 = vtanh.f32 %v2493_v17  ;;  %v2396_v61 = vadd.f32 %v2288_v35, %v1992_v26  ;;  %v2683_v36 = vor.u32 1.1754944e-38, %v2682_v21  ;;  %vm2681_vm3 = vcmp.eq.f32.partialorder %v2680_v27, 8.507059e+37  ;;  %v5817_v56 = vpop.permute.xlu2 %3268  ;;  %v4638_v26 = vld [vmem:[#allocation2 + $0x68] sm:$0xff] }
 0x19c   : > { %v1549_v1 = vpop.f32.mrf.mxu0  ;;  %v1887_v2 = vpop.f32.mrf.mxu1  ;;  %v2659_v3 = vmul.f32 %v4690_v54, %v2658_v60 }
 0x19d   : > { %v5773_v48 = vadd.f32 %v5736_v14, %v2396_v61  ;;  %v1993_v15 = vadd.f32 %v1887_v2, %v1547_v47 }
 0x19e   : > { %v2660_v6 = vadd.f32 %v4690_v54, %v2659_v3 }
 0x19f   : > { %v4692_v7 = vpop.eup %4691  ;;  %v4548_v0 = vmul.f32 -1.442695, %v5773_v48  ;;  %4417 = vmatmul.msk.bf16.gmra.mxu1 %vm1475_vm10, %v4614_v55  ;;  %4539 = vmatmul.msk.bf16.gmra.mxu2 %vm1475_vm10, %v4637_v5 }
 0x1a0   : > { %v4694_v10 = vpop.eup %4693  ;;  %v2664_v11 = vsel %vm2663_vm14, %v4690_v54, %v2660_v6  ;;  %v2672_v8 = vmul.f32 %v4692_v7, %v5762_v25  ;;  %vm2677_vm0 = vweird.f32 %v4692_v7 }
 0x1a1   : > { %v4696_v12 = vpop.eup %4695  ;;  %v5780_v13 = vadd.f32 1.0, %v4694_v10  ;;  %4697 = vpow2.f32 %v4548_v0  ;;  %v2669_v16 = vsel %vm2666_vm15, %v2668_v9, %v2664_v11  ;;  %vm2678_vm2 = vmor %vm2676_vm1, %vm2677_vm0  ;;  %v4642_v11 = vld [vmem:[#allocation2 + $0x88] sm:$0xff] }
 0x1a2   : > { %4699 = vtanh.f32 %v5750_v32  ;;  %v5783_v17 = vpop.f32.mrf.mxu3  ;;  %v2291_v18 = vpop.f32.mrf.mxu2  ;;  %v5787_v19 = vsel %vm2527_vm13, %v2669_v16, %v4696_v12  ;;  %v2673_v20 = vsub.f32 1.0, %v2672_v8 }
 0x1a3   : > { %4701 = vrcp.f32 %v5780_v13  ;;  %v2397_v37 = vadd.f32 %v2291_v18, %v1993_v15  ;;  %3424 = vrot.lane.b32.xlu2 %v5787_v19, %s4952_s5  ;;  %v2697_v57 = vand.u32 2147483648, %v5780_v13  ;;  %v2695_v60 = vand.u32 2147483647, %v5780_v13  ;;  %v5837_v18 = vpop.permute.xlu0 %3264 }
 0x1a4   : > { %v1889_v22 = vpop.f32.mrf.mxu1  ;;  %v1552_v23 = vpop.f32.mrf.mxu0  ;;  %v2674_v24 = vmul.f32 %v4692_v7, %v2673_v20  ;;  %vm2691_vm5 = vweird.f32 %v5780_v13 }
 0x1a5   : > { %v5795_v28 = vadd.f32 %v5736_v14, %v2397_v37  ;;  %v1994_v42 = vadd.f32 %v1889_v22, %v1549_v1  ;;  %v2698_v4 = vor.u32 1.1754944e-38, %v2697_v57  ;;  %vm2696_vm7 = vcmp.eq.f32.partialorder %v2695_v60, 8.507059e+37 }
 0x1a6   : > { %v2675_v32 = vadd.f32 %v4692_v7, %v2674_v24  ;;  %v5846_v24 = vpop.permute.xlu2 %3274 }
 0x1a7   : > { %v4698_v33 = vpop.eup %4697  ;;  %v4549_v34 = vmul.f32 -1.442695, %v5795_v28  ;;  %4296 = vmatmul.msk.bf16.gmra.mxu0 %vm1475_vm10, %v4592_v30  ;;  %4543 = vmatmul.msk.bf16.gmra.mxu3 %vm1475_vm10, %v4641_v31  ;;  %7128 = vst [vmem:[#allocation4_spill] sm:$0xff] %v5846_v24 }
 0x1a8   : > { %v4700_v38 = vpop.eup %4699  ;;  %v5801_v39 = vadd.f32 1.0, %v4698_v33  ;;  %v2679_v40 = vsel %vm2678_vm2, %v4692_v7, %v2675_v32 }
 0x1a9   : > { %v4702_v41 = vpop.eup %4701  ;;  %4703 = vpow2.f32 %v4549_v34  ;;  %v2684_v43 = vsel %vm2681_vm3, %v2683_v36, %v2679_v40 }
 0x1aa   : > { %4705 = vrcp.f32 %v5801_v39  ;;  %v5804_v45 = vpop.f32.mrf.mxu3  ;;  %v2293_v46 = vpop.f32.mrf.mxu2  ;;  %v5808_v47 = vsel %vm2527_vm13, %v2684_v43, %v4700_v38  ;;  %v2687_v49 = vmul.f32 %v4702_v41, %v5780_v13  ;;  %vm2692_vm4 = vweird.f32 %v4702_v41 }
 0x1ab   : > { %v2398_v51 = vadd.f32 %v2293_v46, %v1994_v42  ;;  %3426 = vrot.lane.b32.xlu0 %v5808_v47, %s4952_s5  ;;  %4707 = vtanh.f32 %v5760_v50  ;;  %vm2693_vm6 = vmor %vm2691_vm5, %vm2692_vm4  ;;  %v2712_v16 = vand.u32 2147483648, %v5801_v39  ;;  %v2710_v21 = vand.u32 2147483647, %v5801_v39 }
 0x1ac   : > { %v1892_v52 = vpop.f32.mrf.mxu1  ;;  %v1554_v53 = vpop.f32.mrf.mxu0  ;;  %v2688_v54 = vsub.f32 1.0, %v2687_v49  ;;  %vm2706_vm9 = vweird.f32 %v5801_v39 }
 0x1ad   : > { %v5815_v25 = vadd.f32 %v5736_v14, %v2398_v51  ;;  %v1995_v3 = vadd.f32 %v1892_v52, %v1552_v23  ;;  %v2713_v31 = vor.u32 1.1754944e-38, %v2712_v16  ;;  %vm2711_vm12 = vcmp.eq.f32.partialorder %v2710_v21, 8.507059e+37 }
 0x1ae   : > { %v2689_v35 = vmul.f32 %v4702_v41, %v2688_v54  ;;  %v5866_v54 = vpop.permute.xlu0 %3270 }
 0x1af   : > { %v4704_v61 = vpop.eup %4703  ;;  %v4550_v63 = vmul.f32 -1.442695, %v5815_v25  ;;  %4418 = vmatmul.msk.bf16.gmra.mxu1 %vm1475_vm10, %v4615_v58  ;;  %4540 = vmatmul.msk.bf16.gmra.mxu2 %vm1475_vm10, %v4638_v26  ;;  %7129 = vst [vmem:[#allocation5_spill] sm:$0xff] %v5866_v54  ;;  %v5870_v58 = vpop.permute.xlu1 %3266 }
 0x1b0   : > { %v4706_v50 = vpop.eup %4705  ;;  %v5824_v1 = vadd.f32 1.0, %v4704_v61  ;;  %v2690_v2 = vadd.f32 %v4702_v41, %v2689_v35 }
 0x1b1   : > { %4709 = vpow2.f32 %v4550_v63  ;;  %v2702_v55 = vmul.f32 %v4706_v50, %v5801_v39  ;;  %v4708_v0 = vpop.eup %4707  ;;  %vm2707_vm8 = vweird.f32 %v4706_v50 }
 0x1b2   : > { %4711 = vrcp.f32 %v5824_v1  ;;  %v2694_v5 = vsel %vm2693_vm6, %v4702_v41, %v2690_v2  ;;  %v5829_v6 = vpop.f32.mrf.mxu3  ;;  %v2296_v7 = vpop.f32.mrf.mxu2  ;;  %vm2708_vm11 = vmor %vm2706_vm9, %vm2707_vm8  ;;  %v2725_v51 = vand.u32 2147483647, %v5824_v1  ;;  %v2727_v52 = vand.u32 2147483648, %v5824_v1 }
 0x1b3   : > { %v2699_v9 = vsel %vm2696_vm7, %v2698_v4, %v2694_v5  ;;  %v2399_v10 = vadd.f32 %v2296_v7, %v1995_v3  ;;  %v2703_v8 = vsub.f32 1.0, %v2702_v55  ;;  %4713 = vtanh.f32 %v5773_v48  ;;  %v5877_v3 = vpop.permute.xlu2 %3280 }
 0x1b4   : > { %v5833_v12 = vsel %vm2527_vm13, %v2699_v9, %v4708_v0  ;;  %v1894_v13 = vpop.f32.mrf.mxu1  ;;  %v1557_v15 = vpop.f32.mrf.mxu0  ;;  %vm2721_vm14 = vweird.f32 %v5824_v1  ;;  %vm2726_vm0 = vcmp.eq.f32.partialorder %v2725_v51, 8.507059e+37  ;;  %v2728_v63 = vor.u32 1.1754944e-38, %v2727_v52  ;;  %7130 = vst [vmem:[#allocation6_spill] sm:$0xff] %v5877_v3 }
 0x1b5   : > { %v5840_v20 = vadd.f32 %v5736_v14, %v2399_v10  ;;  %3428 = vrot.lane.b32.xlu1 %v5833_v12, %s4952_s5  ;;  %v2704_v37 = vmul.f32 %v4706_v50, %v2703_v8  ;;  %v1996_v32 = vadd.f32 %v1894_v13, %v1554_v53 }
 0x1b6   : > { %v5894_v21 = vpop.permute.xlu0 %3276 }
 0x1b7   : > { %v4710_v22 = vpop.eup %4709  ;;  %v4551_v23 = vmul.f32 -1.442695, %v5840_v20  ;;  %4544 = vmatmul.msk.bf16.gmra.mxu3 %vm1475_vm10, %v4642_v11  ;;  %v2705_v48 = vadd.f32 %v4706_v50, %v2704_v37  ;;  %7131 = vst [vmem:[#allocation7_spill] sm:$0xff] %v5894_v21 }
 0x1b8   : > { %v4712_v27 = vpop.eup %4711  ;;  %v5850_v30 = vadd.f32 1.0, %v4710_v22 }
 0x1b9   : > { %4715 = vpow2.f32 %v4551_v23  ;;  %v2709_v33 = vsel %vm2708_vm11, %v4706_v50, %v2705_v48  ;;  %v2717_v34 = vmul.f32 %v4712_v27, %v5824_v1  ;;  %v4714_v40 = vpop.eup %4713  ;;  %vm2722_vm10 = vweird.f32 %v4712_v27  ;;  %v5898_v48 = vpop.permute.xlu1 %3272 }
 0x1ba   : > { %4717 = vrcp.f32 %v5850_v30  ;;  %v5854_v36 = vpop.f32.mrf.mxu3  ;;  %v2298_v38 = vpop.f32.mrf.mxu2  ;;  %v2714_v42 = vsel %vm2711_vm12, %v2713_v31, %v2709_v33  ;;  %vm2723_vm15 = vmor %vm2721_vm14, %vm2722_vm10  ;;  %v2740_v11 = vand.u32 2147483647, %v5850_v30  ;;  %v2742_v8 = vand.u32 2147483648, %v5850_v30 }
 0x1bb   : > { %v2400_v41 = vadd.f32 %v2298_v38, %v1996_v32  ;;  %v2718_v39 = vsub.f32 1.0, %v2717_v34  ;;  %4719 = vtanh.f32 %v5795_v28  ;;  %v5859_v43 = vsel %vm2527_vm13, %v2714_v42, %v4714_v40 }
 0x1bc   : > { %v1897_v46 = vpop.f32.mrf.mxu1  ;;  %v1559_v49 = vpop.f32.mrf.mxu0  ;;  %3430 = vrot.lane.b32.xlu2 %v5859_v43, %s4952_s5  ;;  %vm2736_vm2 = vweird.f32 %v5850_v30  ;;  %vm2741_vm4 = vcmp.eq.f32.partialorder %v2740_v11, 8.507059e+37  ;;  %v2743_v31 = vor.u32 1.1754944e-38, %v2742_v8 }
 0x1bd   : > { %v5864_v53 = vadd.f32 %v5736_v14, %v2400_v41  ;;  %v2719_v57 = vmul.f32 %v4712_v27, %v2718_v39  ;;  %v1997_v2 = vadd.f32 %v1897_v46, %v1557_v15  ;;  %v5910_v46 = vpop.permute.xlu2 %3286 }
 0x1be   : > { %7132 = vst [vmem:[#allocation8_spill] sm:$0xff] %v5910_v46 }
 0x1bf   : > { %v4716_v28 = vpop.eup %4715  ;;  %v4552_v26 = vmul.f32 -1.442695, %v5864_v53  ;;  %v2720_v35 = vadd.f32 %v4712_v27, %v2719_v57 }
 0x1c0   : > { %v4718_v60 = vpop.eup %4717  ;;  %v5874_v61 = vadd.f32 1.0, %v4716_v28 }
 0x1c1   : > { %v2732_v50 = vmul.f32 %v4718_v60, %v5850_v30  ;;  %4721 = vpow2.f32 %v4552_v26  ;;  %v2724_v4 = vsel %vm2723_vm15, %v4712_v27, %v2720_v35  ;;  %v4720_v55 = vpop.eup %4719  ;;  %vm2737_vm1 = vweird.f32 %v4718_v60 }
 0x1c2   : > { %4723 = vrcp.f32 %v5874_v61  ;;  %v5880_v5 = vpop.f32.mrf.mxu3  ;;  %v2301_v7 = vpop.f32.mrf.mxu2  ;;  %v2729_v1 = vsel %vm2726_vm0, %v2728_v63, %v2724_v4  ;;  %vm2738_vm3 = vmor %vm2736_vm2, %vm2737_vm1  ;;  %v2755_v28 = vand.u32 2147483647, %v5874_v61  ;;  %v2757_v26 = vand.u32 2147483648, %v5874_v61 }
 0x1c3   : > { %v2733_v0 = vsub.f32 1.0, %v2732_v50  ;;  %v2401_v9 = vadd.f32 %v2301_v7, %v1997_v2  ;;  %v5884_v10 = vsel %vm2527_vm13, %v2729_v1, %v4720_v55  ;;  %4725 = vtanh.f32 %v5815_v25  ;;  %v5920_v63 = vpop.permute.xlu0 %3282  ;;  %v5924_v4 = vpop.permute.xlu1 %3278 }
 0x1c4   : > { %v1899_v13 = vpop.f32.mrf.mxu1  ;;  %3432 = vrot.lane.b32.xlu0 %v5884_v10, %s4952_s5  ;;  %v1562_v15 = vpop.f32.mrf.mxu0  ;;  %7133 = vst [vmem:[#allocation9_spill] sm:$0xff] %v5920_v63  ;;  %vm2751_vm6 = vweird.f32 %v5874_v61  ;;  %vm2756_vm8 = vcmp.eq.f32.partialorder %v2755_v28, 8.507059e+37  ;;  %v2758_v1 = vor.u32 1.1754944e-38, %v2757_v26 }
 0x1c5   : > { %v2734_v16 = vmul.f32 %v4718_v60, %v2733_v0  ;;  %v5892_v37 = vadd.f32 %v5736_v14, %v2401_v9  ;;  %v1998_v34 = vadd.f32 %v1899_v13, %v1559_v49  ;;  %7134 = vst [vmem:[#allocation10_spill] sm:$0xff] %v5924_v4 }
 0x1c7   : > { %v4722_v22 = vpop.eup %4721  ;;  %v2735_v23 = vadd.f32 %v4718_v60, %v2734_v16  ;;  %v4553_v25 = vmul.f32 -1.442695, %v5892_v37 }
 0x1c8   : > { %v4724_v27 = vpop.eup %4723  ;;  %v5900_v32 = vadd.f32 1.0, %v4722_v22 }
 0x1c9   : > { %v2739_v33 = vsel %vm2738_vm3, %v4718_v60, %v2735_v23  ;;  %4727 = vpow2.f32 %v4553_v25  ;;  %v2747_v38 = vmul.f32 %v4724_v27, %v5874_v61  ;;  %v4726_v40 = vpop.eup %4725  ;;  %vm2752_vm5 = vweird.f32 %v4724_v27 }
 0x1ca   : > { %v2744_v41 = vsel %vm2741_vm4, %v2743_v31, %v2739_v33  ;;  %4729 = vrcp.f32 %v5900_v32  ;;  %v5904_v30 = vpop.f32.mrf.mxu3  ;;  %v2303_v42 = vpop.f32.mrf.mxu2  ;;  %vm2753_vm7 = vmor %vm2751_vm6, %vm2752_vm5  ;;  %v2772_v33 = vand.u32 2147483648, %v5900_v32  ;;  %vm2766_vm11 = vweird.f32 %v5900_v32 }
 0x1cb   : > { %v5908_v39 = vsel %vm2527_vm13, %v2744_v41, %v4726_v40  ;;  %v2402_v51 = vadd.f32 %v2303_v42, %v1998_v34  ;;  %v2748_v52 = vsub.f32 1.0, %v2747_v38  ;;  %4731 = vtanh.f32 %v5840_v20  ;;  %v5941_v34 = vpop.permute.xlu2 %3292 }
 0x1cc   : > { %v1902_v49 = vpop.f32.mrf.mxu1  ;;  %3434 = vrot.lane.b32.xlu1 %v5908_v39, %s4952_s5  ;;  %v1564_v57 = vpop.f32.mrf.mxu0  ;;  %7135 = vst [vmem:[#allocation11_spill] sm:$0xff] %v5941_v34  ;;  %v2773_v26 = vor.u32 1.1754944e-38, %v2772_v33 }
 0x1cd   : > { %v5918_v35 = vadd.f32 %v5736_v14, %v2402_v51  ;;  %v2749_v60 = vmul.f32 %v4724_v27, %v2748_v52  ;;  %v1999_v0 = vadd.f32 %v1902_v49, %v1562_v15  ;;  %v5948_v51 = vpop.permute.xlu1 %3284  ;;  %v5950_v52 = vpop.permute.xlu0 %3288 }
 0x1ce   : > { %7136 = vst [vmem:[#allocation12_spill] sm:$0xff] %v5948_v51 }
 0x1cf   : > { %v4728_v50 = vpop.eup %4727  ;;  %v4554_v2 = vmul.f32 -1.442695, %v5918_v35  ;;  %v2750_v20 = vadd.f32 %v4724_v27, %v2749_v60  ;;  %7137 = vst [vmem:[#allocation13_spill] sm:$0xff] %v5950_v52 }
 0x1d0   : > { %v4730_v55 = vpop.eup %4729  ;;  %v5926_v7 = vadd.f32 1.0, %v4728_v50 }
 0x1d1   : > { %4733 = vpow2.f32 %v4554_v2  ;;  %v2754_v9 = vsel %vm2753_vm7, %v4724_v27, %v2750_v20  ;;  %v2762_v11 = vmul.f32 %v4730_v55, %v5900_v32  ;;  %v4732_v8 = vpop.eup %4731  ;;  %v2770_v27 = vand.u32 2147483647, %v5900_v32 }
 0x1d2   : > { %4735 = vrcp.f32 %v5926_v7  ;;  %v5930_v13 = vpop.f32.mrf.mxu3  ;;  %v2306_v16 = vpop.f32.mrf.mxu2  ;;  %v2759_v61 = vsel %vm2756_vm8, %v2758_v1, %v2754_v9  ;;  %vm2767_vm9 = vweird.f32 %v4730_v55  ;;  %vm2781_vm15 = vweird.f32 %v5926_v7 }
 0x1d3   : > { %v2403_v22 = vadd.f32 %v2306_v16, %v1999_v0  ;;  %v5934_v23 = vsel %vm2527_vm13, %v2759_v61, %v4732_v8  ;;  %v2763_v25 = vsub.f32 1.0, %v2762_v11  ;;  %4737 = vtanh.f32 %v5864_v53  ;;  %vm2768_vm12 = vmor %vm2766_vm11, %vm2767_vm9 }
 0x1d4   : > { %v1904_v31 = vpop.f32.mrf.mxu1  ;;  %3436 = vrot.lane.b32.xlu2 %v5934_v23, %s4952_s5  ;;  %v1567_v15 = vpop.f32.mrf.mxu0  ;;  %vm2771_vm10 = vcmp.eq.f32.partialorder %v2770_v27, 8.507059e+37 }
 0x1d5   : > { %v5944_v38 = vadd.f32 %v5736_v14, %v2403_v22  ;;  %v2764_v40 = vmul.f32 %v4730_v55, %v2763_v25  ;;  %v2000_v60 = vadd.f32 %v1904_v31, %v1564_v57  ;;  %v2787_v22 = vand.u32 2147483648, %v5926_v7  ;;  %v5971_v27 = vpop.permute.xlu2 %3298 }
 0x1d6   : > { %v2785_v25 = vand.u32 2147483647, %v5926_v7  ;;  %7138 = vst [vmem:[#allocation14_spill] sm:$0xff] %v5971_v27 }
 0x1d7   : > { %v4734_v41 = vpop.eup %4733  ;;  %v4555_v42 = vmul.f32 -1.442695, %v5944_v38  ;;  %v2765_v53 = vadd.f32 %v4730_v55, %v2764_v40 }
 0x1d8   : > { %v4736_v49 = vpop.eup %4735  ;;  %v5952_v28 = vadd.f32 1.0, %v4734_v41  ;;  %vm2786_vm1 = vcmp.eq.f32.partialorder %v2785_v25, 8.507059e+37 }
 0x1d9   : > { %4739 = vpow2.f32 %v4555_v42  ;;  %v2769_v50 = vsel %vm2768_vm12, %v4730_v55, %v2765_v53  ;;  %v2777_v2 = vmul.f32 %v4736_v49, %v5926_v7  ;;  %v4738_v20 = vpop.eup %4737  ;;  %vm2782_vm14 = vweird.f32 %v4736_v49 }
 0x1da   : > { %4741 = vrcp.f32 %v5952_v28  ;;  %v1942_v1 = vpop.f32.mrf.mxu3  ;;  %v2308_v32 = vpop.f32.mrf.mxu2  ;;  %v2774_v0 = vsel %vm2771_vm10, %v2773_v26, %v2769_v50  ;;  %vm2783_vm0 = vmor %vm2781_vm15, %vm2782_vm14  ;;  %v2788_v26 = vor.u32 1.1754944e-38, %v2787_v22  ;;  %vm2796_vm3 = vweird.f32 %v5952_v28 }
 0x1db   : > { %v5957_v9 = vadd.f32 %v1942_v1, %v5768_v59  ;;  %v2404_v11 = vadd.f32 %v2308_v32, %v2000_v60  ;;  %v5961_v8 = vsel %vm2527_vm13, %v2774_v0, %v4738_v20  ;;  %v2778_v55 = vsub.f32 1.0, %v2777_v2  ;;  %v5978_v60 = vpop.permute.xlu1 %3290  ;;  %v5980_v50 = vpop.permute.xlu0 %3294 }
 0x1dc   : > { %v1907_v16 = vpop.f32.mrf.mxu1  ;;  %3438 = vrot.lane.b32.xlu0 %v5961_v8, %s4952_s5  ;;  %v1569_v57 = vpop.f32.mrf.mxu0  ;;  %4743 = vtanh.f32 %v5892_v37  ;;  %7139 = vst [vmem:[#allocation15_spill] sm:$0xff] %v5978_v60 }
 0x1dd   : > { %v5967_v61 = vadd.f32 %v5736_v14, %v2404_v11  ;;  %v2779_v59 = vmul.f32 %v4736_v49, %v2778_v55  ;;  %v2001_v37 = vadd.f32 %v1907_v16, %v1567_v15  ;;  %7140 = vst [vmem:[#allocation16_spill] sm:$0xff] %v5980_v50  ;;  %v2800_v16 = vand.u32 2147483647, %v5952_v28 }
 0x1de   : > { %v2802_v55 = vand.u32 2147483648, %v5952_v28 }
 0x1df   : > { %v4740_v31 = vpop.eup %4739  ;;  %v4556_v33 = vmul.f32 -1.442695, %v5967_v61  ;;  %v2780_v42 = vadd.f32 %v4736_v49, %v2779_v59  ;;  %vm2801_vm5 = vcmp.eq.f32.partialorder %v2800_v16, 8.507059e+37 }
 0x1e0   : > { %v4742_v40 = vpop.eup %4741  ;;  %v5974_v41 = vadd.f32 1.0, %v4740_v31 }
 0x1e1   : > { %4745 = vpow2.f32 %v4556_v33  ;;  %v2792_v53 = vmul.f32 %v4742_v40, %v5952_v28  ;;  %v2784_v1 = vsel %vm2783_vm0, %v4736_v49, %v2780_v42  ;;  %vm2797_vm2 = vweird.f32 %v4742_v40 }
 0x1e2   : > { %4747 = vrcp.f32 %v5974_v41  ;;  %v1944_v2 = vpop.f32.mrf.mxu3  ;;  %v2311_v20 = vpop.f32.mrf.mxu2  ;;  %v2789_v11 = vsel %vm2786_vm1, %v2788_v26, %v2784_v1  ;;  %vm2798_vm4 = vmor %vm2796_vm3, %vm2797_vm2  ;;  %vm2811_vm7 = vweird.f32 %v5974_v41 }
 0x1e3   : > { %v4744_v32 = vpop.eup %4743  ;;  %v2793_v0 = vsub.f32 1.0, %v2792_v53  ;;  %v5984_v7 = vadd.f32 %v1944_v2, %v5783_v17  ;;  %v2405_v15 = vadd.f32 %v2311_v20, %v2001_v37  ;;  %4749 = vtanh.f32 %v5918_v35  ;;  %v6002_v26 = vpop.permute.xlu2 %3304 }
 0x1e4   : > { %v1909_v22 = vpop.f32.mrf.mxu1  ;;  %v5991_v59 = vsel %vm2527_vm13, %v2789_v11, %v4744_v32  ;;  %v1572_v49 = vpop.f32.mrf.mxu0  ;;  %v2803_v53 = vor.u32 1.1754944e-38, %v2802_v55  ;;  %7141 = vst [vmem:[#allocation17_spill] sm:$0xff] %v6002_v26 }
 0x1e5   : > { %v2794_v25 = vmul.f32 %v4742_v40, %v2793_v0  ;;  %v5994_v31 = vadd.f32 %v5736_v14, %v2405_v15  ;;  %3440 = vrot.lane.b32.xlu1 %v5991_v59, %s4952_s5  ;;  %v2002_v20 = vadd.f32 %v1909_v22, %v1569_v57  ;;  %v6015_v57 = vpop.permute.xlu0 %3300  ;;  %v2815_v22 = vand.u32 2147483647, %v5974_v41 }
 0x1e6   : > { %7143 = vst [vmem:[#allocation19_spill] sm:$0xff] %v6015_v57 }
 0x1e7   : > { %v4746_v17 = vpop.eup %4745  ;;  %v2795_v35 = vadd.f32 %v4742_v40, %v2794_v25  ;;  %v4557_v33 = vmul.f32 -1.442695, %v5994_v31  ;;  %vm2816_vm9 = vcmp.eq.f32.partialorder %v2815_v22, 8.507059e+37 }
 0x1e8   : > { %v4748_v42 = vpop.eup %4747  ;;  %v6000_v37 = vadd.f32 1.0, %v4746_v17  ;;  %v2817_v17 = vand.u32 2147483648, %v5974_v41 }
 0x1e9   : > { %v2799_v2 = vsel %vm2798_vm4, %v4742_v40, %v2795_v35  ;;  %4751 = vpow2.f32 %v4557_v33  ;;  %v2807_v1 = vmul.f32 %v4748_v42, %v5974_v41  ;;  %v4750_v32 = vpop.eup %4749  ;;  %v6013_v40 = vpop.permute.xlu1 %3296  ;;  %vm2812_vm6 = vweird.f32 %v4748_v42 }
 0x1ea   : > { %4753 = vrcp.f32 %v6000_v37  ;;  %v2804_v0 = vsel %vm2801_vm5, %v2803_v53, %v2799_v2  ;;  %v1947_v28 = vpop.f32.mrf.mxu3  ;;  %v2313_v15 = vpop.f32.mrf.mxu2  ;;  %7142 = vst [vmem:[#allocation18_spill] sm:$0xff] %v6013_v40  ;;  %vm2813_vm8 = vmor %vm2811_vm7, %vm2812_vm6  ;;  %vm2826_vm12 = vweird.f32 %v6000_v37 }
 0x1eb   : > { %v6008_v11 = vsel %vm2527_vm13, %v2804_v0, %v4750_v32  ;;  %v2808_v25 = vsub.f32 1.0, %v2807_v1  ;;  %v6011_v16 = vadd.f32 %v1947_v28, %v5804_v45  ;;  %v2406_v55 = vadd.f32 %v2313_v15, %v2002_v20  ;;  %v6031_v41 = vpop.permute.xlu2 %3310 }
 0x1ec   : > { %4755 = vtanh.f32 %v5944_v38  ;;  %v1912_v35 = vpop.f32.mrf.mxu1  ;;  %3442 = vrot.lane.b32.xlu2 %v6008_v11, %s4952_s5  ;;  %v1574_v33 = vpop.f32.mrf.mxu0  ;;  %v2818_v0 = vor.u32 1.1754944e-38, %v2817_v17  ;;  %7144 = vst [vmem:[#allocation20_spill] sm:$0xff] %v6031_v41 }
 0x1ed   : > { %v2809_v53 = vmul.f32 %v4748_v42, %v2808_v25  ;;  %v6023_v45 = vadd.f32 %v5736_v14, %v2406_v55  ;;  %v2003_v15 = vadd.f32 %v1912_v35, %v1572_v49 }
 0x1ef   : > { %v4752_v2 = vpop.eup %4751  ;;  %v2810_v20 = vadd.f32 %v4748_v42, %v2809_v53  ;;  %v4558_v38 = vmul.f32 -1.442695, %v6023_v45 }
 0x1f0   : > { %v4754_v1 = vpop.eup %4753  ;;  %v6027_v32 = vadd.f32 1.0, %v4752_v2 }
 0x1f1   : > { %v2814_v28 = vsel %vm2813_vm8, %v4748_v42, %v2810_v20  ;;  %4757 = vpow2.f32 %v4558_v38  ;;  %v2822_v25 = vmul.f32 %v4754_v1, %v6000_v37  ;;  %v6045_v38 = vpop.permute.xlu1 %3302  ;;  %vm2827_vm11 = vweird.f32 %v4754_v1 }
 0x1f2   : > { %v4756_v26 = vpop.eup %4755  ;;  %4759 = vrcp.f32 %v6027_v32  ;;  %v2819_v55 = vsel %vm2816_vm9, %v2818_v0, %v2814_v28  ;;  %v1949_v53 = vpop.f32.mrf.mxu3  ;;  %7145 = vst [vmem:[#allocation21_spill] sm:$0xff] %v6045_v38  ;;  %vm2828_vm10 = vmor %vm2826_vm12, %vm2827_vm11  ;;  %vm2841_vm0 = vweird.f32 %v6027_v32 }
 0x1f3   : > { %v2316_v27 = vpop.f32.mrf.mxu2  ;;  %v6035_v2 = vsel %vm2527_vm13, %v2819_v55, %v4756_v26  ;;  %v6038_v22 = vadd.f32 %v1949_v53, %v5829_v6  ;;  %v2823_v35 = vsub.f32 1.0, %v2822_v25  ;;  %v6047_v0 = vpop.permute.xlu0 %3306  ;;  %4761 = vtanh.f32 %v5967_v61 }
 0x1f4   : > { %v2407_v42 = vadd.f32 %v2316_v27, %v2003_v15  ;;  %v1914_v17 = vpop.f32.mrf.mxu1  ;;  %3444 = vrot.lane.b32.xlu0 %v6035_v2, %s4952_s5  ;;  %v1577_v49 = vpop.f32.mrf.mxu0  ;;  %7146 = vst [vmem:[#allocation22_spill] sm:$0xff] %v6047_v0  ;;  %v2830_v6 = vand.u32 2147483647, %v6000_v37  ;;  %v2832_v27 = vand.u32 2147483648, %v6000_v37  ;;  %v2847_v37 = vand.u32 2147483648, %v6027_v32 }
 0x1f5   : > { %v2824_v26 = vmul.f32 %v4754_v1, %v2823_v35  ;;  %v2004_v41 = vadd.f32 %v1914_v17, %v1574_v33  ;;  %v2845_v33 = vand.u32 2147483647, %v6027_v32 }
 0x1f6   : > { %v6043_v20 = vadd.f32 %v5736_v14, %v2407_v42  ;;  %vm2831_vm14 = vcmp.eq.f32.partialorder %v2830_v6, 8.507059e+37  ;;  %v2833_v0 = vor.u32 1.1754944e-38, %v2832_v27  ;;  %v6064_v6 = vpop.permute.xlu2 %3316 }
 0x1f7   : > { %v4758_v28 = vpop.eup %4757  ;;  %v2825_v53 = vadd.f32 %v4754_v1, %v2824_v26  ;;  %7147 = vst [vmem:[#allocation23_spill] sm:$0xff] %v6064_v6  ;;  %vm2846_vm2 = vcmp.eq.f32.partialorder %v2845_v33, 8.507059e+37 }
 0x1f8   : > { %v4559_v15 = vmul.f32 -1.442695, %v6043_v20  ;;  %v4760_v55 = vpop.eup %4759  ;;  %v6053_v25 = vadd.f32 1.0, %v4758_v28 }
 0x1f9   : > { %v2837_v42 = vmul.f32 %v4760_v55, %v6027_v32  ;;  %v2829_v34 = vsel %vm2828_vm10, %v4754_v1, %v2825_v53  ;;  %v4762_v26 = vpop.eup %4761  ;;  %vm2842_vm15 = vweird.f32 %v4760_v55  ;;  %v2848_v53 = vor.u32 1.1754944e-38, %v2847_v37 }
 0x1fa   : > { %4763 = vpow2.f32 %v4559_v15  ;;  %v1952_v61 = vpop.f32.mrf.mxu3  ;;  %v2834_v15 = vsel %vm2831_vm14, %v2833_v0, %v2829_v34  ;;  %vm2843_vm1 = vmor %vm2841_vm0, %vm2842_vm15  ;;  %vm2856_vm4 = vweird.f32 %v6053_v25 }
 0x1fb   : > { %4765 = vrcp.f32 %v6053_v25  ;;  %v2318_v35 = vpop.f32.mrf.mxu2  ;;  %v2838_v38 = vsub.f32 1.0, %v2837_v42  ;;  %v6059_v57 = vadd.f32 %v1952_v61, %v5854_v36  ;;  %v6071_v36 = vsel %vm2527_vm13, %v2834_v15, %v4762_v26 }
 0x1fc   : > { %v2408_v28 = vadd.f32 %v2318_v35, %v2004_v41  ;;  %4767 = vtanh.f32 %v5994_v31  ;;  %v1917_v17 = vpop.f32.mrf.mxu1  ;;  %v1579_v40 = vpop.f32.mrf.mxu0  ;;  %3446 = vrot.lane.b32.xlu1 %v6071_v36, %s4952_s5 }
 0x1fd   : > { %v2839_v50 = vmul.f32 %v4760_v55, %v2838_v38  ;;  %v6077_v41 = vpop.permute.xlu1 %3308  ;;  %v6079_v38 = vpop.permute.xlu0 %3312 }
 0x1fe   : > { %v6067_v27 = vadd.f32 %v5736_v14, %v2408_v28  ;;  %7148 = vst [vmem:[#allocation24_spill] sm:$0xff] %v6077_v41  ;;  %v2005_v28 = vadd.f32 %v1917_v17, %v1577_v49  ;;  %v2862_v49 = vand.u32 2147483648, %v6053_v25 }
 0x1ff   : > { %v2840_v1 = vadd.f32 %v4760_v55, %v2839_v50  ;;  %7149 = vst [vmem:[#allocation25_spill] sm:$0xff] %v6079_v38 }
 0x200   : > { %v4764_v31 = vpop.eup %4763  ;;  %v4560_v34 = vmul.f32 -1.442695, %v6067_v27 }
 0x201   : > { %v4766_v0 = vpop.eup %4765  ;;  %v6081_v42 = vadd.f32 1.0, %v4764_v31  ;;  %v2844_v61 = vsel %vm2843_vm1, %v4760_v55, %v2840_v1  ;;  %v2860_v55 = vand.u32 2147483647, %v6053_v25 }
 0x202   : > { %v2852_v35 = vmul.f32 %v4766_v0, %v6053_v25  ;;  %4769 = vpow2.f32 %v4560_v34  ;;  %v4768_v50 = vpop.eup %4767  ;;  %v2849_v26 = vsel %vm2846_vm2, %v2848_v53, %v2844_v61  ;;  %v1954_v32 = vpop.f32.mrf.mxu3  ;;  %vm2857_vm3 = vweird.f32 %v4766_v0 }
 0x203   : > { %4771 = vrcp.f32 %v6081_v42  ;;  %v2321_v15 = vpop.f32.mrf.mxu2  ;;  %v6087_v41 = vsel %vm2527_vm13, %v2849_v26, %v4768_v50  ;;  %v6090_v33 = vadd.f32 %v1954_v32, %v5880_v5  ;;  %v6101_v61 = vpop.permute.xlu2 %3322  ;;  %vm2858_vm5 = vmor %vm2856_vm4, %vm2857_vm3  ;;  %vm2861_vm6 = vcmp.eq.f32.partialorder %v2860_v55, 8.507059e+37 }
 0x204   : > { %v2853_v6 = vsub.f32 1.0, %v2852_v35  ;;  %v2409_v37 = vadd.f32 %v2321_v15, %v2005_v28  ;;  %4773 = vtanh.f32 %v6023_v45  ;;  %v1919_v17 = vpop.f32.mrf.mxu1  ;;  %3448 = vrot.lane.b32.xlu2 %v6087_v41, %s4952_s5  ;;  %v1582_v34 = vpop.f32.mrf.mxu0  ;;  %7150 = vst [vmem:[#allocation26_spill] sm:$0xff] %v6101_v61  ;;  %v2013_v28 = vadd.f32 %v5904_v30, %v5747_v29 }
 0x205   : > { %v2006_v26 = vadd.f32 %v1919_v17, %v1579_v40  ;;  %v6108_v32 = vpop.permute.xlu1 %3314  ;;  %v6110_v15 = vpop.permute.xlu0 %3318  ;;  %v2875_v17 = vand.u32 2147483647, %v6081_v42  ;;  %vm2871_vm8 = vweird.f32 %v6081_v42 }
 0x206   : > { %v2854_v31 = vmul.f32 %v4766_v0, %v2853_v6  ;;  %v6098_v1 = vadd.f32 %v5736_v14, %v2409_v37  ;;  %v2863_v6 = vor.u32 1.1754944e-38, %v2862_v49  ;;  %7151 = vst [vmem:[#allocation27_spill] sm:$0xff] %v6108_v32 }
 0x207   : > { %7152 = vst [vmem:[#allocation28_spill] sm:$0xff] %v6110_v15  ;;  %vm2876_vm11 = vcmp.eq.f32.partialorder %v2875_v17, 8.507059e+37 }
 0x208   : > { %v4770_v53 = vpop.eup %4769  ;;  %v2855_v5 = vadd.f32 %v4766_v0, %v2854_v31  ;;  %v4561_v45 = vmul.f32 -1.442695, %v6098_v1 }
 0x209   : > { %v4772_v35 = vpop.eup %4771  ;;  %v6106_v50 = vadd.f32 1.0, %v4770_v53  ;;  %v2877_v53 = vand.u32 2147483648, %v6081_v42 }
 0x20a   : > { %v2859_v14 = vsel %vm2858_vm5, %v4766_v0, %v2855_v5  ;;  %4775 = vpow2.f32 %v4561_v45  ;;  %v2867_v25 = vmul.f32 %v4772_v35, %v6081_v42  ;;  %v4774_v37 = vpop.eup %4773  ;;  %v2341_v29 = vpop.f32.mrf.mxu3  ;;  %v6126_v5 = vld [vmem:[%s7118_s2] ss:$0 sm:$0xff]  ;;  %vm2872_vm7 = vweird.f32 %v4772_v35 }
 0x20b   : > { %v2864_v31 = vsel %vm2861_vm6, %v2863_v6, %v2859_v14  ;;  %4777 = vrcp.f32 %v6106_v50  ;;  %v2323_v61 = vpop.f32.mrf.mxu2  ;;  %v2417_v0 = vadd.f32 %v2341_v29, %v2013_v28  ;;  %vm2873_vm9 = vmor %vm2871_vm8, %vm2872_vm7  ;;  %vm2886_vm12 = vweird.f32 %v6106_v50 }
 0x20c   : > { %v6116_v30 = vsel %vm2527_vm13, %v2864_v31, %v4774_v37  ;;  %v2410_v55 = vadd.f32 %v2323_v61, %v2006_v26  ;;  %v2868_v49 = vsub.f32 1.0, %v2867_v25  ;;  %4779 = vtanh.f32 %v6043_v20  ;;  %v1922_v40 = vpop.f32.mrf.mxu1  ;;  %v1584_v26 = vpop.f32.mrf.mxu0 }
 0x20d   : > { %3450 = vrot.lane.b32.xlu0 %v6116_v30, %s4952_s5  ;;  %v2517_v61 = vadd.f32 %v6126_v5, %v2417_v0  ;;  %v2014_v31 = vadd.f32 %v5930_v13, %v5757_v44  ;;  %v3425_v0 = vpop.permute.xlu2 %3424  ;;  %v2890_v44 = vand.u32 2147483647, %v6106_v50 }
 0x20e   : > { %v2510_v45 = vadd.f32 %v6126_v5, %v2410_v55  ;;  %v2869_v28 = vmul.f32 %v4772_v35, %v2868_v49  ;;  %v2878_v55 = vor.u32 1.1754944e-38, %v2877_v53  ;;  %v2007_v49 = vadd.f32 %v1922_v40, %v1582_v34  ;;  %v6145_v34 = vpop.permute.xlu1 %3320  ;;  %v6149_v40 = vpop.permute.xlu0 %3324 }
 0x20f   : > { %v4569_v14 = vmul.f32 -1.442695, %v2517_v61  ;;  %7153 = vst [vmem:[#allocation29_spill] sm:$0xff] %v6145_v34  ;;  %vm6160_vm14 = vcmp.eq.f32.partialorder %v2890_v44, 8.507059e+37 }
 0x210   : > { %v4776_v20 = vpop.eup %4775  ;;  %v4562_v6 = vmul.f32 -1.442695, %v2510_v45  ;;  %v2870_v25 = vadd.f32 %v4772_v35, %v2869_v28  ;;  %7154 = vst [vmem:[#allocation30_spill] sm:$0xff] %v6149_v40 }
 0x211   : > { %v6131_v37 = vpop.eup %4777  ;;  %v6135_v29 = vadd.f32 1.0, %v4776_v20 }
 0x212   : > { %4781 = vpow2.f32 %v4562_v6  ;;  %v2874_v15 = vsel %vm2873_vm9, %v4772_v35, %v2870_v25  ;;  %v2882_v32 = vmul.f32 %v6131_v37, %v6106_v50  ;;  %v4780_v28 = vpop.eup %4779  ;;  %v2343_v38 = vpop.f32.mrf.mxu3  ;;  %v3520_v6 = vmul.f32 %v3425_v0, %v5787_v19 }
 0x213   : > { %4783 = vrcp.f32 %v6135_v29  ;;  %v2326_v42 = vpop.f32.mrf.mxu2  ;;  %v2879_v52 = vsel %vm2876_vm11, %v2878_v55, %v2874_v15  ;;  %v2418_v20 = vadd.f32 %v2343_v38, %v2014_v31  ;;  %v2892_v15 = vand.u32 2147483648, %v6106_v50 }
 0x214   : > { %4785 = vpow2.f32 %v4569_v14  ;;  %v2411_v13 = vadd.f32 %v2326_v42, %v2007_v49  ;;  %v6143_v17 = vsel %vm2527_vm13, %v2879_v52, %v4780_v28  ;;  %v1924_v35 = vpop.f32.mrf.mxu1  ;;  %v2883_v53 = vsub.f32 1.0, %v2882_v32 }
 0x215   : > { %3452 = vrot.lane.b32.xlu1 %v6143_v17, %s4952_s5  ;;  %4787 = vtanh.f32 %v6067_v27  ;;  %v2518_v52 = vadd.f32 %v6126_v5, %v2418_v20  ;;  %vm2887_vm10 = vweird.f32 %v6131_v37  ;;  %v2893_v49 = vor.u32 1.1754944e-38, %v2892_v15 }
 0x216   : > { %v2511_v38 = vadd.f32 %v6126_v5, %v2411_v13  ;;  %4789 = vtanh.f32 %v6098_v1  ;;  %v2884_v14 = vmul.f32 %v6131_v37, %v2883_v53  ;;  %v2008_v42 = vadd.f32 %v1924_v35, %v1584_v26  ;;  %v1587_v13 = vpop.f32.mrf.mxu0  ;;  %vm2888_vm15 = vmor %vm2886_vm12, %vm2887_vm10  ;;  %v6196_v27 = vpop.permute.xlu1 %3326 }
 0x217   : > { %4791 = vtanh.f32 %v2510_v45  ;;  %v4570_v31 = vmul.f32 -1.442695, %v2518_v52  ;;  %v2905_v44 = vand.u32 2147483647, %v6135_v29  ;;  %v2907_v26 = vand.u32 2147483648, %v6135_v29  ;;  %7157 = vst [vmem:[#allocation31_spill] sm:$0xff] %v6196_v27 }
 0x218   : > { %v4782_v25 = vpop.eup %4781  ;;  %v4563_v32 = vmul.f32 -1.442695, %v2511_v38  ;;  %4793 = vtanh.f32 %v2517_v61  ;;  %v2885_v1 = vadd.f32 %v6131_v37, %v2884_v14  ;;  %vm2901_vm0 = vweird.f32 %v6135_v29 }
 0x219   : > { %v6164_v55 = vpop.eup %4783  ;;  %v6166_v0 = vadd.f32 1.0, %v4782_v25  ;;  %vm6199_vm1 = vcmp.eq.f32.partialorder %v2905_v44, 8.507059e+37 }
 0x21a   : > { %v4786_v28 = vpop.eup %4785  ;;  %4795 = vpow2.f32 %v4563_v32  ;;  %v2897_v45 = vmul.f32 %v6164_v55, %v6135_v29  ;;  %v2346_v53 = vpop.f32.mrf.mxu3  ;;  %v2889_v15 = vsel %vm2888_vm15, %v6131_v37, %v2885_v1  ;;  %vm2902_vm2 = vweird.f32 %v6164_v55 }
 0x21b   : > { %4797 = vrcp.f32 %v6166_v0  ;;  %v6177_v61 = vadd.f32 1.0, %v4786_v28  ;;  %v2328_v20 = vpop.f32.mrf.mxu2  ;;  %v4788_v35 = vpop.eup %4787  ;;  %v2419_v50 = vadd.f32 %v2346_v53, %v5957_v9  ;;  %v2894_v25 = vsel %vm6160_vm14, %v2893_v49, %v2889_v15  ;;  %vm6218_vm3 = vmor %vm2901_vm0, %vm2902_vm2 }
 0x21c   : > { %4799 = vpow2.f32 %v4570_v31  ;;  %v2412_v14 = vadd.f32 %v2328_v20, %v2008_v42  ;;  %v4790_v32 = vpop.eup %4789  ;;  %v1927_v40 = vpop.f32.mrf.mxu1  ;;  %v6188_v28 = vsel %vm2527_vm13, %v2894_v25, %v4788_v35  ;;  %v2898_v37 = vsub.f32 1.0, %v2897_v45 }
 0x21d   : > { %4801 = vrcp.f32 %v6177_v61  ;;  %3584 = vrot.lane.b32.xlu1 %v3520_v6, %s4952_s5  ;;  %v6190_v1 = vpop.eup %4791  ;;  %v2519_v9 = vadd.f32 %v6126_v5, %v2419_v50  ;;  %3454 = vrot.lane.b32.xlu2 %v6188_v28, %s4952_s5  ;;  %v3427_v42 = vpop.permute.xlu0 %3426  ;;  %v2908_v20 = vor.u32 1.1754944e-38, %v2907_v26  ;;  %vm2916_vm4 = vweird.f32 %v6166_v0 }
 0x21e   : > { %v2512_v31 = vadd.f32 %v6126_v5, %v2412_v14  ;;  %v6203_v49 = vpop.eup %4793  ;;  %4803 = vtanh.f32 %v2511_v38  ;;  %v2899_v45 = vmul.f32 %v6164_v55, %v2898_v37  ;;  %v2009_v14 = vadd.f32 %v1927_v40, %v1587_v13 }
 0x21f   : > { %4805 = vtanh.f32 %v2518_v52  ;;  %v4571_v35 = vmul.f32 -1.442695, %v2519_v9  ;;  %v3025_v38 = vand.u32 2147483647, %v6177_v61  ;;  %v3521_v37 = vmul.f32 %v3427_v42, %v5808_v47 }
 0x220   : > { %v4796_v53 = vpop.eup %4795  ;;  %v4564_v15 = vmul.f32 -1.442695, %v2512_v31  ;;  %4807 = vtanh.f32 %v2512_v31  ;;  %v2900_v25 = vadd.f32 %v6164_v55, %v2899_v45  ;;  %v3027_v40 = vand.u32 2147483648, %v6177_v61 }
 0x221   : > { %v6207_v50 = vpop.eup %4797  ;;  %v6209_v44 = vadd.f32 1.0, %v4796_v53  ;;  %vm3021_vm5 = vweird.f32 %v6177_v61  ;;  %v2920_v53 = vand.u32 2147483647, %v6166_v0  ;;  %vm6248_vm6 = vcmp.eq.f32.partialorder %v3025_v38, 8.507059e+37 }
 0x222   : > { %v4800_v27 = vpop.eup %4799  ;;  %4809 = vpow2.f32 %v4564_v15  ;;  %v2912_v13 = vmul.f32 %v6207_v50, %v6166_v0  ;;  %v2348_v45 = vpop.f32.mrf.mxu3  ;;  %v2904_v29 = vsel %vm6218_vm3, %v6164_v55, %v2900_v25  ;;  %v3028_v52 = vor.u32 1.1754944e-38, %v3027_v40 }
 0x223   : > { %v6226_v26 = vpop.eup %4801  ;;  %4811 = vrcp.f32 %v6209_v44  ;;  %v6229_v31 = vadd.f32 1.0, %v4800_v27  ;;  %v2331_v42 = vpop.f32.mrf.mxu2  ;;  %v2420_v34 = vadd.f32 %v2348_v45, %v5984_v7  ;;  %v2909_v46 = vsel %vm6199_vm1, %v2908_v20, %v2904_v29 }
 0x224   : > { %4813 = vpow2.f32 %v4571_v35  ;;  %v2413_v15 = vadd.f32 %v2331_v42, %v2009_v14  ;;  %v6239_v63 = vpop.eup %4803  ;;  %v1589_v27 = vpop.f32.mrf.mxu0  ;;  %v6244_v55 = vsel %vm2527_vm13, %v2909_v46, %v4790_v32  ;;  %v3017_v25 = vmul.f32 %v6226_v26, %v6177_v61 }
 0x225   : > { %4815 = vrcp.f32 %v6229_v31  ;;  %v1929_v3 = vpop.f32.mrf.mxu1  ;;  %v6252_v7 = vpop.eup %4805  ;;  %v2520_v20 = vadd.f32 %v6126_v5, %v2420_v34  ;;  %3586 = vrot.lane.b32.xlu2 %v3521_v37, %s4952_s5  ;;  %3456 = vrot.lane.b32.xlu0 %v6244_v55, %s4952_s5  ;;  %v2913_v46 = vsub.f32 1.0, %v2912_v13  ;;  %v2922_v32 = vand.u32 2147483648, %v6166_v0 }
 0x226   : > { %v2513_v6 = vadd.f32 %v6126_v5, %v2413_v15  ;;  %v6260_v14 = vpop.eup %4807  ;;  %4817 = vtanh.f32 %v2519_v9  ;;  %v3018_v38 = vsub.f32 1.0, %v3017_v25  ;;  %vm2917_vm7 = vweird.f32 %v6207_v50 }
 0x227   : > { %v3429_v29 = vpop.permute.xlu1 %3428  ;;  %vm3022_vm8 = vweird.f32 %v6226_v26  ;;  %v2914_v34 = vmul.f32 %v6207_v50, %v2913_v46  ;;  %vm6265_vm9 = vcmp.eq.f32.partialorder %v2920_v53, 8.507059e+37  ;;  %v4572_v15 = vmul.f32 -1.442695, %v2520_v20  ;;  %vm2918_vm11 = vmor %vm2916_vm4, %vm2917_vm7 }
 0x228   : > { %v4810_v42 = vpop.eup %4809  ;;  %v4565_v45 = vmul.f32 -1.442695, %v2513_v6  ;;  %4819 = vtanh.f32 %v2513_v6  ;;  %v2010_v9 = vadd.f32 %v1929_v3, %v1589_v27  ;;  %v3019_v40 = vmul.f32 %v6226_v26, %v3018_v38  ;;  %vm3023_vm12 = vmor %vm3021_vm5, %vm3022_vm8 }
 0x229   : > { %v6269_v13 = vpop.eup %4811  ;;  %v2915_v60 = vadd.f32 %v6207_v50, %v2914_v34  ;;  %v2923_v21 = vor.u32 1.1754944e-38, %v2922_v32  ;;  %v3040_v51 = vand.u32 2147483647, %v6229_v31  ;;  %v6276_v53 = vadd.f32 1.0, %v4810_v42 }
 0x22a   : > { %v4814_v25 = vpop.eup %4813  ;;  %4821 = vpow2.f32 %v4565_v45  ;;  %v3522_v4 = vmul.f32 %v3429_v29, %v5833_v12  ;;  %v2351_v54 = vpop.f32.mrf.mxu3  ;;  %v3020_v3 = vadd.f32 %v6226_v26, %v3019_v40  ;;  %v2927_v42 = vmul.f32 %v6269_v13, %v6209_v44 }
 0x22b   : > { %v6274_v24 = vpop.eup %4815  ;;  %v6278_v46 = vadd.f32 1.0, %v4814_v25  ;;  %v2333_v6 = vpop.f32.mrf.mxu2  ;;  %v2421_v32 = vadd.f32 %v2351_v54, %v6011_v16  ;;  %v2919_v38 = vsel %vm2918_vm11, %v6207_v50, %v2915_v60  ;;  %4823 = vpow2.f32 %v4572_v15 }
 0x22c   : > { %v2414_v27 = vadd.f32 %v2333_v6, %v2010_v9  ;;  %v6294_v45 = vpop.eup %4817  ;;  %v3431_v29 = vpop.permute.xlu2 %3430  ;;  %v3024_v0 = vsel %vm3023_vm12, %v6226_v26, %v3020_v3  ;;  %v2924_v54 = vsel %vm6265_vm9, %v2923_v21, %v2919_v38  ;;  %v3032_v16 = vmul.f32 %v6274_v24, %v6229_v31 }
 0x22d   : > { %v1932_v34 = vpop.f32.mrf.mxu1  ;;  %4825 = vrcp.f32 %v6278_v46  ;;  %v2521_v61 = vadd.f32 %v6126_v5, %v2421_v32  ;;  %v3029_v50 = vsel %vm6248_vm6, %v3028_v52, %v3024_v0  ;;  %3588 = vrot.lane.b32.xlu0 %v3522_v4, %s4952_s5  ;;  %v1592_v26 = vpop.f32.mrf.mxu0  ;;  %v6317_v37 = vsel %vm2527_vm13, %v2924_v54, %v6190_v1 }
 0x22e   : > { %v2514_v60 = vadd.f32 %v6126_v5, %v2414_v27  ;;  %v6307_v15 = vpop.eup %4819  ;;  %v6312_v21 = vsel %vm2527_vm13, %v3029_v50, %v6203_v49  ;;  %v3033_v9 = vsub.f32 1.0, %v3032_v16  ;;  %v3042_v40 = vand.u32 2147483648, %v6229_v31  ;;  %3458 = vrot.lane.b32.xlu1 %v6317_v37, %s4952_s5 }
 0x22f   : > { %v3523_v52 = vmul.f32 %v3431_v29, %v5859_v43  ;;  %4827 = vtanh.f32 %v2520_v20  ;;  %3472 = vrot.lane.b32.xlu2 %v6312_v21, %s4952_s5  ;;  %vm3036_vm10 = vweird.f32 %v6229_v31  ;;  %vm6326_vm14 = vcmp.eq.f32.partialorder %v3040_v51, 8.507059e+37 }
 0x230   : > { %v4822_v35 = vpop.eup %4821  ;;  %4829 = vrcp.f32 %v6276_v53  ;;  %v2011_v1 = vadd.f32 %v1932_v34, %v1592_v26  ;;  %v3034_v49 = vmul.f32 %v6274_v24, %v3033_v9  ;;  %vm3037_vm15 = vweird.f32 %v6274_v24 }
 0x231   : > { %v4566_v20 = vmul.f32 -1.442695, %v2514_v60  ;;  %4831 = vtanh.f32 %v2514_v60  ;;  %v4573_v25 = vmul.f32 -1.442695, %v2521_v61  ;;  %v2928_v6 = vsub.f32 1.0, %v2927_v42  ;;  %v4824_v3 = vpop.eup %4823  ;;  %vm3038_vm0 = vmor %vm3036_vm10, %vm3037_vm15 }
 0x232   : > { %v6333_v27 = vadd.f32 1.0, %v4822_v35  ;;  %4833 = vtanh.f32 %v2521_v61  ;;  %v2353_v51 = vpop.f32.mrf.mxu3  ;;  %v3035_v38 = vadd.f32 %v6274_v24, %v3034_v49  ;;  %v3043_v29 = vor.u32 1.1754944e-38, %v3042_v40 }
 0x233   : > { %v2336_v32 = vpop.f32.mrf.mxu2  ;;  %v6336_v0 = vpop.eup %4825  ;;  %v2422_v54 = vadd.f32 %v2353_v51, %v6038_v22  ;;  %v2929_v42 = vmul.f32 %v6269_v13, %v2928_v6  ;;  %vm2931_vm1 = vweird.f32 %v6209_v44  ;;  %vm2932_vm2 = vweird.f32 %v6269_v13 }
 0x234   : > { %v2415_v34 = vadd.f32 %v2336_v32, %v2011_v1  ;;  %v3039_v16 = vsel %vm3038_vm0, %v6274_v24, %v3035_v38  ;;  %v2935_v60 = vand.u32 2147483647, %v6209_v44  ;;  %v2937_v61 = vand.u32 2147483648, %v6209_v44  ;;  %vm2933_vm3 = vmor %vm2931_vm1, %vm2932_vm2 }
 0x235   : > { %v6349_v50 = vpop.eup %4827  ;;  %4835 = vpow2.f32 %v4573_v25  ;;  %v6353_v31 = vadd.f32 %v6126_v5, %v2422_v54  ;;  %v3044_v26 = vsel %vm6326_vm14, %v3043_v29, %v3039_v16  ;;  %v6359_v24 = vadd.f32 1.0, %v4824_v3  ;;  %v1934_v40 = vpop.f32.mrf.mxu1 }
 0x236   : > { %v2515_v22 = vadd.f32 %v6126_v5, %v2415_v34  ;;  %v6357_v9 = vpop.eup %4829  ;;  %v6364_v35 = vsel %vm2527_vm13, %v3044_v26, %v6252_v7  ;;  %v2930_v1 = vadd.f32 %v6269_v13, %v2929_v42  ;;  %v3047_v49 = vmul.f32 %v6336_v0, %v6278_v46  ;;  %3590 = vrot.lane.b32.xlu1 %v3523_v52, %s4952_s5  ;;  %v1594_v32 = vpop.f32.mrf.mxu0 }
 0x237   : > { %v6369_v25 = vpop.eup %4831  ;;  %4837 = vpow2.f32 %v4566_v20  ;;  %v4574_v6 = vmul.f32 -1.442695, %v6353_v31  ;;  %3474 = vrot.lane.b32.xlu0 %v6364_v35, %s4952_s5  ;;  %v2938_v7 = vor.u32 1.1754944e-38, %v2937_v61  ;;  %vm2936_vm4 = vcmp.eq.f32.partialorder %v2935_v60, 8.507059e+37  ;;  %v3433_v61 = vpop.permute.xlu0 %3432 }
 0x238   : > { %v4567_v4 = vmul.f32 -1.442695, %v2515_v22  ;;  %v6379_v3 = vpop.eup %4833  ;;  %4839 = vrcp.f32 %v6333_v27  ;;  %v2934_v20 = vsel %vm2933_vm3, %v6269_v13, %v2930_v1  ;;  %v3048_v51 = vsub.f32 1.0, %v3047_v49 }
 0x239   : > { %v2012_v38 = vadd.f32 %v1934_v40, %v1594_v32  ;;  %v2939_v29 = vsel %vm2936_vm4, %v2938_v7, %v2934_v20  ;;  %vm3052_vm5 = vweird.f32 %v6336_v0  ;;  %v3055_v60 = vand.u32 2147483647, %v6278_v46 }
 0x23a   : > { %4841 = vpow2.f32 %v4567_v4  ;;  %v6387_v44 = vsel %vm2527_vm13, %v2939_v29, %v6239_v63  ;;  %v2356_v34 = vpop.f32.mrf.mxu3  ;;  %v3049_v54 = vmul.f32 %v6336_v0, %v3048_v51  ;;  %vm3051_vm6 = vweird.f32 %v6278_v46 }
 0x23b   : > { %4843 = vrcp.f32 %v6359_v24  ;;  %v2338_v52 = vpop.f32.mrf.mxu2  ;;  %v4836_v42 = vpop.eup %4835  ;;  %3460 = vrot.lane.b32.xlu2 %v6387_v44, %s4952_s5  ;;  %v2423_v16 = vadd.f32 %v2356_v34, %v6059_v57  ;;  %v3057_v26 = vand.u32 2147483648, %v6278_v46  ;;  %v2942_v40 = vmul.f32 %v6357_v9, %v6276_v53  ;;  %vm3053_vm7 = vmor %vm3051_vm6, %vm3052_vm5 }
 0x23c   : > { %4845 = vpow2.f32 %v4574_v6  ;;  %v2416_v13 = vadd.f32 %v2338_v52, %v2012_v38  ;;  %v3050_v63 = vadd.f32 %v6336_v0, %v3049_v54  ;;  %v6410_v6 = vadd.f32 1.0, %v4836_v42 }
 0x23d   : > { %v4838_v1 = vpop.eup %4837  ;;  %4847 = vtanh.f32 %v2515_v22  ;;  %v6404_v4 = vadd.f32 %v6126_v5, %v2423_v16  ;;  %v3058_v7 = vor.u32 1.1754944e-38, %v3057_v26  ;;  %v2943_v32 = vsub.f32 1.0, %v2942_v40 }
 0x23e   : > { %v6401_v49 = vadd.f32 %v6126_v5, %v2416_v13  ;;  %v6408_v57 = vpop.eup %4839  ;;  %v3054_v46 = vsel %vm3053_vm7, %v6336_v0, %v3050_v63  ;;  %v3524_v22 = vmul.f32 %v3433_v61, %v5884_v10  ;;  %vm3056_vm8 = vcmp.eq.f32.partialorder %v3055_v60, 8.507059e+37 }
 0x23f   : > { %v4575_v38 = vmul.f32 -1.442695, %v6404_v4  ;;  %v3059_v52 = vsel %vm3056_vm8, %v3058_v7, %v3054_v46  ;;  %v2944_v34 = vmul.f32 %v6357_v9, %v2943_v32  ;;  %vm2947_vm9 = vweird.f32 %v6357_v9  ;;  %v3437_v7 = vpop.permute.xlu2 %3436 }
 0x240   : > { %v4842_v20 = vpop.eup %4841  ;;  %v4568_v51 = vmul.f32 -1.442695, %v6401_v49  ;;  %v2950_v54 = vand.u32 2147483647, %v6276_v53  ;;  %v6421_v42 = vadd.f32 1.0, %v4838_v1  ;;  %v6426_v13 = vsel %vm2527_vm13, %v3059_v52, %v6294_v45 }
 0x241   : > { %v6416_v29 = vpop.eup %4843  ;;  %v2952_v16 = vand.u32 2147483648, %v6276_v53  ;;  %v6430_v60 = vadd.f32 1.0, %v4842_v20  ;;  %3476 = vrot.lane.b32.xlu1 %v6426_v13, %s4952_s5  ;;  %v2945_v61 = vadd.f32 %v6357_v9, %v2944_v34  ;;  %vm2946_vm11 = vweird.f32 %v6276_v53 }
 0x242   : > { %v4846_v0 = vpop.eup %4845  ;;  %4849 = vpow2.f32 %v4568_v51  ;;  %v2358_v63 = vpop.f32.mrf.mxu3  ;;  %vm2948_vm12 = vmor %vm2946_vm11, %vm2947_vm9  ;;  %v3062_v1 = vmul.f32 %v6416_v29, %v6359_v24  ;;  %vm2951_vm10 = vcmp.eq.f32.partialorder %v2950_v54, 8.507059e+37  ;;  %vm3067_vm14 = vweird.f32 %v6416_v29 }
 0x243   : > { %4851 = vrcp.f32 %v6410_v6  ;;  %v6436_v26 = vpop.eup %4847  ;;  %3592 = vrot.lane.b32.xlu2 %v3524_v22, %s4952_s5  ;;  %v2953_v45 = vor.u32 1.1754944e-38, %v2952_v16  ;;  %v2424_v40 = vadd.f32 %v2358_v63, %v6090_v33  ;;  %v6444_v46 = vadd.f32 1.0, %v4846_v0  ;;  %v3435_v54 = vpop.permute.xlu1 %3434 }
 0x244   : > { %4853 = vpow2.f32 %v4575_v38  ;;  %v2949_v53 = vsel %vm2948_vm12, %v6357_v9, %v2945_v61  ;;  %v3063_v22 = vsub.f32 1.0, %v3062_v1  ;;  %v2957_v9 = vmul.f32 %v6408_v57, %v6333_v27 }
 0x245   : > { %4855 = vtanh.f32 %v6353_v31  ;;  %v2954_v32 = vsel %vm2951_vm10, %v2953_v45, %v2949_v53  ;;  %v6450_v20 = vadd.f32 %v6126_v5, %v2424_v40  ;;  %v3072_v31 = vand.u32 2147483648, %v6359_v24 }
 0x246   : > { %4857 = vrcp.f32 %v6421_v42  ;;  %v6456_v33 = vsel %vm2527_vm13, %v2954_v32, %v6260_v14  ;;  %v3064_v38 = vmul.f32 %v6416_v29, %v3063_v22  ;;  %v3070_v52 = vand.u32 2147483647, %v6359_v24 }
 0x247   : > { %4859 = vrcp.f32 %v6430_v60  ;;  %3462 = vrot.lane.b32.xlu0 %v6456_v33, %s4952_s5  ;;  %v4576_v5 = vmul.f32 -1.442695, %v6450_v20  ;;  %v6470_v14 = vmul.f32 %v3437_v7, %v5934_v23  ;;  %vm3066_vm15 = vweird.f32 %v6359_v24 }
 0x248   : > { %v4850_v51 = vpop.eup %4849  ;;  %4861 = vrcp.f32 %v6444_v46  ;;  %v2958_v0 = vsub.f32 1.0, %v2957_v9  ;;  %v3065_v63 = vadd.f32 %v6416_v29, %v3064_v38  ;;  %v2967_v45 = vand.u32 2147483648, %v6333_v27  ;;  %vm3068_vm0 = vmor %vm3066_vm15, %vm3067_vm14 }
 0x249   : > { %v6467_v34 = vpop.eup %4851  ;;  %v6474_v61 = vadd.f32 1.0, %v4850_v51  ;;  %4863 = vpow2.f32 %v4576_v5  ;;  %v3073_v1 = vor.u32 1.1754944e-38, %v3072_v31  ;;  %vm2962_vm1 = vweird.f32 %v6408_v57 }
 0x24a   : > { %v4854_v16 = vpop.eup %4853  ;;  %v2959_v53 = vmul.f32 %v6408_v57, %v2958_v0  ;;  %v2965_v7 = vand.u32 2147483647, %v6333_v27  ;;  %v3525_v32 = vmul.f32 %v3435_v54, %v5908_v39  ;;  %v3069_v22 = vsel %vm3068_vm0, %v6416_v29, %v3065_v63 }
 0x24b   : > { %v6478_v40 = vpop.eup %4855  ;;  %vm3071_vm2 = vcmp.eq.f32.partialorder %v3070_v52, 8.507059e+37  ;;  %v3077_v9 = vmul.f32 %v6467_v34, %v6410_v6  ;;  %v6491_v5 = vadd.f32 1.0, %v4854_v16  ;;  %vm2961_vm3 = vweird.f32 %v6333_v27 }
 0x24c   : > { %v6483_v24 = vpop.eup %4857  ;;  %v3074_v31 = vsel %vm3071_vm2, %v3073_v1, %v3069_v22  ;;  %v2960_v38 = vadd.f32 %v6408_v57, %v2959_v53  ;;  %4865 = vrcp.f32 %v6474_v61  ;;  %vm2963_vm4 = vmor %vm2961_vm3, %vm2962_vm1  ;;  %v2968_v29 = vor.u32 1.1754944e-38, %v2967_v45 }
 0x24d   : > { %v6489_v51 = vpop.eup %4859  ;;  %v6499_v54 = vsel %vm2527_vm13, %v3074_v31, %v6349_v50  ;;  %v3078_v52 = vsub.f32 1.0, %v3077_v9  ;;  %vm2966_vm5 = vcmp.eq.f32.partialorder %v2965_v7, 8.507059e+37  ;;  %v3087_v27 = vand.u32 2147483648, %v6410_v6 }
 0x24e   : > { %v6501_v0 = vpop.eup %4861  ;;  %3478 = vrot.lane.b32.xlu2 %v6499_v54, %s4952_s5  ;;  %v2964_v16 = vsel %vm2963_vm4, %v6408_v57, %v2960_v38  ;;  %v2972_v63 = vmul.f32 %v6483_v24, %v6421_v42  ;;  %vm3082_vm6 = vweird.f32 %v6467_v34  ;;  %v3085_v53 = vand.u32 2147483647, %v6410_v6 }
 0x24f   : > { %v4864_v1 = vpop.eup %4863  ;;  %3594 = vrot.lane.b32.xlu0 %v3525_v32, %s4952_s5  ;;  %v2969_v50 = vsel %vm2966_vm5, %v2968_v29, %v2964_v16  ;;  %v3079_v45 = vmul.f32 %v6467_v34, %v3078_v52  ;;  %4867 = vrcp.f32 %v6491_v5  ;;  %vm3081_vm7 = vweird.f32 %v6410_v6 }
 0x250   : > { %v6514_v22 = vadd.f32 1.0, %v4864_v1  ;;  %v6519_v57 = vsel %vm2527_vm13, %v2969_v50, %v6307_v15  ;;  %v2973_v7 = vsub.f32 1.0, %v2972_v63  ;;  %v2980_v9 = vand.u32 2147483647, %v6421_v42  ;;  %vm3083_vm8 = vmor %vm3081_vm7, %vm3082_vm6 }
 0x251   : > { %3464 = vrot.lane.b32.xlu1 %v6519_v57, %s4952_s5  ;;  %v3080_v32 = vadd.f32 %v6467_v34, %v3079_v45  ;;  %v2982_v31 = vand.u32 2147483648, %v6421_v42  ;;  %v3088_v38 = vor.u32 1.1754944e-38, %v3087_v27  ;;  %vm2977_vm9 = vweird.f32 %v6483_v24 }
 0x252   : > { %v2974_v29 = vmul.f32 %v6483_v24, %v2973_v7  ;;  %v3092_v15 = vmul.f32 %v6501_v0, %v6444_v46  ;;  %v6531_v52 = vpop.eup %4865  ;;  %4869 = vrcp.f32 %v6514_v22  ;;  %vm3086_vm11 = vcmp.eq.f32.partialorder %v3085_v53, 8.507059e+37 }
 0x253   : > { %v3084_v16 = vsel %vm3083_vm8, %v6467_v34, %v3080_v32  ;;  %vm2976_vm12 = vweird.f32 %v6421_v42  ;;  %vm2981_vm10 = vcmp.eq.f32.partialorder %v2980_v9, 8.507059e+37  ;;  %v2983_v50 = vor.u32 1.1754944e-38, %v2982_v31  ;;  %v3439_v9 = vpop.permute.xlu0 %3438 }
 0x254   : > { %v3089_v6 = vsel %vm3086_vm11, %v3088_v38, %v3084_v16  ;;  %v2975_v63 = vadd.f32 %v6483_v24, %v2974_v29  ;;  %v3093_v27 = vsub.f32 1.0, %v3092_v15  ;;  %vm2978_vm14 = vmor %vm2976_vm12, %vm2977_vm9  ;;  %v3102_v45 = vand.u32 2147483648, %v6444_v46 }
 0x255   : > { %v6540_v1 = vsel %vm2527_vm13, %v3089_v6, %v6379_v3  ;;  %v2987_v34 = vmul.f32 %v6489_v51, %v6430_v60  ;;  %v6545_v53 = vpop.eup %4867  ;;  %vm3097_vm15 = vweird.f32 %v6501_v0  ;;  %v3100_v32 = vand.u32 2147483647, %v6444_v46 }
 0x256   : > { %v2979_v42 = vsel %vm2978_vm14, %v6483_v24, %v2975_v63  ;;  %v3094_v7 = vmul.f32 %v6501_v0, %v3093_v27  ;;  %4871 = vtanh.f32 %v6401_v49  ;;  %vm3096_vm0 = vweird.f32 %v6444_v46 }
 0x257   : > { %3480 = vrot.lane.b32.xlu0 %v6540_v1, %s4952_s5  ;;  %v2984_v3 = vsel %vm2981_vm10, %v2983_v50, %v2979_v42  ;;  %v2988_v31 = vsub.f32 1.0, %v2987_v34  ;;  %v2995_v29 = vand.u32 2147483647, %v6430_v60  ;;  %v2997_v15 = vand.u32 2147483648, %v6430_v60  ;;  %vm3098_vm1 = vmor %vm3096_vm0, %vm3097_vm15 }
 0x258   : > { %v6558_v24 = vsel %vm2527_vm13, %v2984_v3, %v6369_v25  ;;  %v3095_v38 = vadd.f32 %v6501_v0, %v3094_v7  ;;  %v6563_v49 = vpop.eup %4869  ;;  %v3103_v46 = vor.u32 1.1754944e-38, %v3102_v45  ;;  %vm2992_vm2 = vweird.f32 %v6489_v51 }
 0x259   : > { %3596 = vrot.lane.b32.xlu1 %v6470_v14, %s4952_s5  ;;  %3466 = vrot.lane.b32.xlu2 %v6558_v24, %s4952_s5  ;;  %v2989_v25 = vmul.f32 %v6489_v51, %v2988_v31  ;;  %v3107_v16 = vmul.f32 %v6545_v53, %v6491_v5  ;;  %4873 = vtanh.f32 %v6404_v4  ;;  %v3527_v6 = vmul.f32 %v3439_v9, %v5961_v8 }
 0x25a   : > { %v3099_v14 = vsel %vm3098_vm1, %v6501_v0, %v3095_v38  ;;  %vm3101_vm3 = vcmp.eq.f32.partialorder %v3100_v32, 8.507059e+37  ;;  %vm2991_vm4 = vweird.f32 %v6430_v60  ;;  %vm2996_vm6 = vcmp.eq.f32.partialorder %v2995_v29, 8.507059e+37 }
 0x25b   : > { %v3104_v63 = vsel %vm3101_vm3, %v3103_v46, %v3099_v14  ;;  %v2990_v27 = vadd.f32 %v6489_v51, %v2989_v25  ;;  %v3108_v50 = vsub.f32 1.0, %v3107_v16  ;;  %vm2993_vm5 = vmor %vm2991_vm4, %vm2992_vm2  ;;  %v2998_v45 = vor.u32 1.1754944e-38, %v2997_v15 }
 0x25c   : > { %vm3111_vm7 = vweird.f32 %v6491_v5  ;;  %v3002_v34 = vmul.f32 %v6531_v52, %v6474_v61  ;;  %v4872_v4 = vpop.eup %4871  ;;  %vm3112_vm8 = vweird.f32 %v6545_v53  ;;  %v3117_v7 = vand.u32 2147483648, %v6491_v5 }
 0x25d   : > { %v2994_v42 = vsel %vm2993_vm5, %v6489_v51, %v2990_v27  ;;  %v3109_v0 = vmul.f32 %v6545_v53, %v3108_v50  ;;  %v6590_v60 = vsel %vm2527_vm13, %v3104_v63, %v6478_v40  ;;  %v3115_v3 = vand.u32 2147483647, %v6491_v5  ;;  %vm3113_vm9 = vmor %vm3111_vm7, %vm3112_vm8  ;;  %v3441_v5 = vpop.permute.xlu1 %3440 }
 0x25e   : > { %v2999_v32 = vsel %vm2996_vm6, %v2998_v45, %v2994_v42  ;;  %v3003_v9 = vsub.f32 1.0, %v3002_v34  ;;  %v3012_v38 = vand.u32 2147483648, %v6474_v61  ;;  %v3122_v29 = vmul.f32 %v6563_v49, %v6514_v22 }
 0x25f   : > { %v6596_v31 = vsel %vm2527_vm13, %v2999_v32, %v6436_v26  ;;  %v3110_v51 = vadd.f32 %v6545_v53, %v3109_v0  ;;  %v4874_v15 = vpop.eup %4873  ;;  %vm3007_vm11 = vweird.f32 %v6531_v52  ;;  %v3010_v26 = vand.u32 2147483647, %v6474_v61 }
 0x260   : > { %3468 = vrot.lane.b32.xlu0 %v6596_v31, %s4952_s5  ;;  %v3004_v40 = vmul.f32 %v6531_v52, %v3003_v9  ;;  %v3118_v25 = vor.u32 1.1754944e-38, %v3117_v7  ;;  %v3123_v16 = vsub.f32 1.0, %v3122_v29  ;;  %vm3116_vm12 = vcmp.eq.f32.partialorder %v3115_v3, 8.507059e+37  ;;  %v3443_v7 = vpop.permute.xlu2 %3442 }
 0x261   : > { %3482 = vrot.lane.b32.xlu1 %v6590_v60, %s4952_s5  ;;  %3598 = vrot.lane.b32.xlu2 %v3527_v6, %s4952_s5  ;;  %v3114_v46 = vsel %vm3113_vm9, %v6545_v53, %v3110_v51  ;;  %vm3006_vm10 = vweird.f32 %v6474_v61  ;;  %v3013_v27 = vor.u32 1.1754944e-38, %v3012_v38  ;;  %vm3127_vm15 = vweird.f32 %v6563_v49 }
 0x262   : > { %v3005_v14 = vadd.f32 %v6531_v52, %v3004_v40  ;;  %v3119_v63 = vsel %vm3116_vm12, %v3118_v25, %v3114_v46  ;;  %vm3008_vm14 = vmor %vm3006_vm10, %vm3007_vm11  ;;  %v3124_v50 = vmul.f32 %v6563_v49, %v3123_v16  ;;  %vm3011_vm0 = vcmp.eq.f32.partialorder %v3010_v26, 8.507059e+37 }
 0x263   : > { %v3132_v53 = vand.u32 2147483648, %v6514_v22  ;;  %vm3126_vm1 = vweird.f32 %v6514_v22  ;;  %v3130_v61 = vand.u32 2147483647, %v6514_v22  ;;  %4875 = vtanh.f32 %v6450_v20 }
 0x264   : > { %v3009_v45 = vsel %vm3008_vm14, %v6531_v52, %v3005_v14  ;;  %v3125_v34 = vadd.f32 %v6563_v49, %v3124_v50  ;;  %v3528_v42 = vmul.f32 %v3441_v5, %v5991_v59  ;;  %v6626_v0 = vsel %vm2527_vm13, %v3119_v63, %v4874_v15  ;;  %vm3128_vm2 = vmor %vm3126_vm1, %vm3127_vm15 }
 0x265   : > { %v3014_v6 = vsel %vm3011_vm0, %v3013_v27, %v3009_v45  ;;  %v3133_v3 = vor.u32 1.1754944e-38, %v3132_v53  ;;  %vm3131_vm3 = vcmp.eq.f32.partialorder %v3130_v61, 8.507059e+37  ;;  %v3361_v5 = vmul.f32 %v5870_v58, %v5808_v47 }
 0x266   : > { %v6630_v52 = vsel %vm2527_vm13, %v3014_v6, %v4872_v4  ;;  %v3129_v32 = vsel %vm3128_vm2, %v6563_v49, %v3125_v34  ;;  %v3445_v22 = vpop.permute.xlu0 %3444  ;;  %v3529_v49 = vmul.f32 %v3443_v7, %v6008_v11  ;;  %v3360_v53 = vmul.f32 %v5837_v18, %v5787_v19 }
 0x267   : > { %v3134_v20 = vsel %vm3131_vm3, %v3133_v3, %v3129_v32  ;;  %v3530_v51 = vmul.f32 %v3445_v22, %v6035_v2  ;;  %vm4065_vm4 = vcmask 523520  }
 0x268   : > { %3600 = vrot.lane.b32.xlu0 %v3528_v42, %s4952_s5  ;;  %v3449_v38 = vpop.permute.xlu2 %3448 }
 0x269   : > { %3484 = vrot.lane.b32.xlu2 %v6626_v0, %s4952_s5  ;;  %3470 = vrot.lane.b32.xlu1 %v6630_v52, %s4952_s5  ;;  %v4876_v9 = vpop.eup %4875  ;;  %v3532_v40 = vmul.f32 %v3449_v38, %v6087_v41 }
 0x26a   : > { %v6640_v4 = vsel %vm2527_vm13, %v3134_v20, %v4876_v9  ;;  %vm4032_vm13 = vcmask 261120  }
 0x26e   : > { %v3447_v29 = vpop.permute.xlu1 %3446 }
 0x26f   : > { %v3531_v15 = vmul.f32 %v3447_v29, %v6071_v36 }
 0x270   : > { %3486 = vrot.lane.b32.xlu0 %v6640_v4, %s4952_s5 }
 0x271   : > { %3602 = vrot.lane.b32.xlu1 %v3529_v49, %s4952_s5  ;;  %3604 = vrot.lane.b32.xlu2 %v3530_v51, %s4952_s5  ;;  %v3364_v51 = vmul.f32 %v5898_v48, %v5884_v10  ;;  %v3362_v49 = vmul.f32 %v5817_v56, %v5833_v12  ;;  %v7168_v48 = vld [vmem:[#allocation5_spill] sm:$0xff] }
 0x277   : > { %v3455_v62 = vpop.permute.xlu2 %3454 }
 0x278   : > { %3606 = vrot.lane.b32.xlu0 %v3531_v15, %s4952_s5  ;;  %v3535_v26 = vmul.f32 %v3455_v62, %v6188_v28 }
 0x279   : > { %3608 = vrot.lane.b32.xlu1 %v3532_v40, %s4952_s5 }
 0x27f   : > { %v3451_v46 = vpop.permute.xlu0 %3450  ;;  %v3587_v16 = vpop.permute.xlu2 %3586 }
 0x280   : > { %v3533_v25 = vmul.f32 %v3451_v46, %v6116_v30  ;;  %v6659_v27 = vadd.f32 %v3587_v16, %v3361_v5 }
 0x281   : > { %3614 = vrot.lane.b32.xlu1 %v3535_v26, %s4952_s5 }
 0x282   : > { %3610 = vrot.lane.b32.xlu2 %v3533_v25, %s4952_s5  ;;  %4877 = vtanh.f32 %v6659_v27  ;;  %v3363_v25 = vmul.f32 %v7168_v48, %v5859_v43 }
 0x287   : > { %v3453_v14 = vpop.permute.xlu1 %3452 }
 0x288   : > { %v3534_v63 = vmul.f32 %v3453_v14, %v6143_v17  ;;  %v4878_v58 = vpop.eup %4877 }
 0x289   : > { %v3473_v50 = vpop.permute.xlu2 %3472 }
 0x28a   : > { %3612 = vrot.lane.b32.xlu0 %v3534_v63, %s4952_s5  ;;  %v3544_v45 = vmul.f32 %v3473_v50, %v6312_v21 }
 0x28c   : > { %3632 = vrot.lane.b32.xlu1 %v3544_v45, %s4952_s5 }
 0x28f   : > { %v3585_v6 = vpop.permute.xlu1 %3584 }
 0x290   : > { %v6667_v34 = vadd.f32 %v3585_v6, %v3360_v53 }
 0x292   : > { %4879 = vtanh.f32 %v6667_v34 }
 0x294   : > { %3778 = vrot.lane.b32.xlu1 %v4878_v58, %s4952_s5 }
 0x295   : > { %v3461_v61 = vpop.permute.xlu2 %3460 }
 0x296   : > { %v3538_v3 = vmul.f32 %v3461_v61, %v6387_v44 }
 0x297   : > { %v3457_v7 = vpop.permute.xlu0 %3456 }
 0x298   : > { %v4880_v42 = vpop.eup %4879  ;;  %v3536_v32 = vmul.f32 %v3457_v7, %v6244_v55 }
 0x299   : > { %3776 = vrot.lane.b32.xlu0 %v4880_v42, %s4952_s5  ;;  %v7169_v42 = vld [vmem:[#allocation10_spill] sm:$0xff] }
 0x29a   : > { %3616 = vrot.lane.b32.xlu2 %v3536_v32, %s4952_s5  ;;  %v3367_v7 = vmul.f32 %v7169_v42, %v5961_v8  ;;  %v7173_v42 = vld [vmem:[#allocation15_spill] sm:$0xff] }
 0x29c   : > { %3620 = vrot.lane.b32.xlu1 %v3538_v3, %s4952_s5 }
 0x29d   : > { %v3593_v18 = vpop.permute.xlu2 %3592 }
 0x29e   : > { %v6682_v38 = vadd.f32 %v3593_v18, %v3364_v51  ;;  %v7170_v51 = vld [vmem:[#allocation4_spill] sm:$0xff] }
 0x29f   : > { %v3589_v20 = vpop.permute.xlu0 %3588 }
 0x2a0   : > { %v3459_v22 = vpop.permute.xlu1 %3458  ;;  %v6684_v15 = vadd.f32 %v3589_v20, %v3362_v49  ;;  %4881 = vtanh.f32 %v6682_v38  ;;  %v3365_v49 = vmul.f32 %v7170_v51, %v5908_v39 }
 0x2a1   : > { %v3537_v9 = vmul.f32 %v3459_v22, %v6317_v37 }
 0x2a2   : > { %4883 = vtanh.f32 %v6684_v15 }
 0x2a3   : > { %3618 = vrot.lane.b32.xlu0 %v3537_v9, %s4952_s5 }
 0x2a6   : > { %v4882_v56 = vpop.eup %4881 }
 0x2a8   : > { %v3479_v29 = vpop.permute.xlu2 %3478  ;;  %v3591_v46 = vpop.permute.xlu1 %3590 }
 0x2a9   : > { %v3547_v40 = vmul.f32 %v3479_v29, %v6499_v54  ;;  %v3475_v62 = vpop.permute.xlu0 %3474  ;;  %v4884_v16 = vpop.eup %4883  ;;  %v6695_v5 = vadd.f32 %v3591_v46, %v3363_v25 }
 0x2aa   : > { %v3545_v26 = vmul.f32 %v3475_v62, %v6364_v35  ;;  %v7171_v62 = vld [vmem:[#allocation12_spill] sm:$0xff] }
 0x2ab   : > { %3638 = vrot.lane.b32.xlu1 %v3547_v40, %s4952_s5  ;;  %4885 = vtanh.f32 %v6695_v5 }
 0x2ac   : > { %3634 = vrot.lane.b32.xlu2 %v3545_v26, %s4952_s5  ;;  %v3370_v26 = vmul.f32 %v7171_v62, %v6035_v2 }
 0x2b1   : > { %v4886_v61 = vpop.eup %4885 }
 0x2b3   : > { %v3467_v14 = vpop.permute.xlu2 %3466  ;;  %3784 = vrot.lane.b32.xlu1 %v4882_v56, %s4952_s5  ;;  %v3477_v63 = vpop.permute.xlu1 %3476 }
 0x2b4   : > { %3780 = vrot.lane.b32.xlu2 %v4884_v16, %s4952_s5  ;;  %v3546_v50 = vmul.f32 %v3477_v63, %v6426_v13  ;;  %v3541_v45 = vmul.f32 %v3467_v14, %v6558_v24  ;;  %v7172_v14 = vld [vmem:[#allocation7_spill] sm:$0xff] }
 0x2b5   : > { %v3366_v63 = vmul.f32 %v7172_v14, %v5934_v23 }
 0x2b6   : > { %3636 = vrot.lane.b32.xlu0 %v3546_v50, %s4952_s5 }
 0x2b9   : > { %v3463_v53 = vpop.permute.xlu0 %3462 }
 0x2ba   : > { %v3539_v6 = vmul.f32 %v3463_v53, %v6456_v33 }
 0x2bb   : > { %v3599_v58 = vpop.permute.xlu2 %3598  ;;  %3626 = vrot.lane.b32.xlu1 %v3541_v45, %s4952_s5 }
 0x2bc   : > { %3622 = vrot.lane.b32.xlu2 %v3539_v6, %s4952_s5  ;;  %v6708_v3 = vadd.f32 %v3599_v58, %v3367_v7  ;;  %v3373_v7 = vmul.f32 %v7173_v42, %v6116_v30 }
 0x2be   : > { %3782 = vrot.lane.b32.xlu0 %v4886_v61, %s4952_s5  ;;  %4887 = vtanh.f32 %v6708_v3 }
 0x2c1   : > { %v3595_v32 = vpop.permute.xlu0 %3594 }
 0x2c2   : > { %v6717_v29 = vadd.f32 %v3595_v32, %v3365_v49  ;;  %v7174_v49 = vld [vmem:[#allocation6_spill] sm:$0xff] }
 0x2c3   : > { %v3465_v18 = vpop.permute.xlu1 %3464  ;;  %v3485_v20 = vpop.permute.xlu2 %3484 }
 0x2c4   : > { %v3550_v22 = vmul.f32 %v3485_v20, %v6626_v0  ;;  %v3540_v9 = vmul.f32 %v3465_v18, %v6519_v57  ;;  %v4888_v16 = vpop.eup %4887  ;;  %4889 = vtanh.f32 %v6717_v29 }
 0x2c6   : > { %3644 = vrot.lane.b32.xlu1 %v3550_v22, %s4952_s5  ;;  %3624 = vrot.lane.b32.xlu0 %v3540_v9, %s4952_s5 }
 0x2c9   : > { %v3481_v40 = vpop.permute.xlu0 %3480 }
 0x2ca   : > { %v3548_v46 = vmul.f32 %v3481_v40, %v6540_v1  ;;  %v4890_v45 = vpop.eup %4889  ;;  %v3368_v40 = vmul.f32 %v7174_v49, %v5991_v59 }
 0x2cb   : > { %v3597_v56 = vpop.permute.xlu1 %3596  ;;  %v3605_v48 = vpop.permute.xlu2 %3604 }
 0x2cc   : > { %3640 = vrot.lane.b32.xlu2 %v3548_v46, %s4952_s5  ;;  %v6723_v25 = vadd.f32 %v3605_v48, %v3370_v26  ;;  %v6730_v53 = vadd.f32 %v3597_v56, %v3366_v63  ;;  %v7175_v26 = vld [vmem:[#allocation9_spill] sm:$0xff] }
 0x2cd   : > { %v3369_v46 = vmul.f32 %v7175_v26, %v6008_v11 }
 0x2ce   : > { %3790 = vrot.lane.b32.xlu1 %v4888_v16, %s4952_s5  ;;  %4891 = vtanh.f32 %v6723_v25 }
 0x2cf   : > { %4893 = vtanh.f32 %v6730_v53 }
 0x2d2   : > { %v3469_v50 = vpop.permute.xlu0 %3468 }
 0x2d3   : > { %v3483_v6 = vpop.permute.xlu1 %3482  ;;  %v3542_v32 = vmul.f32 %v3469_v50, %v6596_v31 }
 0x2d4   : > { %v3549_v58 = vmul.f32 %v3483_v6, %v6590_v60  ;;  %3786 = vrot.lane.b32.xlu2 %v4890_v45, %s4952_s5  ;;  %v4892_v61 = vpop.eup %4891  ;;  %v7176_v45 = vld [vmem:[#allocation8_spill] sm:$0xff] }
 0x2d5   : > { %v4894_v51 = vpop.eup %4893  ;;  %v3371_v6 = vmul.f32 %v7176_v45, %v6071_v36  ;;  %v7180_v45 = vld [vmem:[#allocation11_spill] sm:$0xff] }
 0x2d6   : > { %3642 = vrot.lane.b32.xlu0 %v3549_v58, %s4952_s5  ;;  %3796 = vrot.lane.b32.xlu1 %v4892_v61, %s4952_s5  ;;  %v7177_v58 = vld [vmem:[#allocation13_spill] sm:$0xff] }
 0x2d7   : > { %v3372_v61 = vmul.f32 %v7177_v58, %v6087_v41 }
 0x2da   : > { %v3601_v18 = vpop.permute.xlu0 %3600 }
 0x2db   : > { %v3471_v20 = vpop.permute.xlu1 %3470  ;;  %v6747_v62 = vadd.f32 %v3601_v18, %v3368_v40 }
 0x2dc   : > { %v3611_v22 = vpop.permute.xlu2 %3610  ;;  %3628 = vrot.lane.b32.xlu2 %v3542_v32, %s4952_s5  ;;  %v3543_v63 = vmul.f32 %v3471_v20, %v6630_v52 }
 0x2dd   : > { %v6741_v9 = vadd.f32 %v3611_v22, %v3373_v7 }
 0x2de   : > { %3788 = vrot.lane.b32.xlu0 %v4894_v51, %s4952_s5  ;;  %v7178_v51 = vld [vmem:[#allocation16_spill] sm:$0xff] }
 0x2df   : > { %4895 = vtanh.f32 %v6741_v9  ;;  %v3375_v49 = vmul.f32 %v7178_v51, %v6188_v28  ;;  %v7181_v51 = vld [vmem:[#allocation25_spill] sm:$0xff] }
 0x2e0   : > { %4897 = vtanh.f32 %v6747_v62 }
 0x2e2   : > { %v3487_v56 = vpop.permute.xlu0 %3486 }
 0x2e3   : > { %v3551_v48 = vmul.f32 %v3487_v56, %v6640_v4  ;;  %v3603_v16 = vpop.permute.xlu1 %3602 }
 0x2e4   : > { %v6753_v50 = vadd.f32 %v3603_v16, %v3369_v46  ;;  %v7179_v46 = vld [vmem:[#allocation18_spill] sm:$0xff] }
 0x2e5   : > { %v4896_v14 = vpop.eup %4895  ;;  %3646 = vrot.lane.b32.xlu2 %v3551_v48, %s4952_s5  ;;  %v3376_v56 = vmul.f32 %v7179_v46, %v6244_v55 }
 0x2e6   : > { %3802 = vrot.lane.b32.xlu1 %v4896_v14, %s4952_s5  ;;  %4899 = vtanh.f32 %v6753_v50  ;;  %3630 = vrot.lane.b32.xlu0 %v3543_v63, %s4952_s5  ;;  %v4898_v7 = vpop.eup %4897 }
 0x2ea   : > { %v3607_v42 = vpop.permute.xlu0 %3606 }
 0x2eb   : > { %v3609_v32 = vpop.permute.xlu1 %3608  ;;  %v6764_v18 = vadd.f32 %v3607_v42, %v3371_v6  ;;  %v3374_v6 = vmul.f32 %v7180_v45, %v6143_v17  ;;  %v7182_v45 = vld [vmem:[#allocation27_spill] sm:$0xff] }
 0x2ec   : > { %v4900_v20 = vpop.eup %4899  ;;  %v6766_v22 = vadd.f32 %v3609_v32, %v3372_v61 }
 0x2ed   : > { %3792 = vrot.lane.b32.xlu2 %v4898_v7, %s4952_s5  ;;  %4901 = vtanh.f32 %v6764_v18 }
 0x2ee   : > { %4903 = vtanh.f32 %v6766_v22  ;;  %3794 = vrot.lane.b32.xlu0 %v4900_v20, %s4952_s5 }
 0x2f3   : > { %v4902_v40 = vpop.eup %4901  ;;  %v3615_v26 = vpop.permute.xlu1 %3614 }
 0x2f4   : > { %v4904_v48 = vpop.eup %4903  ;;  %v6776_v16 = vadd.f32 %v3615_v26, %v3375_v49  ;;  %v3617_v14 = vpop.permute.xlu2 %3616  ;;  %v3384_v49 = vmul.f32 %v7181_v51, %v6312_v21 }
 0x2f5   : > { %3798 = vrot.lane.b32.xlu2 %v4902_v40, %s4952_s5  ;;  %v6779_v63 = vadd.f32 %v3617_v14, %v3376_v56 }
 0x2f6   : > { %3800 = vrot.lane.b32.xlu0 %v4904_v48, %s4952_s5  ;;  %4905 = vtanh.f32 %v6776_v16 }
 0x2f7   : > { %4907 = vtanh.f32 %v6779_v63 }
 0x2fc   : > { %v3613_v58 = vpop.permute.xlu0 %3612  ;;  %v4906_v61 = vpop.eup %4905 }
 0x2fd   : > { %v6786_v42 = vadd.f32 %v3613_v58, %v3374_v6  ;;  %v4908_v7 = vpop.eup %4907  ;;  %v3385_v6 = vmul.f32 %v7182_v45, %v6364_v35  ;;  %v7183_v58 = vld [vmem:[#allocation19_spill] sm:$0xff] }
 0x2fe   : > { %3806 = vrot.lane.b32.xlu0 %v4906_v61, %s4952_s5  ;;  %v3633_v32 = vpop.permute.xlu1 %3632  ;;  %3808 = vrot.lane.b32.xlu1 %v4908_v7, %s4952_s5  ;;  %v3378_v61 = vmul.f32 %v7183_v58, %v6387_v44 }
 0x2ff   : > { %4909 = vtanh.f32 %v6786_v42  ;;  %v6794_v40 = vadd.f32 %v3633_v32, %v3384_v49 }
 0x301   : > { %4911 = vtanh.f32 %v6794_v40 }
 0x305   : > { %v4910_v20 = vpop.eup %4909 }
 0x306   : > { %3804 = vrot.lane.b32.xlu2 %v4910_v20, %s4952_s5  ;;  %v3635_v26 = vpop.permute.xlu2 %3634  ;;  %v3779_v46 = vpop.permute.xlu1 %3778 }
 0x307   : > { %v3873_v56 = vmul.f32 %v3779_v46, %v5808_v47  ;;  %v6805_v7 = vadd.f32 %v3635_v26, %v3385_v6  ;;  %v4912_v49 = vpop.eup %4911  ;;  %v7185_v26 = vld [vmem:[#allocation14_spill] sm:$0xff] }
 0x309   : > { %3938 = vrot.lane.b32.xlu0 %v3873_v56, %s4953_s8  ;;  %v3377_v56 = vmul.f32 %v7185_v26, %v6317_v37 }
 0x30b   : > { %v3777_v48 = vpop.permute.xlu0 %3776 }
 0x30c   : > { %v3872_v14 = vmul.f32 %v3777_v48, %v5787_v19  ;;  %v7184_v19 = vld [vmem:[#allocation21_spill] sm:$0xff] }
 0x30d   : > { %v3379_v46 = vmul.f32 %v7184_v19, %v6456_v33 }
 0x30e   : > { %3936 = vrot.lane.b32.xlu2 %v3872_v14, %s4953_s8  ;;  %v3781_v32 = vpop.permute.xlu2 %3780  ;;  %v3621_v47 = vpop.permute.xlu1 %3620 }
 0x30f   : > { %v3874_v20 = vmul.f32 %v3781_v32, %v5833_v12  ;;  %v6808_v51 = vadd.f32 %v3621_v47, %v3378_v61 }
 0x311   : > { %4913 = vtanh.f32 %v6808_v51  ;;  %3940 = vrot.lane.b32.xlu1 %v3874_v20, %s4953_s8  ;;  %3824 = vrot.lane.b32.xlu0 %v4912_v49, %s4952_s5  ;;  %v7187_v20 = vld [vmem:[#allocation28_spill] sm:$0xff] }
 0x312   : > { %4915 = vtanh.f32 %v6805_v7  ;;  %v3387_v49 = vmul.f32 %v7187_v20, %v6499_v54 }
 0x315   : > { %v3619_v14 = vpop.permute.xlu0 %3618 }
 0x316   : > { %v3623_v48 = vpop.permute.xlu2 %3622  ;;  %v6820_v6 = vadd.f32 %v3619_v14, %v3377_v56  ;;  %v7188_v14 = vld [vmem:[#allocation29_spill] sm:$0xff] }
 0x317   : > { %v4914_v12 = vpop.eup %4913  ;;  %v6818_v45 = vadd.f32 %v3623_v48, %v3379_v46 }
 0x318   : > { %v4916_v58 = vpop.eup %4915 }
 0x319   : > { %7186 = vst [vmem:[#allocation5_spill] sm:$0xff] %v6818_v45  ;;  %4917 = vtanh.f32 %v6818_v45  ;;  %3826 = vrot.lane.b32.xlu1 %v4916_v58, %s4952_s5  ;;  %3812 = vrot.lane.b32.xlu0 %v4914_v12, %s4952_s5  ;;  %v3388_v12 = vmul.f32 %v7188_v14, %v6540_v1  ;;  %v7189_v58 = vld [vmem:[#allocation22_spill] sm:$0xff] }
 0x31a   : > { %4919 = vtanh.f32 %v6820_v6 }
 0x31d   : > { %v3639_v61 = vpop.permute.xlu1 %3638 }
 0x31e   : > { %v6830_v19 = vadd.f32 %v3639_v61, %v3387_v49 }
 0x31f   : > { %v4918_v32 = vpop.eup %4917 }
 0x320   : > { %v4920_v47 = vpop.eup %4919  ;;  %4921 = vtanh.f32 %v6830_v19 }
 0x321   : > { %3810 = vrot.lane.b32.xlu2 %v4920_v47, %s4952_s5  ;;  %3814 = vrot.lane.b32.xlu1 %v4918_v32, %s4952_s5  ;;  %v3381_v32 = vmul.f32 %v7189_v58, %v6558_v24 }
 0x325   : > { %v3785_v46 = vpop.permute.xlu1 %3784 }
 0x326   : > { %v3641_v26 = vpop.permute.xlu2 %3640  ;;  %v3876_v56 = vmul.f32 %v3785_v46, %v5884_v10  ;;  %v4922_v49 = vpop.eup %4921  ;;  %v7191_v46 = vld [vmem:[#allocation23_spill] sm:$0xff] }
 0x327   : > { %v6839_v45 = vadd.f32 %v3641_v26, %v3388_v12 }
 0x328   : > { %3944 = vrot.lane.b32.xlu0 %v3876_v56, %s4953_s8  ;;  %v3637_v48 = vpop.permute.xlu0 %3636  ;;  %v3386_v56 = vmul.f32 %v7191_v46, %v6426_v13 }
 0x329   : > { %7190 = vst [vmem:[#allocation10_spill] sm:$0xff] %v6839_v45 }
 0x32a   : > { %v6848_v14 = vadd.f32 %v3637_v48, %v3386_v56 }
 0x32d   : > { %v3627_v47 = vpop.permute.xlu1 %3626 }
 0x32e   : > { %v3787_v61 = vpop.permute.xlu2 %3786  ;;  %v6841_v20 = vadd.f32 %v3627_v47, %v3381_v32 }
 0x32f   : > { %v3877_v10 = vmul.f32 %v3787_v61, %v5908_v39  ;;  %v7192_v39 = vld [vmem:[#allocation24_spill] sm:$0xff] }
 0x330   : > { %4923 = vtanh.f32 %v6841_v20  ;;  %3830 = vrot.lane.b32.xlu0 %v4922_v49, %s4952_s5  ;;  %v3783_v58 = vpop.permute.xlu0 %3782  ;;  %v3382_v12 = vmul.f32 %v7192_v39, %v6596_v31 }
 0x331   : > { %3946 = vrot.lane.b32.xlu1 %v3877_v10, %s4953_s8  ;;  %4925 = vtanh.f32 %v6839_v45  ;;  %v3875_v26 = vmul.f32 %v3783_v58, %v5859_v43  ;;  %v7194_v10 = vld [vmem:[#allocation17_spill] sm:$0xff] }
 0x332   : > { %4927 = vtanh.f32 %v6848_v14  ;;  %v3380_v46 = vmul.f32 %v7194_v10, %v6519_v57 }
 0x333   : > { %3942 = vrot.lane.b32.xlu2 %v3875_v26, %s4953_s8  ;;  %v7195_v26 = vld [vmem:[#allocation30_spill] sm:$0xff] }
 0x334   : > { %v3390_v39 = vmul.f32 %v7195_v26, %v6626_v0 }
 0x336   : > { %v4924_v32 = vpop.eup %4923  ;;  %v3629_v47 = vpop.permute.xlu2 %3628 }
 0x337   : > { %v6857_v61 = vadd.f32 %v3629_v47, %v3382_v12  ;;  %v4926_v48 = vpop.eup %4925 }
 0x338   : > { %v3645_v49 = vpop.permute.xlu1 %3644  ;;  %3818 = vrot.lane.b32.xlu0 %v4924_v32, %s4952_s5  ;;  %v3625_v43 = vpop.permute.xlu0 %3624 }
 0x339   : > { %7193 = vst [vmem:[#allocation4_spill] sm:$0xff] %v6857_v61  ;;  %4929 = vtanh.f32 %v6857_v61  ;;  %3832 = vrot.lane.b32.xlu1 %v4926_v48, %s4952_s5  ;;  %v6864_v56 = vadd.f32 %v3625_v43, %v3380_v46  ;;  %v4928_v58 = vpop.eup %4927  ;;  %v6870_v47 = vadd.f32 %v3645_v49, %v3390_v39  ;;  %v7196_v46 = vld [vmem:[#allocation31_spill] sm:$0xff] }
 0x33a   : > { %v3391_v43 = vmul.f32 %v7196_v46, %v6640_v4 }
 0x33b   : > { %4931 = vtanh.f32 %v6864_v56  ;;  %3828 = vrot.lane.b32.xlu2 %v4928_v58, %s4952_s5 }
 0x33c   : > { %4933 = vtanh.f32 %v6870_v47 }
 0x33f   : > { %v4930_v12 = vpop.eup %4929  ;;  %v3647_v32 = vpop.permute.xlu2 %3646 }
 0x340   : > { %v3791_v10 = vpop.permute.xlu1 %3790  ;;  %v6879_v58 = vadd.f32 %v3647_v32, %v3391_v43  ;;  %v7198_v43 = vld [vmem:[#allocation20_spill] sm:$0xff] }
 0x341   : > { %v3879_v61 = vmul.f32 %v3791_v10, %v5961_v8  ;;  %3820 = vrot.lane.b32.xlu1 %v4930_v12, %s4952_s5  ;;  %v4932_v48 = vpop.eup %4931  ;;  %v7197_v8 = vld [vmem:[#allocation26_spill] sm:$0xff] }
 0x342   : > { %v4934_v45 = vpop.eup %4933  ;;  %4935 = vtanh.f32 %v6879_v58 }
 0x343   : > { %3950 = vrot.lane.b32.xlu0 %v3879_v61, %s4953_s8  ;;  %3816 = vrot.lane.b32.xlu2 %v4932_v48, %s4952_s5  ;;  %v3389_v61 = vmul.f32 %v7197_v8, %v6590_v60 }
 0x347   : > { %v3793_v26 = vpop.permute.xlu2 %3792 }
 0x348   : > { %v3880_v49 = vmul.f32 %v3793_v26, %v5991_v59  ;;  %v3643_v39 = vpop.permute.xlu0 %3642  ;;  %v3797_v12 = vpop.permute.xlu1 %3796  ;;  %v3383_v26 = vmul.f32 %v7198_v43, %v6630_v52 }
 0x349   : > { %v6887_v10 = vadd.f32 %v3643_v39, %v3389_v61  ;;  %v4936_v32 = vpop.eup %4935  ;;  %v3882_v46 = vmul.f32 %v3797_v12, %v6035_v2 }
 0x34a   : > { %3952 = vrot.lane.b32.xlu1 %v3880_v49, %s4953_s8 }
 0x34b   : > { %3836 = vrot.lane.b32.xlu0 %v4934_v45, %s4952_s5  ;;  %4937 = vtanh.f32 %v6887_v10 }
 0x34f   : > { %v3799_v45 = vpop.permute.xlu2 %3798 }
 0x350   : > { %v3789_v48 = vpop.permute.xlu0 %3788  ;;  %v3883_v39 = vmul.f32 %v3799_v45, %v6071_v36 }
 0x351   : > { %v3878_v59 = vmul.f32 %v3789_v48, %v5934_v23  ;;  %v4938_v61 = vpop.eup %4937 }
 0x352   : > { %3838 = vrot.lane.b32.xlu1 %v4936_v32, %s4952_s5 }
 0x353   : > { %3948 = vrot.lane.b32.xlu2 %v3878_v59, %s4953_s8  ;;  %3956 = vrot.lane.b32.xlu0 %v3882_v46, %s4953_s8 }
 0x358   : > { %v3803_v49 = vpop.permute.xlu1 %3802  ;;  %v3631_v8 = vpop.permute.xlu0 %3630 }
 0x359   : > { %v3885_v2 = vmul.f32 %v3803_v49, %v6116_v30  ;;  %v6899_v23 = vadd.f32 %v3631_v8, %v3383_v26 }
 0x35a   : > { %3958 = vrot.lane.b32.xlu1 %v3883_v39, %s4953_s8 }
 0x35b   : > { %4939 = vtanh.f32 %v6899_v23  ;;  %3834 = vrot.lane.b32.xlu2 %v4938_v61, %s4952_s5  ;;  %3962 = vrot.lane.b32.xlu0 %v3885_v2, %s4953_s8 }
 0x360   : > { %v3805_v12 = vpop.permute.xlu2 %3804  ;;  %v3795_v46 = vpop.permute.xlu0 %3794 }
 0x361   : > { %v3886_v48 = vmul.f32 %v3805_v12, %v6143_v17  ;;  %v4940_v32 = vpop.eup %4939  ;;  %v3881_v30 = vmul.f32 %v3795_v46, %v6008_v11 }
 0x363   : > { %3964 = vrot.lane.b32.xlu1 %v3886_v48, %s4953_s8  ;;  %3822 = vrot.lane.b32.xlu2 %v4940_v32, %s4952_s5 }
 0x368   : > { %v3937_v36 = vpop.permute.xlu2 %3936  ;;  %v3801_v17 = vpop.permute.xlu0 %3800 }
 0x369   : > { %4033 = vst.msk [vmem:[%s6913_s11] sm:$0xff] %vm4032_vm13, %v3937_v36  ;;  %v3884_v45 = vmul.f32 %v3801_v17, %v6087_v41 }
 0x36a   : > { %4066 = vst.msk [vmem:[%s6913_s11] sm:$0xff] %vm4065_vm4, %v6667_v34 }
 0x36b   : > { %3954 = vrot.lane.b32.xlu2 %v3881_v30, %s4953_s8 }
 0x370   : > { %v3809_v59 = vpop.permute.xlu1 %3808  ;;  %v3807_v26 = vpop.permute.xlu0 %3806 }
 0x371   : > { %v3888_v43 = vmul.f32 %v3809_v59, %v6244_v55  ;;  %v3887_v11 = vmul.f32 %v3807_v26, %v6188_v28 }
 0x373   : > { %3960 = vrot.lane.b32.xlu2 %v3884_v45, %s4953_s8  ;;  %3968 = vrot.lane.b32.xlu0 %v3888_v43, %s4953_s8 }
 0x37b   : > { %3966 = vrot.lane.b32.xlu2 %v3887_v11, %s4953_s8  ;;  %v3811_v34 = vpop.permute.xlu2 %3810  ;;  %v3939_v49 = vpop.permute.xlu0 %3938 }
 0x37c   : > { %v3889_v39 = vmul.f32 %v3811_v34, %v6317_v37  ;;  %4034 = vst.msk [vmem:[%s6913_s11 + $0x8] sm:$0xff] %vm4032_vm13, %v3939_v49  ;;  %v7201_v49 = vld [vmem:[#allocation4_spill] sm:$0xff] }
 0x37d   : > { %4067 = vst.msk [vmem:[%s6913_s11 + $0x8] sm:$0xff] %vm4065_vm4, %v6659_v27 }
 0x37e   : > { %3970 = vrot.lane.b32.xlu1 %v3889_v39, %s4953_s8 }
 0x383   : > { %v3825_v41 = vpop.permute.xlu0 %3824  ;;  %v3941_v55 = vpop.permute.xlu1 %3940 }
 0x384   : > { %v3896_v8 = vmul.f32 %v3825_v41, %v6312_v21  ;;  %4035 = vst.msk [vmem:[%s6913_s11 + $0x10] sm:$0xff] %vm4032_vm13, %v3941_v55 }
 0x385   : > { %4068 = vst.msk [vmem:[%s6913_s11 + $0x10] sm:$0xff] %vm4065_vm4, %v6684_v15 }
 0x386   : > { %3984 = vrot.lane.b32.xlu2 %v3896_v8, %s4953_s8 }
 0x38b   : > { %v3813_v28 = vpop.permute.xlu0 %3812  ;;  %v3827_v37 = vpop.permute.xlu1 %3826 }
 0x38c   : > { %v3890_v27 = vmul.f32 %v3813_v28, %v6387_v44  ;;  %v3897_v2 = vmul.f32 %v3827_v37, %v6364_v35 }
 0x38d   : > { %v3943_v61 = vpop.permute.xlu2 %3942 }
 0x38e   : > { %3986 = vrot.lane.b32.xlu0 %v3897_v2, %s4953_s8  ;;  %3972 = vrot.lane.b32.xlu2 %v3890_v27, %s4953_s8  ;;  %4036 = vst.msk [vmem:[%s6913_s11 + $0x18] sm:$0xff] %vm4032_vm13, %v3943_v61 }
 0x38f   : > { %4069 = vst.msk [vmem:[%s6913_s11 + $0x18] sm:$0xff] %vm4065_vm4, %v6695_v5 }
 0x393   : > { %v3815_v21 = vpop.permute.xlu1 %3814 }
 0x394   : > { %v3891_v15 = vmul.f32 %v3815_v21, %v6456_v33 }
 0x395   : > { %v3829_v12 = vpop.permute.xlu2 %3828 }
 0x396   : > { %3974 = vrot.lane.b32.xlu0 %v3891_v15, %s4953_s8  ;;  %v3898_v35 = vmul.f32 %v3829_v12, %v6426_v13 }
 0x398   : > { %3988 = vrot.lane.b32.xlu1 %v3898_v35, %s4953_s8 }
 0x39a   : > { %v3945_v44 = vpop.permute.xlu0 %3944 }
 0x39b   : > { %4037 = vst.msk [vmem:[%s6913_s11 + $0x20] sm:$0xff] %vm4032_vm13, %v3945_v44 }
 0x39c   : > { %4070 = vst.msk [vmem:[%s6913_s11 + $0x20] sm:$0xff] %vm4065_vm4, %v6682_v38 }
 0x39d   : > { %v3817_v5 = vpop.permute.xlu2 %3816 }
 0x39e   : > { %v3892_v48 = vmul.f32 %v3817_v5, %v6519_v57 }
 0x3a0   : > { %3976 = vrot.lane.b32.xlu1 %v3892_v48, %s4953_s8 }
 0x3a2   : > { %v3831_v33 = vpop.permute.xlu0 %3830 }
 0x3a3   : > { %v3899_v32 = vmul.f32 %v3831_v33, %v6499_v54  ;;  %v3947_v46 = vpop.permute.xlu1 %3946 }
 0x3a4   : > { %4038 = vst.msk [vmem:[%s6913_s11 + $0x28] sm:$0xff] %vm4032_vm13, %v3947_v46 }
 0x3a5   : > { %4071 = vst.msk [vmem:[%s6913_s11 + $0x28] sm:$0xff] %vm4065_vm4, %v6717_v29  ;;  %3990 = vrot.lane.b32.xlu2 %v3899_v32, %s4953_s8 }
 0x3aa   : > { %v3819_v13 = vpop.permute.xlu0 %3818 }
 0x3ab   : > { %v3893_v38 = vmul.f32 %v3819_v13, %v6558_v24  ;;  %v3833_v57 = vpop.permute.xlu1 %3832 }
 0x3ac   : > { %v3900_v36 = vmul.f32 %v3833_v57, %v6540_v1 }
 0x3ad   : > { %v3949_v30 = vpop.permute.xlu2 %3948  ;;  %3978 = vrot.lane.b32.xlu2 %v3893_v38, %s4953_s8 }
 0x3ae   : > { %4039 = vst.msk [vmem:[%s6913_s11 + $0x30] sm:$0xff] %vm4032_vm13, %v3949_v30  ;;  %3992 = vrot.lane.b32.xlu0 %v3900_v36, %s4953_s8 }
 0x3af   : > { %4072 = vst.msk [vmem:[%s6913_s11 + $0x30] sm:$0xff] %vm4065_vm4, %v6730_v53 }
 0x3b3   : > { %v3821_v54 = vpop.permute.xlu1 %3820 }
 0x3b4   : > { %v3894_v29 = vmul.f32 %v3821_v54, %v6596_v31 }
 0x3b5   : > { %v3835_v17 = vpop.permute.xlu2 %3834  ;;  %v3951_v24 = vpop.permute.xlu0 %3950 }
 0x3b6   : > { %4040 = vst.msk [vmem:[%s6913_s11 + $0x38] sm:$0xff] %vm4032_vm13, %v3951_v24  ;;  %3980 = vrot.lane.b32.xlu0 %v3894_v29, %s4953_s8 }
 0x3b7   : > { %4073 = vst.msk [vmem:[%s6913_s11 + $0x38] sm:$0xff] %vm4065_vm4, %v6708_v3 }
 0x3bc   : > { %v3953_v1 = vpop.permute.xlu1 %3952 }
 0x3bd   : > { %v3837_v59 = vpop.permute.xlu0 %3836  ;;  %4041 = vst.msk [vmem:[%s6913_s11 + $0x40] sm:$0xff] %vm4032_vm13, %v3953_v1  ;;  %v3823_v53 = vpop.permute.xlu2 %3822 }
 0x3be   : > { %v3902_v31 = vmul.f32 %v3837_v59, %v6626_v0  ;;  %4074 = vst.msk [vmem:[%s6913_s11 + $0x40] sm:$0xff] %vm4065_vm4, %v6747_v62  ;;  %v3895_v45 = vmul.f32 %v3823_v53, %v6630_v52  ;;  %v3901_v0 = vmul.f32 %v3835_v17, %v6590_v60 }
 0x3c0   : > { %3996 = vrot.lane.b32.xlu2 %v3902_v31, %s4953_s8  ;;  %3982 = vrot.lane.b32.xlu1 %v3895_v45, %s4953_s8 }
 0x3c4   : > { %v3839_v3 = vpop.permute.xlu1 %3838 }
 0x3c5   : > { %v3957_v43 = vpop.permute.xlu0 %3956  ;;  %v3903_v26 = vmul.f32 %v3839_v3, %v6640_v4  ;;  %v3955_v11 = vpop.permute.xlu2 %3954 }
 0x3c6   : > { %4043 = vst.msk [vmem:[%s6913_s11 + $0x50] sm:$0xff] %vm4032_vm13, %v3957_v43 }
 0x3c7   : > { %4076 = vst.msk [vmem:[%s6913_s11 + $0x50] sm:$0xff] %vm4065_vm4, %v6723_v25  ;;  %3998 = vrot.lane.b32.xlu0 %v3903_v26, %s4953_s8 }
 0x3c8   : > { %4042 = vst.msk [vmem:[%s6913_s11 + $0x48] sm:$0xff] %vm4032_vm13, %v3955_v11  ;;  %3994 = vrot.lane.b32.xlu1 %v3901_v0, %s4953_s8 }
 0x3c9   : > { %4075 = vst.msk [vmem:[%s6913_s11 + $0x48] sm:$0xff] %vm4065_vm4, %v6753_v50 }
 0x3cc   : > { %v3959_v52 = vpop.permute.xlu1 %3958 }
 0x3cd   : > { %4044 = vst.msk [vmem:[%s6913_s11 + $0x58] sm:$0xff] %vm4032_vm13, %v3959_v52  ;;  %v3961_v60 = vpop.permute.xlu2 %3960  ;;  %v3963_v4 = vpop.permute.xlu0 %3962 }
 0x3ce   : > { %4077 = vst.msk [vmem:[%s6913_s11 + $0x58] sm:$0xff] %vm4065_vm4, %v6764_v18 }
 0x3cf   : > { %4045 = vst.msk [vmem:[%s6913_s11 + $0x60] sm:$0xff] %vm4032_vm13, %v3961_v60 }
 0x3d0   : > { %4078 = vst.msk [vmem:[%s6913_s11 + $0x60] sm:$0xff] %vm4065_vm4, %v6766_v22 }
 0x3d1   : > { %4046 = vst.msk [vmem:[%s6913_s11 + $0x68] sm:$0xff] %vm4032_vm13, %v3963_v4 }
 0x3d2   : > { %4079 = vst.msk [vmem:[%s6913_s11 + $0x68] sm:$0xff] %vm4065_vm4, %v6741_v9 }
 0x3d5   : > { %v3965_v25 = vpop.permute.xlu1 %3964  ;;  %v3967_v62 = vpop.permute.xlu2 %3966 }
 0x3d6   : > { %4047 = vst.msk [vmem:[%s6913_s11 + $0x70] sm:$0xff] %vm4032_vm13, %v3965_v25 }
 0x3d7   : > { %4048 = vst.msk [vmem:[%s6913_s11 + $0x78] sm:$0xff] %vm4032_vm13, %v3967_v62 }
 0x3d8   : > { %4081 = vst.msk [vmem:[%s6913_s11 + $0x78] sm:$0xff] %vm4065_vm4, %v6776_v16 }
 0x3d9   : > { %4080 = vst.msk [vmem:[%s6913_s11 + $0x70] sm:$0xff] %vm4065_vm4, %v6786_v42 }
 0x3e0   : > { %v3985_v50 = vpop.permute.xlu2 %3984 }
 0x3e1   : > { %4057 = vst.msk [vmem:[%s6913_s11 + $0xc0] sm:$0xff] %vm4032_vm13, %v3985_v50 }
 0x3e2   : > { %4090 = vst.msk [vmem:[%s6913_s11 + $0xc0] sm:$0xff] %vm4065_vm4, %v6794_v40 }
 0x3e5   : > { %v3969_v9 = vpop.permute.xlu0 %3968 }
 0x3e6   : > { %4049 = vst.msk [vmem:[%s6913_s11 + $0x80] sm:$0xff] %vm4032_vm13, %v3969_v9 }
 0x3e7   : > { %4082 = vst.msk [vmem:[%s6913_s11 + $0x80] sm:$0xff] %vm4065_vm4, %v6779_v63 }
 0x3e8   : > { %v3973_v18 = vpop.permute.xlu2 %3972 }
 0x3e9   : > { %4051 = vst.msk [vmem:[%s6913_s11 + $0x90] sm:$0xff] %vm4032_vm13, %v3973_v18 }
 0x3ea   : > { %4084 = vst.msk [vmem:[%s6913_s11 + $0x90] sm:$0xff] %vm4065_vm4, %v6808_v51  ;;  %v7199_v51 = vld [vmem:[#allocation5_spill] sm:$0xff] }
 0x3f0   : > { %v3971_v22 = vpop.permute.xlu1 %3970 }
 0x3f1   : > { %4050 = vst.msk [vmem:[%s6913_s11 + $0x88] sm:$0xff] %vm4032_vm13, %v3971_v22 }
 0x3f2   : > { %4083 = vst.msk [vmem:[%s6913_s11 + $0x88] sm:$0xff] %vm4065_vm4, %v6820_v6 }
 0x3ff   : > { %v3991_v16 = vpop.permute.xlu2 %3990 }
 0x400   : > { %4060 = vst.msk [vmem:[%s6913_s11 + $0xd8] sm:$0xff] %vm4032_vm13, %v3991_v16  ;;  %v3987_v63 = vpop.permute.xlu0 %3986 }
 0x401   : > { %4093 = vst.msk [vmem:[%s6913_s11 + $0xd8] sm:$0xff] %vm4065_vm4, %v6830_v19 }
 0x402   : > { %4058 = vst.msk [vmem:[%s6913_s11 + $0xc8] sm:$0xff] %vm4032_vm13, %v3987_v63 }
 0x403   : > { %4091 = vst.msk [vmem:[%s6913_s11 + $0xc8] sm:$0xff] %vm4065_vm4, %v6805_v7 }
 0x407   : > { %v3979_v42 = vpop.permute.xlu2 %3978 }
 0x408   : > { %4054 = vst.msk [vmem:[%s6913_s11 + $0xa8] sm:$0xff] %vm4032_vm13, %v3979_v42  ;;  %v3975_v40 = vpop.permute.xlu0 %3974 }
 0x409   : > { %4087 = vst.msk [vmem:[%s6913_s11 + $0xa8] sm:$0xff] %vm4065_vm4, %v6841_v20 }
 0x40a   : > { %4052 = vst.msk [vmem:[%s6913_s11 + $0x98] sm:$0xff] %vm4032_vm13, %v3975_v40  ;;  %v3989_v6 = vpop.permute.xlu1 %3988 }
 0x40b   : > { %4085 = vst.msk [vmem:[%s6913_s11 + $0x98] sm:$0xff] %vm4065_vm4, %v7199_v51 }
 0x40c   : > { %4059 = vst.msk [vmem:[%s6913_s11 + $0xd0] sm:$0xff] %vm4032_vm13, %v3989_v6 }
 0x40d   : > { %4092 = vst.msk [vmem:[%s6913_s11 + $0xd0] sm:$0xff] %vm4065_vm4, %v6848_v14  ;;  %v7200_v14 = vld [vmem:[#allocation10_spill] sm:$0xff] }
 0x412   : > { %v3977_v7 = vpop.permute.xlu1 %3976 }
 0x413   : > { %4053 = vst.msk [vmem:[%s6913_s11 + $0xa0] sm:$0xff] %vm4032_vm13, %v3977_v7 }
 0x414   : > { %4086 = vst.msk [vmem:[%s6913_s11 + $0xa0] sm:$0xff] %vm4065_vm4, %v6864_v56 }
 0x41a   : > { %v3997_v19 = vpop.permute.xlu2 %3996 }
 0x41b   : > { %4063 = vst.msk [vmem:[%s6913_s11 + $0xf0] sm:$0xff] %vm4032_vm13, %v3997_v19 }
 0x41c   : > { %4096 = vst.msk [vmem:[%s6913_s11 + $0xf0] sm:$0xff] %vm4065_vm4, %v6870_v47 }
 0x420   : > { %v3993_v20 = vpop.permute.xlu0 %3992 }
 0x421   : > { %4061 = vst.msk [vmem:[%s6913_s11 + $0xe0] sm:$0xff] %vm4032_vm13, %v3993_v20 }
 0x422   : > { %4094 = vst.msk [vmem:[%s6913_s11 + $0xe0] sm:$0xff] %vm4065_vm4, %v7200_v14 }
 0x428   : > { %v3981_v34 = vpop.permute.xlu0 %3980 }
 0x429   : > { %4055 = vst.msk [vmem:[%s6913_s11 + $0xb0] sm:$0xff] %vm4032_vm13, %v3981_v34 }
 0x42a   : > { %4088 = vst.msk [vmem:[%s6913_s11 + $0xb0] sm:$0xff] %vm4065_vm4, %v7201_v49 }
 0x432   : > { %v3983_v56 = vpop.permute.xlu1 %3982 }
 0x433   : > { %4056 = vst.msk [vmem:[%s6913_s11 + $0xb8] sm:$0xff] %vm4032_vm13, %v3983_v56 }
 0x434   : > { %4089 = vst.msk [vmem:[%s6913_s11 + $0xb8] sm:$0xff] %vm4065_vm4, %v6899_v23 }
 0x439   : > { %v3999_v39 = vpop.permute.xlu0 %3998 }
 0x43a   : > { %4064 = vst.msk [vmem:[%s6913_s11 + $0xf8] sm:$0xff] %vm4032_vm13, %v3999_v39  ;;  %v3995_v47 = vpop.permute.xlu1 %3994 }
 0x43b   : > { %4097 = vst.msk [vmem:[%s6913_s11 + $0xf8] sm:$0xff] %vm4065_vm4, %v6879_v58 }
 0x43c   : > { %4062 = vst.msk [vmem:[%s6913_s11 + $0xe8] sm:$0xff] %vm4032_vm13, %v3995_v47 }
 0x43d   : > { %4095 = vst.msk [vmem:[%s6913_s11 + $0xe8] sm:$0xff] %vm4065_vm4, %v6887_v10 }
 0x43e PF: > { %s14_s15 = sadd.s32 1, %s4948_s15  }
 0x43f   : > { %p11_p4 = scmp.ge.s32.totalorder %s14_s15, 4  }
 0x441   :  { %13 = sbr.rel (!%p11_p4) target bundleno = 1 (0x1), region = 71 }

</bundles_post_ra>
